<compile_context>
chip_gen: v7x
topology: tpu7x:2x2x1
jax: 0.10.0
libtpu: 0.0.40
codegen_flags: <defaults>
</compile_context>

<pallas_src>
import functools
import math

import jax
import jax.numpy as jnp
from jax.experimental import pallas as pl
from jax.experimental.pallas import tpu as pltpu


NUM_HEADS = 4
OUT_LANES = 128   # lane-dense output slab width (logits | boxes | pad)


def _round_up(x, m):
    return ((x + m - 1) // m) * m


# ----------------------------------------------------------------------------
# Host-side slab packing
# ----------------------------------------------------------------------------
def _pack_weight_slab(mats):
    """Pack (name, [in,out] f32 matrix) pairs into one bf16 slab.

    Each matrix sits at a 128-lane-aligned column block, rows zero-padded to a
    common height.  Returns (slab[R, C] bf16, {name: (col, in_dim, out_dim)}).
    """
    max_in = max(int(w.shape[0]) for _, w in mats)
    rows = _round_up(max_in, 16)               # bf16 packs 16 sublanes / vreg
    blocks, index, col = [], {}, 0
    for name, w in mats:
        rin, rout = int(w.shape[0]), int(w.shape[1])
        width = _round_up(rout, 128)
        blk = jnp.zeros((rows, width), jnp.float32).at[:rin, :rout].set(w)
        blocks.append(blk)
        index[name] = (col, rin, rout)
        col += width
    return jnp.concatenate(blocks, axis=1).astype(jnp.bfloat16), index


def _pack_vector_slab(vecs, width):
    """Pack (name, [r, c<=width] f32) pairs row-wise into one f32 slab.

    Returns (slab[R, width] f32, {name: (row, nrows, ncols)})."""
    rows, index, r0 = [], {}, 0
    for name, a in vecs:
        a = jnp.asarray(a, jnp.float32)
        r, c = int(a.shape[0]), int(a.shape[1])
        assert c <= width, (name, c, width)
        rows.append(jnp.pad(a, ((0, 0), (0, width - c))))
        index[name] = (r0, r, c)
        r0 += r
    total = _round_up(r0, 8)
    if total > r0:
        rows.append(jnp.zeros((total - r0, width), jnp.float32))
    return jnp.concatenate(rows, axis=0), index


# ----------------------------------------------------------------------------
# The fused forward-pass kernel (one grid program per batch chunk)
# ----------------------------------------------------------------------------
def _detr_kernel(patches_ref, w_ref, v_ref, pos_ref, out_ref, *,
                 w_index, v_index, Bb, T, Q, D, num_heads, n_cls):
    f32, bf16 = jnp.float32, jnp.bfloat16

    def W(name):                                   # bf16 weight tile (static slice)
        col, rin, rout = w_index[name]
        return w_ref[0:rin, col:col + rout]

    def V(name):                                   # f32 bias / LN rows (static slice)
        r, nr, nc = v_index[name]
        return v_ref[r:r + nr, 0:nc]

    def lin(x, wname, bname, act=None):
        y = jnp.dot(x.astype(bf16), W(wname), preferred_element_type=f32) + V(bname)
        if act == "relu":
            y = jnp.maximum(y, 0.0)
        return y

    def ln(x, name, eps=1e-5):
        gb = V(name)                               # [2, D] = (gamma; beta)
        mean = jnp.mean(x, axis=-1, keepdims=True)
        var = jnp.mean(jnp.square(x - mean), axis=-1, keepdims=True)
        return (x - mean) * jax.lax.rsqrt(var + eps) * gb[0:1, :] + gb[1:2, :]

    def cat0(parts):
        return parts[0] if len(parts) == 1 else jnp.concatenate(parts, axis=0)

    # Per-head lane masks [1, D], built once (hoisted out of all loops).
    dh = D // num_heads
    lane_d = jax.lax.broadcasted_iota(jnp.int32, (1, D), 1)
    head_masks = [((lane_d >= h * dh) & (lane_d < (h + 1) * dh)).astype(bf16)
                  for h in range(num_heads)]

    def mha(q, k, v):
        """Head-packed multi-head attention.  q already carries 1/sqrt(dh)
        (folded into the Q weights).  One K=D-contraction matmul for all head
        scores (block-diagonal K), one for P@V (block-diagonal V)."""
        Tk = k.shape[0]
        qb, kb, vb = q.astype(bf16), k.astype(bf16), v.astype(bf16)   # cast once
        k_bd = cat0([kb * m for m in head_masks])            # [H*Tk, D]
        v_bd = cat0([vb * m for m in head_masks])            # [H*Tk, D]
        s = jax.lax.dot_general(qb, k_bd, (((1,), (1,)), ((), ())),
                                preferred_element_type=f32)  # [Tq, H*Tk]
        probs = []
        for h in range(num_heads):                           # static, unrolled
            sh = s[:, h * Tk:(h + 1) * Tk]
            m = jnp.max(sh, axis=-1, keepdims=True)
            e = jnp.exp(sh - m)
            den = jnp.sum(e, axis=-1, keepdims=True)
            probs.append(e * pl.reciprocal(den, approx=True))
        p = jnp.concatenate(probs, axis=-1).astype(bf16)     # [Tq, H*Tk]
        return jnp.dot(p, v_bd, preferred_element_type=f32)  # [Tq, D]

    # --- backbone patch-conv (im2col matmul) + ReLU, then 1x1 projection ----
    x = patches_ref[...]                                     # [Bb*T, C*p*p]
    feat = lin(x, "backbone_w", "backbone_b", act="relu")
    src = lin(feat, "proj_w", "proj_b")                      # [Bb*T, D]

    pos = pos_ref[...]                                       # [T, D]
    pos_t = cat0([pos] * Bb)                                 # [Bb*T, D]

    # --- encoder layer (post-norm); q,k fused into one lane-aligned matmul ---
    qk = lin(src + pos_t, "enc_wqk", "enc_bqk")              # [Bb*T, 2*128]
    v = lin(src, "enc_wv", "enc_bv")                         # [Bb*T, D]
    q_e, k_e = qk[:, 0:D], qk[:, OUT_LANES:OUT_LANES + D]    # 128-aligned slices
    attn = cat0([mha(q_e[b * T:(b + 1) * T],
                     k_e[b * T:(b + 1) * T],
                     v[b * T:(b + 1) * T]) for b in range(Bb)])
    src2 = lin(attn, "enc_wo", "enc_bo")
    src = ln(src + src2, "enc_ln1")
    ff = lin(src, "enc_ff1_w", "enc_ff1_b", act="relu")
    ff = lin(ff, "enc_ff2_w", "enc_ff2_b")
    memory = ln(src + ff, "enc_ln2")                         # [Bb*T, D]

    # --- decoder layer.  tgt starts at 0, so the self-attention block is
    #     query/image-independent; its post-LN result was folded host-side
    #     into a single [1, D] row ("dec_sa_row"). ---
    tgt_row = V("dec_sa_row")                                # [1, D]
    query_pos = V("query_embed")                             # [Q, D]
    tgt = jnp.broadcast_to(tgt_row, (Q, D))

    q_c = lin(tgt + query_pos, "crs_wq", "crs_bq")           # [Q, D] (batch-invariant)
    k_c = lin(memory + pos_t, "crs_wk", "crs_bk")            # [Bb*T, D]
    v_c = lin(memory, "crs_wv", "crs_bv")                    # [Bb*T, D]
    attn = cat0([mha(q_c,
                     k_c[b * T:(b + 1) * T],
                     v_c[b * T:(b + 1) * T]) for b in range(Bb)])   # [Bb*Q, D]
    tgt_full = jnp.broadcast_to(tgt_row, (Bb * Q, D))
    tgt2 = lin(attn, "crs_wo", "crs_bo")
    t = ln(tgt_full + tgt2, "dec_ln2")
    ff = lin(t, "dec_ff1_w", "dec_ff1_b", act="relu")
    ff = lin(ff, "dec_ff2_w", "dec_ff2_b")
    t = ln(t + ff, "dec_ln3")
    hs = ln(t, "dec_norm")                                   # [Bb*Q, D]

    # --- heads: [class (padded to 128 lanes) | bbox-MLP layer 1] fused -------
    y = lin(hs, "head1_w", "head1_b")                        # [Bb*Q, 128 + D]
    logits_wide = y[:, 0:OUT_LANES]                          # lanes >= n_cls are 0
    bb = jnp.maximum(y[:, OUT_LANES:], 0.0)                  # [Bb*Q, D]
    bb = lin(bb, "bbox2_w", "bbox2_b", act="relu")
    boxes_wide = jax.nn.sigmoid(lin(bb, "bbox3_w", "bbox3_b"))  # [Bb*Q, 128]

    # Lane-dense output slab: lanes [0,n_cls) = logits, [n_cls,n_cls+4) = boxes.
    lane = jax.lax.broadcasted_iota(jnp.int32, (1, OUT_LANES), 1)
    out_ref[...] = jnp.where(lane < n_cls, logits_wide, boxes_wide)


# ----------------------------------------------------------------------------
# Glue: positional encoding, parameter init, weight packing, wrapper
# ----------------------------------------------------------------------------
def sine_position_embedding(H, W, D):
    """DETR-style 2D sine positional encoding -> [1, H*W, D]."""
    num_pos_feats = D // 2
    temperature = 10000.0
    eps = 1e-6
    scale = 2.0 * math.pi
    ones = jnp.ones((H, W), jnp.float32)
    y_embed = jnp.cumsum(ones, axis=0)
    x_embed = jnp.cumsum(ones, axis=1)
    y_embed = y_embed / (y_embed[-1:, :] + eps) * scale
    x_embed = x_embed / (x_embed[:, -1:] + eps) * scale
    dim_t = jnp.arange(num_pos_feats, dtype=jnp.float32)
    dim_t = temperature ** (2.0 * jnp.floor(dim_t / 2.0) / num_pos_feats)
    pos_x = x_embed[:, :, None] / dim_t
    pos_y = y_embed[:, :, None] / dim_t
    pos_x = jnp.stack(
        [jnp.sin(pos_x[:, :, 0::2]), jnp.cos(pos_x[:, :, 1::2])], axis=3
    ).reshape(H, W, -1)
    pos_y = jnp.stack(
        [jnp.sin(pos_y[:, :, 0::2]), jnp.cos(pos_y[:, :, 1::2])], axis=3
    ).reshape(H, W, -1)
    pos = jnp.concatenate([pos_y, pos_x], axis=2)
    return pos.reshape(1, H * W, D)


class _KeyGen:
    def __init__(self, key):
        self._key = key

    def __call__(self):
        self._key, sub = jax.random.split(self._key)
        return sub


def _init_linear(kg, in_dim, out_dim, scale=0.05):
    w = scale * jax.random.normal(kg(), (in_dim, out_dim), jnp.float32)
    b = jnp.zeros((out_dim,), jnp.float32)
    return w, b


def _init_mha(kg, D):
    p = {}
    p["wq"], p["bq"] = _init_linear(kg, D, D)
    p["wk"], p["bk"] = _init_linear(kg, D, D)
    p["wv"], p["bv"] = _init_linear(kg, D, D)
    p["wo"], p["bo"] = _init_linear(kg, D, D)
    return p


def _init_ln(D):
    return jnp.ones((D,), jnp.float32), jnp.zeros((D,), jnp.float32)


def init_detr_params(key, *, in_ch=3, patch=4, c_backbone=16, hidden=32,
                     ffn=64, num_queries=8, num_classes=4):
    kg = _KeyGen(key)
    p = {"patch": patch, "hidden": hidden, "num_queries": num_queries}

    p["backbone_w"], p["backbone_b"] = _init_linear(kg, in_ch * patch * patch, c_backbone)
    p["proj_w"], p["proj_b"] = _init_linear(kg, c_backbone, hidden)

    # Encoder layer (post-norm).
    p["enc_attn"] = _init_mha(kg, hidden)
    p["enc_ln1_g"], p["enc_ln1_b"] = _init_ln(hidden)
    p["enc_ff1_w"], p["enc_ff1_b"] = _init_linear(kg, hidden, ffn)
    p["enc_ff2_w"], p["enc_ff2_b"] = _init_linear(kg, ffn, hidden)
    p["enc_ln2_g"], p["enc_ln2_b"] = _init_ln(hidden)

    # Decoder layer (post-norm).
    p["dec_self_attn"] = _init_mha(kg, hidden)
    p["dec_ln1_g"], p["dec_ln1_b"] = _init_ln(hidden)
    p["dec_cross_attn"] = _init_mha(kg, hidden)
    p["dec_ln2_g"], p["dec_ln2_b"] = _init_ln(hidden)
    p["dec_ff1_w"], p["dec_ff1_b"] = _init_linear(kg, hidden, ffn)
    p["dec_ff2_w"], p["dec_ff2_b"] = _init_linear(kg, ffn, hidden)
    p["dec_ln3_g"], p["dec_ln3_b"] = _init_ln(hidden)
    p["dec_norm_g"], p["dec_norm_b"] = _init_ln(hidden)

    p["query_embed"] = 0.05 * jax.random.normal(kg(), (num_queries, hidden), jnp.float32)

    p["class_w"], p["class_b"] = _init_linear(kg, hidden, num_classes + 1)
    p["bbox1_w"], p["bbox1_b"] = _init_linear(kg, hidden, hidden)
    p["bbox2_w"], p["bbox2_b"] = _init_linear(kg, hidden, hidden)
    p["bbox3_w"], p["bbox3_b"] = _init_linear(kg, hidden, 4)
    return p


def prepare_detr_weights(p, *, num_heads=NUM_HEADS):
    """Fold / fuse / pack the raw params into two slabs for the fused kernel.

    * Q/K weights fused at 128-lane-aligned columns; 1/sqrt(dh) folded into Q.
    * Decoder self-attention (dead for tgt==0, 1 decoder layer) folded into a
      single precomputed post-LN row.
    * Class head padded to 128 lanes and fused with bbox-MLP layer 1; final
      bbox layer padded so boxes land at lanes [n_cls, n_cls+4) of a 128-wide
      sigmoid output (no in-kernel lane concat needed).
    * All matrices -> one bf16 weight slab; all biases/LN/query rows -> one
      f32 vector slab.
    """
    D = p["hidden"]
    dh = D // num_heads
    scale = 1.0 / math.sqrt(dh)
    n_cls = int(p["class_w"].shape[1])           # num_classes + 1
    assert n_cls + 4 <= OUT_LANES, "class count too large for the output slab"

    ea, ca, sa = p["enc_attn"], p["dec_cross_attn"], p["dec_self_attn"]

    def b2(b):
        return b.reshape(1, -1)

    def lnp(g, b):
        return jnp.stack([g, b], axis=0)

    # Fused encoder Q|K at 128-aligned columns (q: [0,D), k: [128,128+D)).
    enc_wqk = jnp.zeros((D, 2 * OUT_LANES), jnp.float32)
    enc_wqk = enc_wqk.at[:, :D].set(ea["wq"] * scale)
    enc_wqk = enc_wqk.at[:, OUT_LANES:OUT_LANES + D].set(ea["wk"])
    enc_bqk = jnp.zeros((1, 2 * OUT_LANES), jnp.float32)
    enc_bqk = enc_bqk.at[0, :D].set(ea["bq"] * scale)
    enc_bqk = enc_bqk.at[0, OUT_LANES:OUT_LANES + D].set(ea["bk"])

    # Dead decoder self-attention -> single post-LN row (valid for tgt == 0).
    row = sa["bv"] @ sa["wo"] + sa["bo"]
    mean = jnp.mean(row)
    var = jnp.mean(jnp.square(row - mean))
    dec_sa_row = ((row - mean) * jax.lax.rsqrt(var + 1e-5)
                  * p["dec_ln1_g"] + p["dec_ln1_b"]).reshape(1, D)

    # Fused heads: [class padded to 128 | bbox1(D)].
    head1_w = jnp.zeros((D, OUT_LANES + D), jnp.float32)
    head1_w = head1_w.at[:, :n_cls].set(p["class_w"])
    head1_w = head1_w.at[:, OUT_LANES:].set(p["bbox1_w"])
    head1_b = jnp.zeros((1, OUT_LANES + D), jnp.float32)
    head1_b = head1_b.at[0, :n_cls].set(p["class_b"])
    head1_b = head1_b.at[0, OUT_LANES:].set(p["bbox1_b"])

    # Final bbox layer padded so boxes occupy lanes [n_cls, n_cls+4).
    bbox3_w = jnp.zeros((D, OUT_LANES), jnp.float32).at[:, n_cls:n_cls + 4].set(p["bbox3_w"])
    bbox3_b = jnp.zeros((1, OUT_LANES), jnp.float32).at[0, n_cls:n_cls + 4].set(p["bbox3_b"])

    mats = [
        ("backbone_w", p["backbone_w"]),
        ("proj_w", p["proj_w"]),
        ("enc_wqk", enc_wqk),
        ("enc_wv", ea["wv"]),
        ("enc_wo", ea["wo"]),
        ("enc_ff1_w", p["enc_ff1_w"]),
        ("enc_ff2_w", p["enc_ff2_w"]),
        ("crs_wq", ca["wq"] * scale),
        ("crs_wk", ca["wk"]),
        ("crs_wv", ca["wv"]),
        ("crs_wo", ca["wo"]),
        ("dec_ff1_w", p["dec_ff1_w"]),
        ("dec_ff2_w", p["dec_ff2_w"]),
        ("head1_w", head1_w),
        ("bbox2_w", p["bbox2_w"]),
        ("bbox3_w", bbox3_w),
    ]
    w_slab, w_index = _pack_weight_slab(mats)

    vecs = [
        ("query_embed", p["query_embed"]),
        ("dec_sa_row", dec_sa_row),
        ("backbone_b", b2(p["backbone_b"])),
        ("proj_b", b2(p["proj_b"])),
        ("enc_bqk", enc_bqk),
        ("enc_bv", b2(ea["bv"])),
        ("enc_bo", b2(ea["bo"])),
        ("enc_ln1", lnp(p["enc_ln1_g"], p["enc_ln1_b"])),
        ("enc_ff1_b", b2(p["enc_ff1_b"])),
        ("enc_ff2_b", b2(p["enc_ff2_b"])),
        ("enc_ln2", lnp(p["enc_ln2_g"], p["enc_ln2_b"])),
        ("crs_bq", b2(ca["bq"] * scale)),
        ("crs_bk", b2(ca["bk"])),
        ("crs_bv", b2(ca["bv"])),
        ("crs_bo", b2(ca["bo"])),
        ("dec_ln2", lnp(p["dec_ln2_g"], p["dec_ln2_b"])),
        ("dec_ff1_b", b2(p["dec_ff1_b"])),
        ("dec_ff2_b", b2(p["dec_ff2_b"])),
        ("dec_ln3", lnp(p["dec_ln3_g"], p["dec_ln3_b"])),
        ("dec_norm", lnp(p["dec_norm_g"], p["dec_norm_b"])),
        ("head1_b", head1_b),
        ("bbox2_b", b2(p["bbox2_b"])),
        ("bbox3_b", bbox3_b),
    ]
    v_slab, v_index = _pack_vector_slab(vecs, width=2 * OUT_LANES)

    meta = dict(patch=p["patch"], hidden=p["hidden"],
                num_queries=p["num_queries"], num_classes=n_cls - 1,
                num_heads=num_heads, w_index=w_index, v_index=v_index)
    return (w_slab, v_slab), meta


def _num_batch_blocks(B):
    """v7x has 2 TensorCores/chip -> keep 2 'parallel' grid steps; v5e/v6e
    have 1 TC -> fold the whole batch into a single grid step."""
    try:
        kind = jax.devices()[0].device_kind.lower()
    except Exception:
        kind = ""
    if ("v7" in kind or "tpu7" in kind) and B % 2 == 0:
        return 2
    return 1


def detr_forward(weights, meta, image):
    """image: [B, 3, H, W] (NCHW, like PyTorch).  Returns DETR output dict."""
    w_slab, v_slab = weights
    B, C, H, W = image.shape
    patch = meta["patch"]
    D = meta["hidden"]
    Q = meta["num_queries"]
    num_heads = meta["num_heads"]
    num_classes = meta["num_classes"]
    n_cls = num_classes + 1
    Hf, Wf = H // patch, W // patch
    T = Hf * Wf
    P2C = C * patch * patch

    # im2col glue (plain JAX reshape/transpose) -> [B*T, C*patch*patch].
    patches = image.reshape(B, C, Hf, patch, Wf, patch)
    patches = patches.transpose(0, 2, 4, 1, 3, 5).reshape(B * T, P2C)

    pos = sine_position_embedding(Hf, Wf, D).reshape(T, D)

    nblk = _num_batch_blocks(B)
    Bb = B // nblk

    kernel = functools.partial(
        _detr_kernel,
        w_index=meta["w_index"], v_index=meta["v_index"],
        Bb=Bb, T=T, Q=Q, D=D, num_heads=num_heads, n_cls=n_cls)

    out = pl.pallas_call(
        kernel,
        grid=(nblk,),
        in_specs=[
            pl.BlockSpec((Bb * T, P2C), lambda i: (i, 0)),       # patches chunk
            pl.BlockSpec(w_slab.shape, lambda i: (0, 0)),        # bf16 weight slab
            pl.BlockSpec(v_slab.shape, lambda i: (0, 0)),        # f32 bias/LN slab
            pl.BlockSpec(pos.shape, lambda i: (0, 0)),           # positional enc.
        ],
        out_specs=pl.BlockSpec((Bb * Q, OUT_LANES), lambda i: (i, 0)),
        out_shape=jax.ShapeDtypeStruct((B * Q, OUT_LANES), jnp.float32),
        compiler_params=pltpu.CompilerParams(
            dimension_semantics=("parallel",)),
    )(patches, w_slab, v_slab, pos)

    out = out.reshape(B, Q, OUT_LANES)
    logits = out[:, :, :n_cls]
    boxes = out[:, :, n_cls:n_cls + 4]
    return {"pred_logits": logits, "pred_boxes": boxes}


# ----------------------------------------------------------------------------
if __name__ == "__main__":
    key = jax.random.PRNGKey(0)
    k_param, k_img = jax.random.split(key)

    params = init_detr_params(k_param)
    weights, meta = prepare_detr_weights(params)
    image = jax.random.normal(k_img, (2, 3, 32, 32), jnp.float32)   # NCHW

    fwd = jax.jit(functools.partial(detr_forward, weights, meta))
    out = jax.block_until_ready(fwd(image))

    assert out["pred_logits"].shape == (2, 8, 5)
    assert out["pred_boxes"].shape == (2, 8, 4)
    assert bool(jnp.all(jnp.isfinite(out["pred_logits"])))
    assert bool(jnp.all((out["pred_boxes"] >= 0.0) & (out["pred_boxes"] <= 1.0)))
    print("KERNEL_OK")
</pallas_src>

<mosaic_0001>
module attributes {stable_mosaic.version = 11 : i64} {
  func.func @_detr_kernel(%arg0: i32, %arg1: memref<128x48xf32, #tpu.memory_space<vmem>>, %arg2: memref<64x2304xbf16, #tpu.memory_space<vmem>>, %arg3: memref<40x256xf32, #tpu.memory_space<vmem>>, %arg4: memref<64x32xf32, #tpu.memory_space<vmem>>, %arg5: memref<16x128xf32, #tpu.memory_space<vmem>>) attributes {dimension_semantics = [#tpu.dimension_semantics<parallel>], iteration_bounds = array<i64: 1>, scalar_prefetch = 0 : i64, scratch_operands = 0 : i64, tpu.core_type = #tpu.core_type<tc>, window_params = [{transform_indices = @transform_0, window_bounds = array<i64: 128, 48>}, {pipeline_mode = #tpu.pipeline_mode<synchronous>, transform_indices = @transform_1, window_bounds = array<i64: 64, 2304>}, {pipeline_mode = #tpu.pipeline_mode<synchronous>, transform_indices = @transform_2, window_bounds = array<i64: 40, 256>}, {pipeline_mode = #tpu.pipeline_mode<synchronous>, transform_indices = @transform_3, window_bounds = array<i64: 64, 32>}, {transform_indices = @transform_4, window_bounds = array<i64: 16, 128>}]} {
    %0 = tpu.iota {dimensions = array<i32: 1>} : vector<1x32xi32>
    %c0_i32 = arith.constant 0 : i32
    %1 = vector.broadcast %c0_i32 : i32 to vector<1x32xi32>
    %2 = arith.cmpi sge, %0, %1 : vector<1x32xi32>
    %c8_i32 = arith.constant 8 : i32
    %3 = vector.broadcast %c8_i32 : i32 to vector<1x32xi32>
    %4 = arith.cmpi slt, %0, %3 : vector<1x32xi32>
    %5 = arith.andi %2, %4 : vector<1x32xi1>
    %6 = arith.extui %5 : vector<1x32xi1> to vector<1x32xi32>
    %7 = arith.sitofp %6 : vector<1x32xi32> to vector<1x32xf32>
    %8 = arith.truncf %7 : vector<1x32xf32> to vector<1x32xbf16>
    %c8_i32_0 = arith.constant 8 : i32
    %9 = vector.broadcast %c8_i32_0 : i32 to vector<1x32xi32>
    %10 = arith.cmpi sge, %0, %9 : vector<1x32xi32>
    %c16_i32 = arith.constant 16 : i32
    %11 = vector.broadcast %c16_i32 : i32 to vector<1x32xi32>
    %12 = arith.cmpi slt, %0, %11 : vector<1x32xi32>
    %13 = arith.andi %10, %12 : vector<1x32xi1>
    %14 = arith.extui %13 : vector<1x32xi1> to vector<1x32xi32>
    %15 = arith.sitofp %14 : vector<1x32xi32> to vector<1x32xf32>
    %16 = arith.truncf %15 : vector<1x32xf32> to vector<1x32xbf16>
    %c16_i32_1 = arith.constant 16 : i32
    %17 = vector.broadcast %c16_i32_1 : i32 to vector<1x32xi32>
    %18 = arith.cmpi sge, %0, %17 : vector<1x32xi32>
    %c24_i32 = arith.constant 24 : i32
    %19 = vector.broadcast %c24_i32 : i32 to vector<1x32xi32>
    %20 = arith.cmpi slt, %0, %19 : vector<1x32xi32>
    %21 = arith.andi %18, %20 : vector<1x32xi1>
    %22 = arith.extui %21 : vector<1x32xi1> to vector<1x32xi32>
    %23 = arith.sitofp %22 : vector<1x32xi32> to vector<1x32xf32>
    %24 = arith.truncf %23 : vector<1x32xf32> to vector<1x32xbf16>
    %c24_i32_2 = arith.constant 24 : i32
    %25 = vector.broadcast %c24_i32_2 : i32 to vector<1x32xi32>
    %26 = arith.cmpi sge, %0, %25 : vector<1x32xi32>
    %c32_i32 = arith.constant 32 : i32
    %27 = vector.broadcast %c32_i32 : i32 to vector<1x32xi32>
    %28 = arith.cmpi slt, %0, %27 : vector<1x32xi32>
    %29 = arith.andi %26, %28 : vector<1x32xi1>
    %30 = arith.extui %29 : vector<1x32xi1> to vector<1x32xi32>
    %31 = arith.sitofp %30 : vector<1x32xi32> to vector<1x32xf32>
    %32 = arith.truncf %31 : vector<1x32xf32> to vector<1x32xbf16>
    %c0 = arith.constant 0 : index
    %c0_3 = arith.constant 0 : index
    %33 = vector.load %arg1[%c0, %c0_3] : memref<128x48xf32, #tpu.memory_space<vmem>>, vector<128x48xf32>
    %34 = arith.truncf %33 : vector<128x48xf32> to vector<128x48xbf16>
    %c0_4 = arith.constant 0 : index
    %c0_5 = arith.constant 0 : index
    %35 = vector.load %arg2[%c0_4, %c0_5] : memref<64x2304xbf16, #tpu.memory_space<vmem>>, vector<48x16xbf16>
    %cst = arith.constant dense<0.000000e+00> : vector<128x16xf32>
    %36 = tpu.matmul %34, %35, %cst {dimension_numbers = #tpu.dot_dimension_numbers<[1], [0], [0], [1], [0, 0, 1, 1], [], []>} : vector<128x48xbf16>, vector<48x16xbf16>, vector<128x16xf32> -> vector<128x16xf32>
    %c9 = arith.constant 9 : index
    %c0_6 = arith.constant 0 : index
    %37 = vector.load %arg3[%c9, %c0_6] : memref<40x256xf32, #tpu.memory_space<vmem>>, vector<1x16xf32>
    %38 = vector.broadcast %37 : vector<1x16xf32> to vector<128x16xf32>
    %39 = arith.addf %36, %38 : vector<128x16xf32>
    %cst_7 = arith.constant 0.000000e+00 : f32
    %40 = vector.broadcast %cst_7 : f32 to vector<128x16xf32>
    %41 = arith.maximumf %39, %40 : vector<128x16xf32>
    %42 = arith.truncf %41 : vector<128x16xf32> to vector<128x16xbf16>
    %c0_8 = arith.constant 0 : index
    %c128 = arith.constant 128 : index
    %43 = vector.load %arg2[%c0_8, %c128] : memref<64x2304xbf16, #tpu.memory_space<vmem>>, vector<16x32xbf16>
    %cst_9 = arith.constant dense<0.000000e+00> : vector<128x32xf32>
    %44 = tpu.matmul %42, %43, %cst_9 {dimension_numbers = #tpu.dot_dimension_numbers<[1], [0], [0], [1], [0, 0, 1, 1], [], []>} : vector<128x16xbf16>, vector<16x32xbf16>, vector<128x32xf32> -> vector<128x32xf32>
    %c10 = arith.constant 10 : index
    %c0_10 = arith.constant 0 : index
    %45 = vector.load %arg3[%c10, %c0_10] : memref<40x256xf32, #tpu.memory_space<vmem>>, vector<1x32xf32>
    %46 = vector.broadcast %45 : vector<1x32xf32> to vector<128x32xf32>
    %47 = arith.addf %44, %46 : vector<128x32xf32>
    %c0_11 = arith.constant 0 : index
    %c0_12 = arith.constant 0 : index
    %48 = vector.load %arg4[%c0_11, %c0_12] : memref<64x32xf32, #tpu.memory_space<vmem>>, vector<64x32xf32>
    %49 = tpu.concatenate %48, %48 in 0 : vector<64x32xf32>, vector<64x32xf32> -> vector<128x32xf32>
    %50 = arith.addf %47, %49 : vector<128x32xf32>
    %51 = arith.truncf %50 : vector<128x32xf32> to vector<128x32xbf16>
    %c0_13 = arith.constant 0 : index
    %c256 = arith.constant 256 : index
    %52 = vector.load %arg2[%c0_13, %c256] : memref<64x2304xbf16, #tpu.memory_space<vmem>>, vector<32x256xbf16>
    %cst_14 = arith.constant dense<0.000000e+00> : vector<128x256xf32>
    %53 = tpu.matmul %51, %52, %cst_14 {dimension_numbers = #tpu.dot_dimension_numbers<[1], [0], [0], [1], [0, 0, 1, 1], [], []>} : vector<128x32xbf16>, vector<32x256xbf16>, vector<128x256xf32> -> vector<128x256xf32>
    %c11 = arith.constant 11 : index
    %c0_15 = arith.constant 0 : index
    %54 = vector.load %arg3[%c11, %c0_15] : memref<40x256xf32, #tpu.memory_space<vmem>>, vector<1x256xf32>
    %55 = vector.broadcast %54 : vector<1x256xf32> to vector<128x256xf32>
    %56 = arith.addf %53, %55 : vector<128x256xf32>
    %57 = arith.truncf %47 : vector<128x32xf32> to vector<128x32xbf16>
    %c0_16 = arith.constant 0 : index
    %c512 = arith.constant 512 : index
    %58 = vector.load %arg2[%c0_16, %c512] : memref<64x2304xbf16, #tpu.memory_space<vmem>>, vector<32x32xbf16>
    %cst_17 = arith.constant dense<0.000000e+00> : vector<128x32xf32>
    %59 = tpu.matmul %57, %58, %cst_17 {dimension_numbers = #tpu.dot_dimension_numbers<[1], [0], [0], [1], [0, 0, 1, 1], [], []>} : vector<128x32xbf16>, vector<32x32xbf16>, vector<128x32xf32> -> vector<128x32xf32>
    %c12 = arith.constant 12 : index
    %c0_18 = arith.constant 0 : index
    %60 = vector.load %arg3[%c12, %c0_18] : memref<40x256xf32, #tpu.memory_space<vmem>>, vector<1x32xf32>
    %61 = vector.broadcast %60 : vector<1x32xf32> to vector<128x32xf32>
    %62 = arith.addf %59, %61 : vector<128x32xf32>
    %63 = vector.extract_strided_slice %56 {offsets = [0, 0], sizes = [128, 32], strides = [1, 1]} : vector<128x256xf32> to vector<128x32xf32>
    %64 = vector.extract_strided_slice %56 {offsets = [0, 128], sizes = [128, 32], strides = [1, 1]} : vector<128x256xf32> to vector<128x32xf32>
    %65 = vector.extract_strided_slice %63 {offsets = [0, 0], sizes = [64, 32], strides = [1, 1]} : vector<128x32xf32> to vector<64x32xf32>
    %66 = vector.extract_strided_slice %64 {offsets = [0, 0], sizes = [64, 32], strides = [1, 1]} : vector<128x32xf32> to vector<64x32xf32>
    %67 = vector.extract_strided_slice %62 {offsets = [0, 0], sizes = [64, 32], strides = [1, 1]} : vector<128x32xf32> to vector<64x32xf32>
    %68 = arith.truncf %65 : vector<64x32xf32> to vector<64x32xbf16>
    %69 = arith.truncf %66 : vector<64x32xf32> to vector<64x32xbf16>
    %70 = arith.truncf %67 : vector<64x32xf32> to vector<64x32xbf16>
    %71 = vector.broadcast %8 : vector<1x32xbf16> to vector<64x32xbf16>
    %72 = arith.mulf %69, %71 : vector<64x32xbf16>
    %73 = vector.broadcast %16 : vector<1x32xbf16> to vector<64x32xbf16>
    %74 = arith.mulf %69, %73 : vector<64x32xbf16>
    %75 = vector.broadcast %24 : vector<1x32xbf16> to vector<64x32xbf16>
    %76 = arith.mulf %69, %75 : vector<64x32xbf16>
    %77 = vector.broadcast %32 : vector<1x32xbf16> to vector<64x32xbf16>
    %78 = arith.mulf %69, %77 : vector<64x32xbf16>
    %79 = tpu.concatenate %72, %74, %76, %78 in 0 : vector<64x32xbf16>, vector<64x32xbf16>, vector<64x32xbf16>, vector<64x32xbf16> -> vector<256x32xbf16>
    %80 = vector.broadcast %8 : vector<1x32xbf16> to vector<64x32xbf16>
    %81 = arith.mulf %70, %80 : vector<64x32xbf16>
    %82 = vector.broadcast %16 : vector<1x32xbf16> to vector<64x32xbf16>
    %83 = arith.mulf %70, %82 : vector<64x32xbf16>
    %84 = vector.broadcast %24 : vector<1x32xbf16> to vector<64x32xbf16>
    %85 = arith.mulf %70, %84 : vector<64x32xbf16>
    %86 = vector.broadcast %32 : vector<1x32xbf16> to vector<64x32xbf16>
    %87 = arith.mulf %70, %86 : vector<64x32xbf16>
    %88 = tpu.concatenate %81, %83, %85, %87 in 0 : vector<64x32xbf16>, vector<64x32xbf16>, vector<64x32xbf16>, vector<64x32xbf16> -> vector<256x32xbf16>
    %cst_19 = arith.constant dense<0.000000e+00> : vector<64x256xf32>
    %89 = tpu.matmul %68, %79, %cst_19 {dimension_numbers = #tpu.dot_dimension_numbers<[1], [1], [0], [0], [0, 0, 1, 0], [], []>} : vector<64x32xbf16>, vector<256x32xbf16>, vector<64x256xf32> -> vector<64x256xf32>
    %90 = vector.extract_strided_slice %89 {offsets = [0, 0], sizes = [64, 64], strides = [1, 1]} : vector<64x256xf32> to vector<64x64xf32>
    %cst_20 = arith.constant dense<0xFF800000> : vector<64xf32>
    %91 = vector.multi_reduction <maximumf>, %90, %cst_20 [1] : vector<64x64xf32> to vector<64xf32>
    %92 = vector.shape_cast %91 : vector<64xf32> to vector<64x1xf32>
    %93 = vector.broadcast %92 : vector<64x1xf32> to vector<64x64xf32>
    %94 = arith.subf %90, %93 : vector<64x64xf32>
    %95 = math.exp %94 : vector<64x64xf32>
    %cst_21 = arith.constant dense<0.000000e+00> : vector<64xf32>
    %96 = vector.multi_reduction <add>, %95, %cst_21 [1] : vector<64x64xf32> to vector<64xf32>
    %97 = vector.shape_cast %96 : vector<64xf32> to vector<64x1xf32>
    %98 = tpu.reciprocal %97 {approx = true} : vector<64x1xf32> -> vector<64x1xf32>
    %99 = vector.broadcast %98 : vector<64x1xf32> to vector<64x64xf32>
    %100 = arith.mulf %95, %99 : vector<64x64xf32>
    %101 = vector.extract_strided_slice %89 {offsets = [0, 64], sizes = [64, 64], strides = [1, 1]} : vector<64x256xf32> to vector<64x64xf32>
    %cst_22 = arith.constant dense<0xFF800000> : vector<64xf32>
    %102 = vector.multi_reduction <maximumf>, %101, %cst_22 [1] : vector<64x64xf32> to vector<64xf32>
    %103 = vector.shape_cast %102 : vector<64xf32> to vector<64x1xf32>
    %104 = vector.broadcast %103 : vector<64x1xf32> to vector<64x64xf32>
    %105 = arith.subf %101, %104 : vector<64x64xf32>
    %106 = math.exp %105 : vector<64x64xf32>
    %cst_23 = arith.constant dense<0.000000e+00> : vector<64xf32>
    %107 = vector.multi_reduction <add>, %106, %cst_23 [1] : vector<64x64xf32> to vector<64xf32>
    %108 = vector.shape_cast %107 : vector<64xf32> to vector<64x1xf32>
    %109 = tpu.reciprocal %108 {approx = true} : vector<64x1xf32> -> vector<64x1xf32>
    %110 = vector.broadcast %109 : vector<64x1xf32> to vector<64x64xf32>
    %111 = arith.mulf %106, %110 : vector<64x64xf32>
    %112 = vector.extract_strided_slice %89 {offsets = [0, 128], sizes = [64, 64], strides = [1, 1]} : vector<64x256xf32> to vector<64x64xf32>
    %cst_24 = arith.constant dense<0xFF800000> : vector<64xf32>
    %113 = vector.multi_reduction <maximumf>, %112, %cst_24 [1] : vector<64x64xf32> to vector<64xf32>
    %114 = vector.shape_cast %113 : vector<64xf32> to vector<64x1xf32>
    %115 = vector.broadcast %114 : vector<64x1xf32> to vector<64x64xf32>
    %116 = arith.subf %112, %115 : vector<64x64xf32>
    %117 = math.exp %116 : vector<64x64xf32>
    %cst_25 = arith.constant dense<0.000000e+00> : vector<64xf32>
    %118 = vector.multi_reduction <add>, %117, %cst_25 [1] : vector<64x64xf32> to vector<64xf32>
    %119 = vector.shape_cast %118 : vector<64xf32> to vector<64x1xf32>
    %120 = tpu.reciprocal %119 {approx = true} : vector<64x1xf32> -> vector<64x1xf32>
    %121 = vector.broadcast %120 : vector<64x1xf32> to vector<64x64xf32>
    %122 = arith.mulf %117, %121 : vector<64x64xf32>
    %123 = vector.extract_strided_slice %89 {offsets = [0, 192], sizes = [64, 64], strides = [1, 1]} : vector<64x256xf32> to vector<64x64xf32>
    %cst_26 = arith.constant dense<0xFF800000> : vector<64xf32>
    %124 = vector.multi_reduction <maximumf>, %123, %cst_26 [1] : vector<64x64xf32> to vector<64xf32>
    %125 = vector.shape_cast %124 : vector<64xf32> to vector<64x1xf32>
    %126 = vector.broadcast %125 : vector<64x1xf32> to vector<64x64xf32>
    %127 = arith.subf %123, %126 : vector<64x64xf32>
    %128 = math.exp %127 : vector<64x64xf32>
    %cst_27 = arith.constant dense<0.000000e+00> : vector<64xf32>
    %129 = vector.multi_reduction <add>, %128, %cst_27 [1] : vector<64x64xf32> to vector<64xf32>
    %130 = vector.shape_cast %129 : vector<64xf32> to vector<64x1xf32>
    %131 = tpu.reciprocal %130 {approx = true} : vector<64x1xf32> -> vector<64x1xf32>
    %132 = vector.broadcast %131 : vector<64x1xf32> to vector<64x64xf32>
    %133 = arith.mulf %128, %132 : vector<64x64xf32>
    %134 = tpu.concatenate %100, %111, %122, %133 in 1 : vector<64x64xf32>, vector<64x64xf32>, vector<64x64xf32>, vector<64x64xf32> -> vector<64x256xf32>
    %135 = arith.truncf %134 : vector<64x256xf32> to vector<64x256xbf16>
    %cst_28 = arith.constant dense<0.000000e+00> : vector<64x32xf32>
    %136 = tpu.matmul %135, %88, %cst_28 {dimension_numbers = #tpu.dot_dimension_numbers<[1], [0], [0], [1], [0, 0, 1, 1], [], []>} : vector<64x256xbf16>, vector<256x32xbf16>, vector<64x32xf32> -> vector<64x32xf32>
    %137 = vector.extract_strided_slice %63 {offsets = [64, 0], sizes = [64, 32], strides = [1, 1]} : vector<128x32xf32> to vector<64x32xf32>
    %138 = vector.extract_strided_slice %64 {offsets = [64, 0], sizes = [64, 32], strides = [1, 1]} : vector<128x32xf32> to vector<64x32xf32>
    %139 = vector.extract_strided_slice %62 {offsets = [64, 0], sizes = [64, 32], strides = [1, 1]} : vector<128x32xf32> to vector<64x32xf32>
    %140 = arith.truncf %137 : vector<64x32xf32> to vector<64x32xbf16>
    %141 = arith.truncf %138 : vector<64x32xf32> to vector<64x32xbf16>
    %142 = arith.truncf %139 : vector<64x32xf32> to vector<64x32xbf16>
    %143 = vector.broadcast %8 : vector<1x32xbf16> to vector<64x32xbf16>
    %144 = arith.mulf %141, %143 : vector<64x32xbf16>
    %145 = vector.broadcast %16 : vector<1x32xbf16> to vector<64x32xbf16>
    %146 = arith.mulf %141, %145 : vector<64x32xbf16>
    %147 = vector.broadcast %24 : vector<1x32xbf16> to vector<64x32xbf16>
    %148 = arith.mulf %141, %147 : vector<64x32xbf16>
    %149 = vector.broadcast %32 : vector<1x32xbf16> to vector<64x32xbf16>
    %150 = arith.mulf %141, %149 : vector<64x32xbf16>
    %151 = tpu.concatenate %144, %146, %148, %150 in 0 : vector<64x32xbf16>, vector<64x32xbf16>, vector<64x32xbf16>, vector<64x32xbf16> -> vector<256x32xbf16>
    %152 = vector.broadcast %8 : vector<1x32xbf16> to vector<64x32xbf16>
    %153 = arith.mulf %142, %152 : vector<64x32xbf16>
    %154 = vector.broadcast %16 : vector<1x32xbf16> to vector<64x32xbf16>
    %155 = arith.mulf %142, %154 : vector<64x32xbf16>
    %156 = vector.broadcast %24 : vector<1x32xbf16> to vector<64x32xbf16>
    %157 = arith.mulf %142, %156 : vector<64x32xbf16>
    %158 = vector.broadcast %32 : vector<1x32xbf16> to vector<64x32xbf16>
    %159 = arith.mulf %142, %158 : vector<64x32xbf16>
    %160 = tpu.concatenate %153, %155, %157, %159 in 0 : vector<64x32xbf16>, vector<64x32xbf16>, vector<64x32xbf16>, vector<64x32xbf16> -> vector<256x32xbf16>
    %cst_29 = arith.constant dense<0.000000e+00> : vector<64x256xf32>
    %161 = tpu.matmul %140, %151, %cst_29 {dimension_numbers = #tpu.dot_dimension_numbers<[1], [1], [0], [0], [0, 0, 1, 0], [], []>} : vector<64x32xbf16>, vector<256x32xbf16>, vector<64x256xf32> -> vector<64x256xf32>
    %162 = vector.extract_strided_slice %161 {offsets = [0, 0], sizes = [64, 64], strides = [1, 1]} : vector<64x256xf32> to vector<64x64xf32>
    %cst_30 = arith.constant dense<0xFF800000> : vector<64xf32>
    %163 = vector.multi_reduction <maximumf>, %162, %cst_30 [1] : vector<64x64xf32> to vector<64xf32>
    %164 = vector.shape_cast %163 : vector<64xf32> to vector<64x1xf32>
    %165 = vector.broadcast %164 : vector<64x1xf32> to vector<64x64xf32>
    %166 = arith.subf %162, %165 : vector<64x64xf32>
    %167 = math.exp %166 : vector<64x64xf32>
    %cst_31 = arith.constant dense<0.000000e+00> : vector<64xf32>
    %168 = vector.multi_reduction <add>, %167, %cst_31 [1] : vector<64x64xf32> to vector<64xf32>
    %169 = vector.shape_cast %168 : vector<64xf32> to vector<64x1xf32>
    %170 = tpu.reciprocal %169 {approx = true} : vector<64x1xf32> -> vector<64x1xf32>
    %171 = vector.broadcast %170 : vector<64x1xf32> to vector<64x64xf32>
    %172 = arith.mulf %167, %171 : vector<64x64xf32>
    %173 = vector.extract_strided_slice %161 {offsets = [0, 64], sizes = [64, 64], strides = [1, 1]} : vector<64x256xf32> to vector<64x64xf32>
    %cst_32 = arith.constant dense<0xFF800000> : vector<64xf32>
    %174 = vector.multi_reduction <maximumf>, %173, %cst_32 [1] : vector<64x64xf32> to vector<64xf32>
    %175 = vector.shape_cast %174 : vector<64xf32> to vector<64x1xf32>
    %176 = vector.broadcast %175 : vector<64x1xf32> to vector<64x64xf32>
    %177 = arith.subf %173, %176 : vector<64x64xf32>
    %178 = math.exp %177 : vector<64x64xf32>
    %cst_33 = arith.constant dense<0.000000e+00> : vector<64xf32>
    %179 = vector.multi_reduction <add>, %178, %cst_33 [1] : vector<64x64xf32> to vector<64xf32>
    %180 = vector.shape_cast %179 : vector<64xf32> to vector<64x1xf32>
    %181 = tpu.reciprocal %180 {approx = true} : vector<64x1xf32> -> vector<64x1xf32>
    %182 = vector.broadcast %181 : vector<64x1xf32> to vector<64x64xf32>
    %183 = arith.mulf %178, %182 : vector<64x64xf32>
    %184 = vector.extract_strided_slice %161 {offsets = [0, 128], sizes = [64, 64], strides = [1, 1]} : vector<64x256xf32> to vector<64x64xf32>
    %cst_34 = arith.constant dense<0xFF800000> : vector<64xf32>
    %185 = vector.multi_reduction <maximumf>, %184, %cst_34 [1] : vector<64x64xf32> to vector<64xf32>
    %186 = vector.shape_cast %185 : vector<64xf32> to vector<64x1xf32>
    %187 = vector.broadcast %186 : vector<64x1xf32> to vector<64x64xf32>
    %188 = arith.subf %184, %187 : vector<64x64xf32>
    %189 = math.exp %188 : vector<64x64xf32>
    %cst_35 = arith.constant dense<0.000000e+00> : vector<64xf32>
    %190 = vector.multi_reduction <add>, %189, %cst_35 [1] : vector<64x64xf32> to vector<64xf32>
    %191 = vector.shape_cast %190 : vector<64xf32> to vector<64x1xf32>
    %192 = tpu.reciprocal %191 {approx = true} : vector<64x1xf32> -> vector<64x1xf32>
    %193 = vector.broadcast %192 : vector<64x1xf32> to vector<64x64xf32>
    %194 = arith.mulf %189, %193 : vector<64x64xf32>
    %195 = vector.extract_strided_slice %161 {offsets = [0, 192], sizes = [64, 64], strides = [1, 1]} : vector<64x256xf32> to vector<64x64xf32>
    %cst_36 = arith.constant dense<0xFF800000> : vector<64xf32>
    %196 = vector.multi_reduction <maximumf>, %195, %cst_36 [1] : vector<64x64xf32> to vector<64xf32>
    %197 = vector.shape_cast %196 : vector<64xf32> to vector<64x1xf32>
    %198 = vector.broadcast %197 : vector<64x1xf32> to vector<64x64xf32>
    %199 = arith.subf %195, %198 : vector<64x64xf32>
    %200 = math.exp %199 : vector<64x64xf32>
    %cst_37 = arith.constant dense<0.000000e+00> : vector<64xf32>
    %201 = vector.multi_reduction <add>, %200, %cst_37 [1] : vector<64x64xf32> to vector<64xf32>
    %202 = vector.shape_cast %201 : vector<64xf32> to vector<64x1xf32>
    %203 = tpu.reciprocal %202 {approx = true} : vector<64x1xf32> -> vector<64x1xf32>
    %204 = vector.broadcast %203 : vector<64x1xf32> to vector<64x64xf32>
    %205 = arith.mulf %200, %204 : vector<64x64xf32>
    %206 = tpu.concatenate %172, %183, %194, %205 in 1 : vector<64x64xf32>, vector<64x64xf32>, vector<64x64xf32>, vector<64x64xf32> -> vector<64x256xf32>
    %207 = arith.truncf %206 : vector<64x256xf32> to vector<64x256xbf16>
    %cst_38 = arith.constant dense<0.000000e+00> : vector<64x32xf32>
    %208 = tpu.matmul %207, %160, %cst_38 {dimension_numbers = #tpu.dot_dimension_numbers<[1], [0], [0], [1], [0, 0, 1, 1], [], []>} : vector<64x256xbf16>, vector<256x32xbf16>, vector<64x32xf32> -> vector<64x32xf32>
    %209 = tpu.concatenate %136, %208 in 0 : vector<64x32xf32>, vector<64x32xf32> -> vector<128x32xf32>
    %210 = arith.truncf %209 : vector<128x32xf32> to vector<128x32xbf16>
    %c0_39 = arith.constant 0 : index
    %c640 = arith.constant 640 : index
    %211 = vector.load %arg2[%c0_39, %c640] : memref<64x2304xbf16, #tpu.memory_space<vmem>>, vector<32x32xbf16>
    %cst_40 = arith.constant dense<0.000000e+00> : vector<128x32xf32>
    %212 = tpu.matmul %210, %211, %cst_40 {dimension_numbers = #tpu.dot_dimension_numbers<[1], [0], [0], [1], [0, 0, 1, 1], [], []>} : vector<128x32xbf16>, vector<32x32xbf16>, vector<128x32xf32> -> vector<128x32xf32>
    %c13 = arith.constant 13 : index
    %c0_41 = arith.constant 0 : index
    %213 = vector.load %arg3[%c13, %c0_41] : memref<40x256xf32, #tpu.memory_space<vmem>>, vector<1x32xf32>
    %214 = vector.broadcast %213 : vector<1x32xf32> to vector<128x32xf32>
    %215 = arith.addf %212, %214 : vector<128x32xf32>
    %216 = arith.addf %47, %215 : vector<128x32xf32>
    %c14 = arith.constant 14 : index
    %c0_42 = arith.constant 0 : index
    %217 = vector.load %arg3[%c14, %c0_42] : memref<40x256xf32, #tpu.memory_space<vmem>>, vector<2x32xf32>
    %cst_43 = arith.constant dense<0.000000e+00> : vector<128xf32>
    %218 = vector.multi_reduction <add>, %216, %cst_43 [1] : vector<128x32xf32> to vector<128xf32>
    %219 = vector.shape_cast %218 : vector<128xf32> to vector<128x1xf32>
    %cst_44 = arith.constant 3.200000e+01 : f32
    %220 = vector.broadcast %cst_44 : f32 to vector<128x1xf32>
    %221 = arith.divf %219, %220 : vector<128x1xf32>
    %222 = vector.broadcast %221 : vector<128x1xf32> to vector<128x32xf32>
    %223 = arith.subf %216, %222 : vector<128x32xf32>
    %224 = arith.mulf %223, %223 : vector<128x32xf32>
    %cst_45 = arith.constant dense<0.000000e+00> : vector<128xf32>
    %225 = vector.multi_reduction <add>, %224, %cst_45 [1] : vector<128x32xf32> to vector<128xf32>
    %226 = vector.shape_cast %225 : vector<128xf32> to vector<128x1xf32>
    %cst_46 = arith.constant 3.200000e+01 : f32
    %227 = vector.broadcast %cst_46 : f32 to vector<128x1xf32>
    %228 = arith.divf %226, %227 : vector<128x1xf32>
    %229 = vector.broadcast %221 : vector<128x1xf32> to vector<128x32xf32>
    %230 = arith.subf %216, %229 : vector<128x32xf32>
    %cst_47 = arith.constant 9.99999974E-6 : f32
    %231 = vector.broadcast %cst_47 : f32 to vector<128x1xf32>
    %232 = arith.addf %228, %231 : vector<128x1xf32>
    %233 = math.rsqrt %232 : vector<128x1xf32>
    %234 = vector.broadcast %233 : vector<128x1xf32> to vector<128x32xf32>
    %235 = arith.mulf %230, %234 : vector<128x32xf32>
    %236 = vector.extract_strided_slice %217 {offsets = [0, 0], sizes = [1, 32], strides = [1, 1]} : vector<2x32xf32> to vector<1x32xf32>
    %237 = vector.broadcast %236 : vector<1x32xf32> to vector<128x32xf32>
    %238 = arith.mulf %235, %237 : vector<128x32xf32>
    %239 = vector.extract_strided_slice %217 {offsets = [1, 0], sizes = [1, 32], strides = [1, 1]} : vector<2x32xf32> to vector<1x32xf32>
    %240 = vector.broadcast %239 : vector<1x32xf32> to vector<128x32xf32>
    %241 = arith.addf %238, %240 : vector<128x32xf32>
    %242 = arith.truncf %241 : vector<128x32xf32> to vector<128x32xbf16>
    %c0_48 = arith.constant 0 : index
    %c768 = arith.constant 768 : index
    %243 = vector.load %arg2[%c0_48, %c768] : memref<64x2304xbf16, #tpu.memory_space<vmem>>, vector<32x64xbf16>
    %cst_49 = arith.constant dense<0.000000e+00> : vector<128x64xf32>
    %244 = tpu.matmul %242, %243, %cst_49 {dimension_numbers = #tpu.dot_dimension_numbers<[1], [0], [0], [1], [0, 0, 1, 1], [], []>} : vector<128x32xbf16>, vector<32x64xbf16>, vector<128x64xf32> -> vector<128x64xf32>
    %c16 = arith.constant 16 : index
    %c0_50 = arith.constant 0 : index
    %245 = vector.load %arg3[%c16, %c0_50] : memref<40x256xf32, #tpu.memory_space<vmem>>, vector<1x64xf32>
    %246 = vector.broadcast %245 : vector<1x64xf32> to vector<128x64xf32>
    %247 = arith.addf %244, %246 : vector<128x64xf32>
    %cst_51 = arith.constant 0.000000e+00 : f32
    %248 = vector.broadcast %cst_51 : f32 to vector<128x64xf32>
    %249 = arith.maximumf %247, %248 : vector<128x64xf32>
    %250 = arith.truncf %249 : vector<128x64xf32> to vector<128x64xbf16>
    %c0_52 = arith.constant 0 : index
    %c896 = arith.constant 896 : index
    %251 = vector.load %arg2[%c0_52, %c896] : memref<64x2304xbf16, #tpu.memory_space<vmem>>, vector<64x32xbf16>
    %cst_53 = arith.constant dense<0.000000e+00> : vector<128x32xf32>
    %252 = tpu.matmul %250, %251, %cst_53 {dimension_numbers = #tpu.dot_dimension_numbers<[1], [0], [0], [1], [0, 0, 1, 1], [], []>} : vector<128x64xbf16>, vector<64x32xbf16>, vector<128x32xf32> -> vector<128x32xf32>
    %c17 = arith.constant 17 : index
    %c0_54 = arith.constant 0 : index
    %253 = vector.load %arg3[%c17, %c0_54] : memref<40x256xf32, #tpu.memory_space<vmem>>, vector<1x32xf32>
    %254 = vector.broadcast %253 : vector<1x32xf32> to vector<128x32xf32>
    %255 = arith.addf %252, %254 : vector<128x32xf32>
    %256 = arith.addf %241, %255 : vector<128x32xf32>
    %c18 = arith.constant 18 : index
    %c0_55 = arith.constant 0 : index
    %257 = vector.load %arg3[%c18, %c0_55] : memref<40x256xf32, #tpu.memory_space<vmem>>, vector<2x32xf32>
    %cst_56 = arith.constant dense<0.000000e+00> : vector<128xf32>
    %258 = vector.multi_reduction <add>, %256, %cst_56 [1] : vector<128x32xf32> to vector<128xf32>
    %259 = vector.shape_cast %258 : vector<128xf32> to vector<128x1xf32>
    %cst_57 = arith.constant 3.200000e+01 : f32
    %260 = vector.broadcast %cst_57 : f32 to vector<128x1xf32>
    %261 = arith.divf %259, %260 : vector<128x1xf32>
    %262 = vector.broadcast %261 : vector<128x1xf32> to vector<128x32xf32>
    %263 = arith.subf %256, %262 : vector<128x32xf32>
    %264 = arith.mulf %263, %263 : vector<128x32xf32>
    %cst_58 = arith.constant dense<0.000000e+00> : vector<128xf32>
    %265 = vector.multi_reduction <add>, %264, %cst_58 [1] : vector<128x32xf32> to vector<128xf32>
    %266 = vector.shape_cast %265 : vector<128xf32> to vector<128x1xf32>
    %cst_59 = arith.constant 3.200000e+01 : f32
    %267 = vector.broadcast %cst_59 : f32 to vector<128x1xf32>
    %268 = arith.divf %266, %267 : vector<128x1xf32>
    %269 = vector.broadcast %261 : vector<128x1xf32> to vector<128x32xf32>
    %270 = arith.subf %256, %269 : vector<128x32xf32>
    %cst_60 = arith.constant 9.99999974E-6 : f32
    %271 = vector.broadcast %cst_60 : f32 to vector<128x1xf32>
    %272 = arith.addf %268, %271 : vector<128x1xf32>
    %273 = math.rsqrt %272 : vector<128x1xf32>
    %274 = vector.broadcast %273 : vector<128x1xf32> to vector<128x32xf32>
    %275 = arith.mulf %270, %274 : vector<128x32xf32>
    %276 = vector.extract_strided_slice %257 {offsets = [0, 0], sizes = [1, 32], strides = [1, 1]} : vector<2x32xf32> to vector<1x32xf32>
    %277 = vector.broadcast %276 : vector<1x32xf32> to vector<128x32xf32>
    %278 = arith.mulf %275, %277 : vector<128x32xf32>
    %279 = vector.extract_strided_slice %257 {offsets = [1, 0], sizes = [1, 32], strides = [1, 1]} : vector<2x32xf32> to vector<1x32xf32>
    %280 = vector.broadcast %279 : vector<1x32xf32> to vector<128x32xf32>
    %281 = arith.addf %278, %280 : vector<128x32xf32>
    %c8 = arith.constant 8 : index
    %c0_61 = arith.constant 0 : index
    %282 = vector.load %arg3[%c8, %c0_61] : memref<40x256xf32, #tpu.memory_space<vmem>>, vector<1x32xf32>
    %c0_62 = arith.constant 0 : index
    %c0_63 = arith.constant 0 : index
    %283 = vector.load %arg3[%c0_62, %c0_63] : memref<40x256xf32, #tpu.memory_space<vmem>>, vector<8x32xf32>
    %284 = vector.shape_cast %282 : vector<1x32xf32> to vector<1x32xf32>
    %285 = vector.broadcast %284 : vector<1x32xf32> to vector<8x32xf32>
    %286 = arith.addf %285, %283 : vector<8x32xf32>
    %287 = arith.truncf %286 : vector<8x32xf32> to vector<8x32xbf16>
    %c0_64 = arith.constant 0 : index
    %c1024 = arith.constant 1024 : index
    %288 = vector.load %arg2[%c0_64, %c1024] : memref<64x2304xbf16, #tpu.memory_space<vmem>>, vector<32x32xbf16>
    %cst_65 = arith.constant dense<0.000000e+00> : vector<8x32xf32>
    %289 = tpu.matmul %287, %288, %cst_65 {dimension_numbers = #tpu.dot_dimension_numbers<[1], [0], [0], [1], [0, 0, 1, 1], [], []>} : vector<8x32xbf16>, vector<32x32xbf16>, vector<8x32xf32> -> vector<8x32xf32>
    %c20 = arith.constant 20 : index
    %c0_66 = arith.constant 0 : index
    %290 = vector.load %arg3[%c20, %c0_66] : memref<40x256xf32, #tpu.memory_space<vmem>>, vector<1x32xf32>
    %291 = vector.broadcast %290 : vector<1x32xf32> to vector<8x32xf32>
    %292 = arith.addf %289, %291 : vector<8x32xf32>
    %293 = arith.addf %281, %49 : vector<128x32xf32>
    %294 = arith.truncf %293 : vector<128x32xf32> to vector<128x32xbf16>
    %c0_67 = arith.constant 0 : index
    %c1152 = arith.constant 1152 : index
    %295 = vector.load %arg2[%c0_67, %c1152] : memref<64x2304xbf16, #tpu.memory_space<vmem>>, vector<32x32xbf16>
    %cst_68 = arith.constant dense<0.000000e+00> : vector<128x32xf32>
    %296 = tpu.matmul %294, %295, %cst_68 {dimension_numbers = #tpu.dot_dimension_numbers<[1], [0], [0], [1], [0, 0, 1, 1], [], []>} : vector<128x32xbf16>, vector<32x32xbf16>, vector<128x32xf32> -> vector<128x32xf32>
    %c21 = arith.constant 21 : index
    %c0_69 = arith.constant 0 : index
    %297 = vector.load %arg3[%c21, %c0_69] : memref<40x256xf32, #tpu.memory_space<vmem>>, vector<1x32xf32>
    %298 = vector.broadcast %297 : vector<1x32xf32> to vector<128x32xf32>
    %299 = arith.addf %296, %298 : vector<128x32xf32>
    %300 = arith.truncf %281 : vector<128x32xf32> to vector<128x32xbf16>
    %c0_70 = arith.constant 0 : index
    %c1280 = arith.constant 1280 : index
    %301 = vector.load %arg2[%c0_70, %c1280] : memref<64x2304xbf16, #tpu.memory_space<vmem>>, vector<32x32xbf16>
    %cst_71 = arith.constant dense<0.000000e+00> : vector<128x32xf32>
    %302 = tpu.matmul %300, %301, %cst_71 {dimension_numbers = #tpu.dot_dimension_numbers<[1], [0], [0], [1], [0, 0, 1, 1], [], []>} : vector<128x32xbf16>, vector<32x32xbf16>, vector<128x32xf32> -> vector<128x32xf32>
    %c22 = arith.constant 22 : index
    %c0_72 = arith.constant 0 : index
    %303 = vector.load %arg3[%c22, %c0_72] : memref<40x256xf32, #tpu.memory_space<vmem>>, vector<1x32xf32>
    %304 = vector.broadcast %303 : vector<1x32xf32> to vector<128x32xf32>
    %305 = arith.addf %302, %304 : vector<128x32xf32>
    %306 = vector.extract_strided_slice %299 {offsets = [0, 0], sizes = [64, 32], strides = [1, 1]} : vector<128x32xf32> to vector<64x32xf32>
    %307 = vector.extract_strided_slice %305 {offsets = [0, 0], sizes = [64, 32], strides = [1, 1]} : vector<128x32xf32> to vector<64x32xf32>
    %308 = arith.truncf %292 : vector<8x32xf32> to vector<8x32xbf16>
    %309 = arith.truncf %306 : vector<64x32xf32> to vector<64x32xbf16>
    %310 = arith.truncf %307 : vector<64x32xf32> to vector<64x32xbf16>
    %311 = vector.broadcast %8 : vector<1x32xbf16> to vector<64x32xbf16>
    %312 = arith.mulf %309, %311 : vector<64x32xbf16>
    %313 = vector.broadcast %16 : vector<1x32xbf16> to vector<64x32xbf16>
    %314 = arith.mulf %309, %313 : vector<64x32xbf16>
    %315 = vector.broadcast %24 : vector<1x32xbf16> to vector<64x32xbf16>
    %316 = arith.mulf %309, %315 : vector<64x32xbf16>
    %317 = vector.broadcast %32 : vector<1x32xbf16> to vector<64x32xbf16>
    %318 = arith.mulf %309, %317 : vector<64x32xbf16>
    %319 = tpu.concatenate %312, %314, %316, %318 in 0 : vector<64x32xbf16>, vector<64x32xbf16>, vector<64x32xbf16>, vector<64x32xbf16> -> vector<256x32xbf16>
    %320 = vector.broadcast %8 : vector<1x32xbf16> to vector<64x32xbf16>
    %321 = arith.mulf %310, %320 : vector<64x32xbf16>
    %322 = vector.broadcast %16 : vector<1x32xbf16> to vector<64x32xbf16>
    %323 = arith.mulf %310, %322 : vector<64x32xbf16>
    %324 = vector.broadcast %24 : vector<1x32xbf16> to vector<64x32xbf16>
    %325 = arith.mulf %310, %324 : vector<64x32xbf16>
    %326 = vector.broadcast %32 : vector<1x32xbf16> to vector<64x32xbf16>
    %327 = arith.mulf %310, %326 : vector<64x32xbf16>
    %328 = tpu.concatenate %321, %323, %325, %327 in 0 : vector<64x32xbf16>, vector<64x32xbf16>, vector<64x32xbf16>, vector<64x32xbf16> -> vector<256x32xbf16>
    %cst_73 = arith.constant dense<0.000000e+00> : vector<8x256xf32>
    %329 = tpu.matmul %308, %319, %cst_73 {dimension_numbers = #tpu.dot_dimension_numbers<[1], [1], [0], [0], [0, 0, 1, 0], [], []>} : vector<8x32xbf16>, vector<256x32xbf16>, vector<8x256xf32> -> vector<8x256xf32>
    %330 = vector.extract_strided_slice %329 {offsets = [0, 0], sizes = [8, 64], strides = [1, 1]} : vector<8x256xf32> to vector<8x64xf32>
    %cst_74 = arith.constant dense<0xFF800000> : vector<8xf32>
    %331 = vector.multi_reduction <maximumf>, %330, %cst_74 [1] : vector<8x64xf32> to vector<8xf32>
    %332 = vector.shape_cast %331 : vector<8xf32> to vector<8x1xf32>
    %333 = vector.broadcast %332 : vector<8x1xf32> to vector<8x64xf32>
    %334 = arith.subf %330, %333 : vector<8x64xf32>
    %335 = math.exp %334 : vector<8x64xf32>
    %cst_75 = arith.constant dense<0.000000e+00> : vector<8xf32>
    %336 = vector.multi_reduction <add>, %335, %cst_75 [1] : vector<8x64xf32> to vector<8xf32>
    %337 = vector.shape_cast %336 : vector<8xf32> to vector<8x1xf32>
    %338 = tpu.reciprocal %337 {approx = true} : vector<8x1xf32> -> vector<8x1xf32>
    %339 = vector.broadcast %338 : vector<8x1xf32> to vector<8x64xf32>
    %340 = arith.mulf %335, %339 : vector<8x64xf32>
    %341 = vector.extract_strided_slice %329 {offsets = [0, 64], sizes = [8, 64], strides = [1, 1]} : vector<8x256xf32> to vector<8x64xf32>
    %cst_76 = arith.constant dense<0xFF800000> : vector<8xf32>
    %342 = vector.multi_reduction <maximumf>, %341, %cst_76 [1] : vector<8x64xf32> to vector<8xf32>
    %343 = vector.shape_cast %342 : vector<8xf32> to vector<8x1xf32>
    %344 = vector.broadcast %343 : vector<8x1xf32> to vector<8x64xf32>
    %345 = arith.subf %341, %344 : vector<8x64xf32>
    %346 = math.exp %345 : vector<8x64xf32>
    %cst_77 = arith.constant dense<0.000000e+00> : vector<8xf32>
    %347 = vector.multi_reduction <add>, %346, %cst_77 [1] : vector<8x64xf32> to vector<8xf32>
    %348 = vector.shape_cast %347 : vector<8xf32> to vector<8x1xf32>
    %349 = tpu.reciprocal %348 {approx = true} : vector<8x1xf32> -> vector<8x1xf32>
    %350 = vector.broadcast %349 : vector<8x1xf32> to vector<8x64xf32>
    %351 = arith.mulf %346, %350 : vector<8x64xf32>
    %352 = vector.extract_strided_slice %329 {offsets = [0, 128], sizes = [8, 64], strides = [1, 1]} : vector<8x256xf32> to vector<8x64xf32>
    %cst_78 = arith.constant dense<0xFF800000> : vector<8xf32>
    %353 = vector.multi_reduction <maximumf>, %352, %cst_78 [1] : vector<8x64xf32> to vector<8xf32>
    %354 = vector.shape_cast %353 : vector<8xf32> to vector<8x1xf32>
    %355 = vector.broadcast %354 : vector<8x1xf32> to vector<8x64xf32>
    %356 = arith.subf %352, %355 : vector<8x64xf32>
    %357 = math.exp %356 : vector<8x64xf32>
    %cst_79 = arith.constant dense<0.000000e+00> : vector<8xf32>
    %358 = vector.multi_reduction <add>, %357, %cst_79 [1] : vector<8x64xf32> to vector<8xf32>
    %359 = vector.shape_cast %358 : vector<8xf32> to vector<8x1xf32>
    %360 = tpu.reciprocal %359 {approx = true} : vector<8x1xf32> -> vector<8x1xf32>
    %361 = vector.broadcast %360 : vector<8x1xf32> to vector<8x64xf32>
    %362 = arith.mulf %357, %361 : vector<8x64xf32>
    %363 = vector.extract_strided_slice %329 {offsets = [0, 192], sizes = [8, 64], strides = [1, 1]} : vector<8x256xf32> to vector<8x64xf32>
    %cst_80 = arith.constant dense<0xFF800000> : vector<8xf32>
    %364 = vector.multi_reduction <maximumf>, %363, %cst_80 [1] : vector<8x64xf32> to vector<8xf32>
    %365 = vector.shape_cast %364 : vector<8xf32> to vector<8x1xf32>
    %366 = vector.broadcast %365 : vector<8x1xf32> to vector<8x64xf32>
    %367 = arith.subf %363, %366 : vector<8x64xf32>
    %368 = math.exp %367 : vector<8x64xf32>
    %cst_81 = arith.constant dense<0.000000e+00> : vector<8xf32>
    %369 = vector.multi_reduction <add>, %368, %cst_81 [1] : vector<8x64xf32> to vector<8xf32>
    %370 = vector.shape_cast %369 : vector<8xf32> to vector<8x1xf32>
    %371 = tpu.reciprocal %370 {approx = true} : vector<8x1xf32> -> vector<8x1xf32>
    %372 = vector.broadcast %371 : vector<8x1xf32> to vector<8x64xf32>
    %373 = arith.mulf %368, %372 : vector<8x64xf32>
    %374 = tpu.concatenate %340, %351, %362, %373 in 1 : vector<8x64xf32>, vector<8x64xf32>, vector<8x64xf32>, vector<8x64xf32> -> vector<8x256xf32>
    %375 = arith.truncf %374 : vector<8x256xf32> to vector<8x256xbf16>
    %cst_82 = arith.constant dense<0.000000e+00> : vector<8x32xf32>
    %376 = tpu.matmul %375, %328, %cst_82 {dimension_numbers = #tpu.dot_dimension_numbers<[1], [0], [0], [1], [0, 0, 1, 1], [], []>} : vector<8x256xbf16>, vector<256x32xbf16>, vector<8x32xf32> -> vector<8x32xf32>
    %377 = vector.extract_strided_slice %299 {offsets = [64, 0], sizes = [64, 32], strides = [1, 1]} : vector<128x32xf32> to vector<64x32xf32>
    %378 = vector.extract_strided_slice %305 {offsets = [64, 0], sizes = [64, 32], strides = [1, 1]} : vector<128x32xf32> to vector<64x32xf32>
    %379 = arith.truncf %292 : vector<8x32xf32> to vector<8x32xbf16>
    %380 = arith.truncf %377 : vector<64x32xf32> to vector<64x32xbf16>
    %381 = arith.truncf %378 : vector<64x32xf32> to vector<64x32xbf16>
    %382 = vector.broadcast %8 : vector<1x32xbf16> to vector<64x32xbf16>
    %383 = arith.mulf %380, %382 : vector<64x32xbf16>
    %384 = vector.broadcast %16 : vector<1x32xbf16> to vector<64x32xbf16>
    %385 = arith.mulf %380, %384 : vector<64x32xbf16>
    %386 = vector.broadcast %24 : vector<1x32xbf16> to vector<64x32xbf16>
    %387 = arith.mulf %380, %386 : vector<64x32xbf16>
    %388 = vector.broadcast %32 : vector<1x32xbf16> to vector<64x32xbf16>
    %389 = arith.mulf %380, %388 : vector<64x32xbf16>
    %390 = tpu.concatenate %383, %385, %387, %389 in 0 : vector<64x32xbf16>, vector<64x32xbf16>, vector<64x32xbf16>, vector<64x32xbf16> -> vector<256x32xbf16>
    %391 = vector.broadcast %8 : vector<1x32xbf16> to vector<64x32xbf16>
    %392 = arith.mulf %381, %391 : vector<64x32xbf16>
    %393 = vector.broadcast %16 : vector<1x32xbf16> to vector<64x32xbf16>
    %394 = arith.mulf %381, %393 : vector<64x32xbf16>
    %395 = vector.broadcast %24 : vector<1x32xbf16> to vector<64x32xbf16>
    %396 = arith.mulf %381, %395 : vector<64x32xbf16>
    %397 = vector.broadcast %32 : vector<1x32xbf16> to vector<64x32xbf16>
    %398 = arith.mulf %381, %397 : vector<64x32xbf16>
    %399 = tpu.concatenate %392, %394, %396, %398 in 0 : vector<64x32xbf16>, vector<64x32xbf16>, vector<64x32xbf16>, vector<64x32xbf16> -> vector<256x32xbf16>
    %cst_83 = arith.constant dense<0.000000e+00> : vector<8x256xf32>
    %400 = tpu.matmul %379, %390, %cst_83 {dimension_numbers = #tpu.dot_dimension_numbers<[1], [1], [0], [0], [0, 0, 1, 0], [], []>} : vector<8x32xbf16>, vector<256x32xbf16>, vector<8x256xf32> -> vector<8x256xf32>
    %401 = vector.extract_strided_slice %400 {offsets = [0, 0], sizes = [8, 64], strides = [1, 1]} : vector<8x256xf32> to vector<8x64xf32>
    %cst_84 = arith.constant dense<0xFF800000> : vector<8xf32>
    %402 = vector.multi_reduction <maximumf>, %401, %cst_84 [1] : vector<8x64xf32> to vector<8xf32>
    %403 = vector.shape_cast %402 : vector<8xf32> to vector<8x1xf32>
    %404 = vector.broadcast %403 : vector<8x1xf32> to vector<8x64xf32>
    %405 = arith.subf %401, %404 : vector<8x64xf32>
    %406 = math.exp %405 : vector<8x64xf32>
    %cst_85 = arith.constant dense<0.000000e+00> : vector<8xf32>
    %407 = vector.multi_reduction <add>, %406, %cst_85 [1] : vector<8x64xf32> to vector<8xf32>
    %408 = vector.shape_cast %407 : vector<8xf32> to vector<8x1xf32>
    %409 = tpu.reciprocal %408 {approx = true} : vector<8x1xf32> -> vector<8x1xf32>
    %410 = vector.broadcast %409 : vector<8x1xf32> to vector<8x64xf32>
    %411 = arith.mulf %406, %410 : vector<8x64xf32>
    %412 = vector.extract_strided_slice %400 {offsets = [0, 64], sizes = [8, 64], strides = [1, 1]} : vector<8x256xf32> to vector<8x64xf32>
    %cst_86 = arith.constant dense<0xFF800000> : vector<8xf32>
    %413 = vector.multi_reduction <maximumf>, %412, %cst_86 [1] : vector<8x64xf32> to vector<8xf32>
    %414 = vector.shape_cast %413 : vector<8xf32> to vector<8x1xf32>
    %415 = vector.broadcast %414 : vector<8x1xf32> to vector<8x64xf32>
    %416 = arith.subf %412, %415 : vector<8x64xf32>
    %417 = math.exp %416 : vector<8x64xf32>
    %cst_87 = arith.constant dense<0.000000e+00> : vector<8xf32>
    %418 = vector.multi_reduction <add>, %417, %cst_87 [1] : vector<8x64xf32> to vector<8xf32>
    %419 = vector.shape_cast %418 : vector<8xf32> to vector<8x1xf32>
    %420 = tpu.reciprocal %419 {approx = true} : vector<8x1xf32> -> vector<8x1xf32>
    %421 = vector.broadcast %420 : vector<8x1xf32> to vector<8x64xf32>
    %422 = arith.mulf %417, %421 : vector<8x64xf32>
    %423 = vector.extract_strided_slice %400 {offsets = [0, 128], sizes = [8, 64], strides = [1, 1]} : vector<8x256xf32> to vector<8x64xf32>
    %cst_88 = arith.constant dense<0xFF800000> : vector<8xf32>
    %424 = vector.multi_reduction <maximumf>, %423, %cst_88 [1] : vector<8x64xf32> to vector<8xf32>
    %425 = vector.shape_cast %424 : vector<8xf32> to vector<8x1xf32>
    %426 = vector.broadcast %425 : vector<8x1xf32> to vector<8x64xf32>
    %427 = arith.subf %423, %426 : vector<8x64xf32>
    %428 = math.exp %427 : vector<8x64xf32>
    %cst_89 = arith.constant dense<0.000000e+00> : vector<8xf32>
    %429 = vector.multi_reduction <add>, %428, %cst_89 [1] : vector<8x64xf32> to vector<8xf32>
    %430 = vector.shape_cast %429 : vector<8xf32> to vector<8x1xf32>
    %431 = tpu.reciprocal %430 {approx = true} : vector<8x1xf32> -> vector<8x1xf32>
    %432 = vector.broadcast %431 : vector<8x1xf32> to vector<8x64xf32>
    %433 = arith.mulf %428, %432 : vector<8x64xf32>
    %434 = vector.extract_strided_slice %400 {offsets = [0, 192], sizes = [8, 64], strides = [1, 1]} : vector<8x256xf32> to vector<8x64xf32>
    %cst_90 = arith.constant dense<0xFF800000> : vector<8xf32>
    %435 = vector.multi_reduction <maximumf>, %434, %cst_90 [1] : vector<8x64xf32> to vector<8xf32>
    %436 = vector.shape_cast %435 : vector<8xf32> to vector<8x1xf32>
    %437 = vector.broadcast %436 : vector<8x1xf32> to vector<8x64xf32>
    %438 = arith.subf %434, %437 : vector<8x64xf32>
    %439 = math.exp %438 : vector<8x64xf32>
    %cst_91 = arith.constant dense<0.000000e+00> : vector<8xf32>
    %440 = vector.multi_reduction <add>, %439, %cst_91 [1] : vector<8x64xf32> to vector<8xf32>
    %441 = vector.shape_cast %440 : vector<8xf32> to vector<8x1xf32>
    %442 = tpu.reciprocal %441 {approx = true} : vector<8x1xf32> -> vector<8x1xf32>
    %443 = vector.broadcast %442 : vector<8x1xf32> to vector<8x64xf32>
    %444 = arith.mulf %439, %443 : vector<8x64xf32>
    %445 = tpu.concatenate %411, %422, %433, %444 in 1 : vector<8x64xf32>, vector<8x64xf32>, vector<8x64xf32>, vector<8x64xf32> -> vector<8x256xf32>
    %446 = arith.truncf %445 : vector<8x256xf32> to vector<8x256xbf16>
    %cst_92 = arith.constant dense<0.000000e+00> : vector<8x32xf32>
    %447 = tpu.matmul %446, %399, %cst_92 {dimension_numbers = #tpu.dot_dimension_numbers<[1], [0], [0], [1], [0, 0, 1, 1], [], []>} : vector<8x256xbf16>, vector<256x32xbf16>, vector<8x32xf32> -> vector<8x32xf32>
    %448 = tpu.concatenate %376, %447 in 0 : vector<8x32xf32>, vector<8x32xf32> -> vector<16x32xf32>
    %449 = vector.shape_cast %282 : vector<1x32xf32> to vector<1x32xf32>
    %450 = vector.broadcast %449 : vector<1x32xf32> to vector<16x32xf32>
    %451 = arith.truncf %448 : vector<16x32xf32> to vector<16x32xbf16>
    %c0_93 = arith.constant 0 : index
    %c1408 = arith.constant 1408 : index
    %452 = vector.load %arg2[%c0_93, %c1408] : memref<64x2304xbf16, #tpu.memory_space<vmem>>, vector<32x32xbf16>
    %cst_94 = arith.constant dense<0.000000e+00> : vector<16x32xf32>
    %453 = tpu.matmul %451, %452, %cst_94 {dimension_numbers = #tpu.dot_dimension_numbers<[1], [0], [0], [1], [0, 0, 1, 1], [], []>} : vector<16x32xbf16>, vector<32x32xbf16>, vector<16x32xf32> -> vector<16x32xf32>
    %c23 = arith.constant 23 : index
    %c0_95 = arith.constant 0 : index
    %454 = vector.load %arg3[%c23, %c0_95] : memref<40x256xf32, #tpu.memory_space<vmem>>, vector<1x32xf32>
    %455 = vector.broadcast %454 : vector<1x32xf32> to vector<16x32xf32>
    %456 = arith.addf %453, %455 : vector<16x32xf32>
    %457 = arith.addf %450, %456 : vector<16x32xf32>
    %c24 = arith.constant 24 : index
    %c0_96 = arith.constant 0 : index
    %458 = vector.load %arg3[%c24, %c0_96] : memref<40x256xf32, #tpu.memory_space<vmem>>, vector<2x32xf32>
    %cst_97 = arith.constant dense<0.000000e+00> : vector<16xf32>
    %459 = vector.multi_reduction <add>, %457, %cst_97 [1] : vector<16x32xf32> to vector<16xf32>
    %460 = vector.shape_cast %459 : vector<16xf32> to vector<16x1xf32>
    %cst_98 = arith.constant 3.200000e+01 : f32
    %461 = vector.broadcast %cst_98 : f32 to vector<16x1xf32>
    %462 = arith.divf %460, %461 : vector<16x1xf32>
    %463 = vector.broadcast %462 : vector<16x1xf32> to vector<16x32xf32>
    %464 = arith.subf %457, %463 : vector<16x32xf32>
    %465 = arith.mulf %464, %464 : vector<16x32xf32>
    %cst_99 = arith.constant dense<0.000000e+00> : vector<16xf32>
    %466 = vector.multi_reduction <add>, %465, %cst_99 [1] : vector<16x32xf32> to vector<16xf32>
    %467 = vector.shape_cast %466 : vector<16xf32> to vector<16x1xf32>
    %cst_100 = arith.constant 3.200000e+01 : f32
    %468 = vector.broadcast %cst_100 : f32 to vector<16x1xf32>
    %469 = arith.divf %467, %468 : vector<16x1xf32>
    %470 = vector.broadcast %462 : vector<16x1xf32> to vector<16x32xf32>
    %471 = arith.subf %457, %470 : vector<16x32xf32>
    %cst_101 = arith.constant 9.99999974E-6 : f32
    %472 = vector.broadcast %cst_101 : f32 to vector<16x1xf32>
    %473 = arith.addf %469, %472 : vector<16x1xf32>
    %474 = math.rsqrt %473 : vector<16x1xf32>
    %475 = vector.broadcast %474 : vector<16x1xf32> to vector<16x32xf32>
    %476 = arith.mulf %471, %475 : vector<16x32xf32>
    %477 = vector.extract_strided_slice %458 {offsets = [0, 0], sizes = [1, 32], strides = [1, 1]} : vector<2x32xf32> to vector<1x32xf32>
    %478 = vector.broadcast %477 : vector<1x32xf32> to vector<16x32xf32>
    %479 = arith.mulf %476, %478 : vector<16x32xf32>
    %480 = vector.extract_strided_slice %458 {offsets = [1, 0], sizes = [1, 32], strides = [1, 1]} : vector<2x32xf32> to vector<1x32xf32>
    %481 = vector.broadcast %480 : vector<1x32xf32> to vector<16x32xf32>
    %482 = arith.addf %479, %481 : vector<16x32xf32>
    %483 = arith.truncf %482 : vector<16x32xf32> to vector<16x32xbf16>
    %c0_102 = arith.constant 0 : index
    %c1536 = arith.constant 1536 : index
    %484 = vector.load %arg2[%c0_102, %c1536] : memref<64x2304xbf16, #tpu.memory_space<vmem>>, vector<32x64xbf16>
    %cst_103 = arith.constant dense<0.000000e+00> : vector<16x64xf32>
    %485 = tpu.matmul %483, %484, %cst_103 {dimension_numbers = #tpu.dot_dimension_numbers<[1], [0], [0], [1], [0, 0, 1, 1], [], []>} : vector<16x32xbf16>, vector<32x64xbf16>, vector<16x64xf32> -> vector<16x64xf32>
    %c26 = arith.constant 26 : index
    %c0_104 = arith.constant 0 : index
    %486 = vector.load %arg3[%c26, %c0_104] : memref<40x256xf32, #tpu.memory_space<vmem>>, vector<1x64xf32>
    %487 = vector.broadcast %486 : vector<1x64xf32> to vector<16x64xf32>
    %488 = arith.addf %485, %487 : vector<16x64xf32>
    %cst_105 = arith.constant 0.000000e+00 : f32
    %489 = vector.broadcast %cst_105 : f32 to vector<16x64xf32>
    %490 = arith.maximumf %488, %489 : vector<16x64xf32>
    %491 = arith.truncf %490 : vector<16x64xf32> to vector<16x64xbf16>
    %c0_106 = arith.constant 0 : index
    %c1664 = arith.constant 1664 : index
    %492 = vector.load %arg2[%c0_106, %c1664] : memref<64x2304xbf16, #tpu.memory_space<vmem>>, vector<64x32xbf16>
    %cst_107 = arith.constant dense<0.000000e+00> : vector<16x32xf32>
    %493 = tpu.matmul %491, %492, %cst_107 {dimension_numbers = #tpu.dot_dimension_numbers<[1], [0], [0], [1], [0, 0, 1, 1], [], []>} : vector<16x64xbf16>, vector<64x32xbf16>, vector<16x32xf32> -> vector<16x32xf32>
    %c27 = arith.constant 27 : index
    %c0_108 = arith.constant 0 : index
    %494 = vector.load %arg3[%c27, %c0_108] : memref<40x256xf32, #tpu.memory_space<vmem>>, vector<1x32xf32>
    %495 = vector.broadcast %494 : vector<1x32xf32> to vector<16x32xf32>
    %496 = arith.addf %493, %495 : vector<16x32xf32>
    %497 = arith.addf %482, %496 : vector<16x32xf32>
    %c28 = arith.constant 28 : index
    %c0_109 = arith.constant 0 : index
    %498 = vector.load %arg3[%c28, %c0_109] : memref<40x256xf32, #tpu.memory_space<vmem>>, vector<2x32xf32>
    %cst_110 = arith.constant dense<0.000000e+00> : vector<16xf32>
    %499 = vector.multi_reduction <add>, %497, %cst_110 [1] : vector<16x32xf32> to vector<16xf32>
    %500 = vector.shape_cast %499 : vector<16xf32> to vector<16x1xf32>
    %cst_111 = arith.constant 3.200000e+01 : f32
    %501 = vector.broadcast %cst_111 : f32 to vector<16x1xf32>
    %502 = arith.divf %500, %501 : vector<16x1xf32>
    %503 = vector.broadcast %502 : vector<16x1xf32> to vector<16x32xf32>
    %504 = arith.subf %497, %503 : vector<16x32xf32>
    %505 = arith.mulf %504, %504 : vector<16x32xf32>
    %cst_112 = arith.constant dense<0.000000e+00> : vector<16xf32>
    %506 = vector.multi_reduction <add>, %505, %cst_112 [1] : vector<16x32xf32> to vector<16xf32>
    %507 = vector.shape_cast %506 : vector<16xf32> to vector<16x1xf32>
    %cst_113 = arith.constant 3.200000e+01 : f32
    %508 = vector.broadcast %cst_113 : f32 to vector<16x1xf32>
    %509 = arith.divf %507, %508 : vector<16x1xf32>
    %510 = vector.broadcast %502 : vector<16x1xf32> to vector<16x32xf32>
    %511 = arith.subf %497, %510 : vector<16x32xf32>
    %cst_114 = arith.constant 9.99999974E-6 : f32
    %512 = vector.broadcast %cst_114 : f32 to vector<16x1xf32>
    %513 = arith.addf %509, %512 : vector<16x1xf32>
    %514 = math.rsqrt %513 : vector<16x1xf32>
    %515 = vector.broadcast %514 : vector<16x1xf32> to vector<16x32xf32>
    %516 = arith.mulf %511, %515 : vector<16x32xf32>
    %517 = vector.extract_strided_slice %498 {offsets = [0, 0], sizes = [1, 32], strides = [1, 1]} : vector<2x32xf32> to vector<1x32xf32>
    %518 = vector.broadcast %517 : vector<1x32xf32> to vector<16x32xf32>
    %519 = arith.mulf %516, %518 : vector<16x32xf32>
    %520 = vector.extract_strided_slice %498 {offsets = [1, 0], sizes = [1, 32], strides = [1, 1]} : vector<2x32xf32> to vector<1x32xf32>
    %521 = vector.broadcast %520 : vector<1x32xf32> to vector<16x32xf32>
    %522 = arith.addf %519, %521 : vector<16x32xf32>
    %c30 = arith.constant 30 : index
    %c0_115 = arith.constant 0 : index
    %523 = vector.load %arg3[%c30, %c0_115] : memref<40x256xf32, #tpu.memory_space<vmem>>, vector<2x32xf32>
    %cst_116 = arith.constant dense<0.000000e+00> : vector<16xf32>
    %524 = vector.multi_reduction <add>, %522, %cst_116 [1] : vector<16x32xf32> to vector<16xf32>
    %525 = vector.shape_cast %524 : vector<16xf32> to vector<16x1xf32>
    %cst_117 = arith.constant 3.200000e+01 : f32
    %526 = vector.broadcast %cst_117 : f32 to vector<16x1xf32>
    %527 = arith.divf %525, %526 : vector<16x1xf32>
    %528 = vector.broadcast %527 : vector<16x1xf32> to vector<16x32xf32>
    %529 = arith.subf %522, %528 : vector<16x32xf32>
    %530 = arith.mulf %529, %529 : vector<16x32xf32>
    %cst_118 = arith.constant dense<0.000000e+00> : vector<16xf32>
    %531 = vector.multi_reduction <add>, %530, %cst_118 [1] : vector<16x32xf32> to vector<16xf32>
    %532 = vector.shape_cast %531 : vector<16xf32> to vector<16x1xf32>
    %cst_119 = arith.constant 3.200000e+01 : f32
    %533 = vector.broadcast %cst_119 : f32 to vector<16x1xf32>
    %534 = arith.divf %532, %533 : vector<16x1xf32>
    %535 = vector.broadcast %527 : vector<16x1xf32> to vector<16x32xf32>
    %536 = arith.subf %522, %535 : vector<16x32xf32>
    %cst_120 = arith.constant 9.99999974E-6 : f32
    %537 = vector.broadcast %cst_120 : f32 to vector<16x1xf32>
    %538 = arith.addf %534, %537 : vector<16x1xf32>
    %539 = math.rsqrt %538 : vector<16x1xf32>
    %540 = vector.broadcast %539 : vector<16x1xf32> to vector<16x32xf32>
    %541 = arith.mulf %536, %540 : vector<16x32xf32>
    %542 = vector.extract_strided_slice %523 {offsets = [0, 0], sizes = [1, 32], strides = [1, 1]} : vector<2x32xf32> to vector<1x32xf32>
    %543 = vector.broadcast %542 : vector<1x32xf32> to vector<16x32xf32>
    %544 = arith.mulf %541, %543 : vector<16x32xf32>
    %545 = vector.extract_strided_slice %523 {offsets = [1, 0], sizes = [1, 32], strides = [1, 1]} : vector<2x32xf32> to vector<1x32xf32>
    %546 = vector.broadcast %545 : vector<1x32xf32> to vector<16x32xf32>
    %547 = arith.addf %544, %546 : vector<16x32xf32>
    %548 = arith.truncf %547 : vector<16x32xf32> to vector<16x32xbf16>
    %c0_121 = arith.constant 0 : index
    %c1792 = arith.constant 1792 : index
    %549 = vector.load %arg2[%c0_121, %c1792] : memref<64x2304xbf16, #tpu.memory_space<vmem>>, vector<32x160xbf16>
    %cst_122 = arith.constant dense<0.000000e+00> : vector<16x160xf32>
    %550 = tpu.matmul %548, %549, %cst_122 {dimension_numbers = #tpu.dot_dimension_numbers<[1], [0], [0], [1], [0, 0, 1, 1], [], []>} : vector<16x32xbf16>, vector<32x160xbf16>, vector<16x160xf32> -> vector<16x160xf32>
    %c32 = arith.constant 32 : index
    %c0_123 = arith.constant 0 : index
    %551 = vector.load %arg3[%c32, %c0_123] : memref<40x256xf32, #tpu.memory_space<vmem>>, vector<1x160xf32>
    %552 = vector.broadcast %551 : vector<1x160xf32> to vector<16x160xf32>
    %553 = arith.addf %550, %552 : vector<16x160xf32>
    %554 = vector.extract_strided_slice %553 {offsets = [0, 0], sizes = [16, 128], strides = [1, 1]} : vector<16x160xf32> to vector<16x128xf32>
    %555 = vector.extract_strided_slice %553 {offsets = [0, 128], sizes = [16, 32], strides = [1, 1]} : vector<16x160xf32> to vector<16x32xf32>
    %cst_124 = arith.constant 0.000000e+00 : f32
    %556 = vector.broadcast %cst_124 : f32 to vector<16x32xf32>
    %557 = arith.maximumf %555, %556 : vector<16x32xf32>
    %558 = arith.truncf %557 : vector<16x32xf32> to vector<16x32xbf16>
    %c0_125 = arith.constant 0 : index
    %c2048 = arith.constant 2048 : index
    %559 = vector.load %arg2[%c0_125, %c2048] : memref<64x2304xbf16, #tpu.memory_space<vmem>>, vector<32x32xbf16>
    %cst_126 = arith.constant dense<0.000000e+00> : vector<16x32xf32>
    %560 = tpu.matmul %558, %559, %cst_126 {dimension_numbers = #tpu.dot_dimension_numbers<[1], [0], [0], [1], [0, 0, 1, 1], [], []>} : vector<16x32xbf16>, vector<32x32xbf16>, vector<16x32xf32> -> vector<16x32xf32>
    %c33 = arith.constant 33 : index
    %c0_127 = arith.constant 0 : index
    %561 = vector.load %arg3[%c33, %c0_127] : memref<40x256xf32, #tpu.memory_space<vmem>>, vector<1x32xf32>
    %562 = vector.broadcast %561 : vector<1x32xf32> to vector<16x32xf32>
    %563 = arith.addf %560, %562 : vector<16x32xf32>
    %cst_128 = arith.constant 0.000000e+00 : f32
    %564 = vector.broadcast %cst_128 : f32 to vector<16x32xf32>
    %565 = arith.maximumf %563, %564 : vector<16x32xf32>
    %566 = arith.truncf %565 : vector<16x32xf32> to vector<16x32xbf16>
    %c0_129 = arith.constant 0 : index
    %c2176 = arith.constant 2176 : index
    %567 = vector.load %arg2[%c0_129, %c2176] : memref<64x2304xbf16, #tpu.memory_space<vmem>>, vector<32x128xbf16>
    %cst_130 = arith.constant dense<0.000000e+00> : vector<16x128xf32>
    %568 = tpu.matmul %566, %567, %cst_130 {dimension_numbers = #tpu.dot_dimension_numbers<[1], [0], [0], [1], [0, 0, 1, 1], [], []>} : vector<16x32xbf16>, vector<32x128xbf16>, vector<16x128xf32> -> vector<16x128xf32>
    %c34 = arith.constant 34 : index
    %c0_131 = arith.constant 0 : index
    %569 = vector.load %arg3[%c34, %c0_131] : memref<40x256xf32, #tpu.memory_space<vmem>>, vector<1x128xf32>
    %570 = vector.broadcast %569 : vector<1x128xf32> to vector<16x128xf32>
    %571 = arith.addf %568, %570 : vector<16x128xf32>
    %572 = arith.negf %571 : vector<16x128xf32>
    %573 = math.exp %572 : vector<16x128xf32>
    %cst_132 = arith.constant 1.000000e+00 : f32
    %574 = vector.broadcast %cst_132 : f32 to vector<16x128xf32>
    %575 = arith.addf %574, %573 : vector<16x128xf32>
    %576 = arith.divf %574, %575 : vector<16x128xf32>
    %577 = tpu.iota {dimensions = array<i32: 1>} : vector<1x128xi32>
    %c5_i32 = arith.constant 5 : i32
    %578 = vector.broadcast %c5_i32 : i32 to vector<1x128xi32>
    %579 = arith.cmpi slt, %577, %578 : vector<1x128xi32>
    %580 = vector.shape_cast %579 : vector<1x128xi1> to vector<1x128xi1>
    %581 = vector.broadcast %580 : vector<1x128xi1> to vector<16x128xi1>
    %582 = arith.select %581, %554, %576 : vector<16x128xi1>, vector<16x128xf32>
    %c0_133 = arith.constant 0 : index
    %c0_134 = arith.constant 0 : index
    %583 = vector.load %arg5[%c0_133, %c0_134] : memref<16x128xf32, #tpu.memory_space<vmem>>, vector<16x128xf32>
    tpu.vector_store %arg5[%c0_133, %c0_134], %582 {strides = array<i32>} : memref<16x128xf32, #tpu.memory_space<vmem>>, vector<16x128xf32>,
    return
  }
  func.func @transform_0(%arg0: i32) -> (i32, i32) {
    %c0_i32 = arith.constant 0 : i32
    %c0_i32_0 = arith.constant 0 : i32
    return %arg0, %c0_i32 : i32, i32
  }
  func.func @transform_1(%arg0: i32) -> (i32, i32) {
    %c0_i32 = arith.constant 0 : i32
    %c0_i32_0 = arith.constant 0 : i32
    %c0_i32_1 = arith.constant 0 : i32
    return %c0_i32, %c0_i32_0 : i32, i32
  }
  func.func @transform_2(%arg0: i32) -> (i32, i32) {
    %c0_i32 = arith.constant 0 : i32
    %c0_i32_0 = arith.constant 0 : i32
    %c0_i32_1 = arith.constant 0 : i32
    return %c0_i32, %c0_i32_0 : i32, i32
  }
  func.func @transform_3(%arg0: i32) -> (i32, i32) {
    %c0_i32 = arith.constant 0 : i32
    %c0_i32_0 = arith.constant 0 : i32
    %c0_i32_1 = arith.constant 0 : i32
    return %c0_i32, %c0_i32_0 : i32, i32
  }
  func.func @transform_4(%arg0: i32) -> (i32, i32) {
    %c0_i32 = arith.constant 0 : i32
    %c0_i32_0 = arith.constant 0 : i32
    return %arg0, %c0_i32 : i32, i32
  }
}

</mosaic_0001>

<bundles_post_ra>
// kernel: detr_forward.1
= control target key start
LH: loop header
LB: loop body
LE: loop exit
PB: predicated region body
PF: predicated region fallthrough
CT: control target
= control target key end

     0   :  { %vm93_vm0 = vcmask 392192   ;;  %vm248_vm1 = vcmask 130048   ;;  %vm439_vm2 = vcmask 261120   ;;  %vm989_vm13 = vcmask 1048064   ;;  %s5602_s11 = smov 64   ;;  %s8001_s1 = inlined_call_operand.vmem [shape: bf16[64,2304], index: 1, kind: input, shape index: {}]   ;;  %s8002_s0 = inlined_call_operand.vmem [shape: f32[128,48], index: 0, kind: input, shape index: {}]   ;;  %s8003_s2 = inlined_call_operand.vmem [shape: f32[40,256], index: 2, kind: input, shape index: {}]   ;;  %s8004_s3 = inlined_call_operand.vmem [shape: f32[64,32], index: 3, kind: input, shape index: {}]   ;;  %s8005_s4 = inlined_call_operand.vmem [shape: f32[16,128], index: 4, kind: output, shape index: {}]  }
   0x1   :  { %v5175_v0 = vld [vmem:[%s8001_s1] ss:$72 sps:$4 sm:$0xff]   ;;  %v5176_v1 = vld [vmem:[%s8001_s1 + $0x90] ss:$72 sps:$4 sm:$0xff]   ;;  %v5178_v27 = vld [vmem:[%s8001_s1 + $0x4] ss:$72 sps:$4 sm:$0xff]  }
   0x2   :  { %4923 = vmatprep.subr.bf16.mxu0 %v5175_v0  ;;  %v44_v2 = vld [vmem:[%s8002_s0] sm:$0xff]  ;;  %v45_v3 = vld [vmem:[%s8002_s0 + $0x8] sm:$0xff]  ;;  %v46_v6 = vld [vmem:[%s8002_s0 + $0x10] sm:$0xff]  ;;  %4945 = vmatprep.subr.bf16.mxu1 %v5178_v27  ;;  %vm900_vm14 = vcmask 523264   ;;  %vm5603_vm15 = vmmov 0  }
   0x3   :  { %4924 = vmatpush3.bf16.msra.mxu0 %v5175_v0  ;;  %v5177_v4 = vld [vmem:[%s8001_s1 + $0x120] ss:$72 sps:$4 sm:$0xff]   ;;  %v60_v5 = vpack.c.bf16 %v45_v3, %v44_v2  ;;  %v47_v7 = vld [vmem:[%s8002_s0 + $0x18] sm:$0xff]  ;;  %v50_v12 = vld [vmem:[%s8002_s0 + $0x30] sm:$0xff]  ;;  %4946 = vmatpush3.bf16.msra.mxu1 %v5178_v27  ;;  %v8006_v27 = vmov 0  }
   0x4   :  { %4925 = vmatprep.subr.bf16.mxu0 %v5176_v1  ;;  %v48_v8 = vld [vmem:[%s8002_s0 + $0x20] sm:$0xff]  ;;  %v49_v9 = vld [vmem:[%s8002_s0 + $0x28] sm:$0xff]  ;;  %v61_v10 = vpack.c.bf16 %v47_v7, %v46_v6  ;;  %v51_v13 = vld [vmem:[%s8002_s0 + $0x38] sm:$0xff] }
   0x5   :  { %4929 = vmatprep.mubr.msk.bf16.mxu0 %vm93_vm0, %v60_v5  ;;  %v62_v11 = vpack.c.bf16 %v49_v9, %v48_v8  ;;  %v52_v14 = vld [vmem:[%s8002_s0 + $0x40] sm:$0xff]  ;;  %v53_v15 = vld [vmem:[%s8002_s0 + $0x48] sm:$0xff]  ;;  %v63_v16 = vpack.c.bf16 %v51_v13, %v50_v12  ;;  %v54_v18 = vld [vmem:[%s8002_s0 + $0x50] sm:$0xff] }
   0x6   :  { %v64_v17 = vpack.c.bf16 %v53_v15, %v52_v14  ;;  %v55_v19 = vld [vmem:[%s8002_s0 + $0x58] sm:$0xff]  ;;  %v56_v20 = vld [vmem:[%s8002_s0 + $0x60] sm:$0xff]  ;;  %v57_v21 = vld [vmem:[%s8002_s0 + $0x68] sm:$0xff] }
   0x7   :  { %4926 = vmatpush3.bf16.msra.mxu0 %v5176_v1  ;;  %v65_v22 = vpack.c.bf16 %v55_v19, %v54_v18  ;;  %v66_v23 = vpack.c.bf16 %v57_v21, %v56_v20  ;;  %v58_v24 = vld [vmem:[%s8002_s0 + $0x70] sm:$0xff]  ;;  %v59_v25 = vld [vmem:[%s8002_s0 + $0x78] sm:$0xff] }
   0x8   :  { %4927 = vmatprep.subr.bf16.mxu0 %v5177_v4  ;;  %v67_v26 = vpack.c.bf16 %v59_v25, %v58_v24  ;;  %v5181_v28 = vld [vmem:[%s8001_s1 + $0xc] ss:$72 sps:$4 sm:$0xff]   ;;  %v5703_v29 = vld [vmem:[%s8003_s2 + $0x11] ss:$0 sm:$0xff]  ;;  %v5184_v48 = vld [vmem:[%s8001_s1 + $0x9c] ss:$72 sps:$4 sm:$0xff]  }
   0x9   :  { %464 = vmatprep.subr.bf16.mxu1 %v5181_v28  ;;  %v5179_v45 = vld [vmem:[%s8001_s1 + $0x8] ss:$72 sps:$4 sm:$0xff]   ;;  %v5182_v56 = vld [vmem:[%s8001_s1 + $0x98] ss:$72 sps:$4 sm:$0xff]  }
   0xa   :  { %v5185_v25 = vld [vmem:[%s8001_s1 + $0x10] ss:$72 sps:$4 sm:$0xff]  }
   0xb   :  { %4928 = vmatpush3.bf16.msra.mxu0 %v5177_v4  ;;  %v5748_v28 = vld [vmem:[%s8003_s2 + $0x12] ss:$0 sm:$0xff] }
   0xc   :  { %4963 = vmatprep.subr.bf16.mxu0 %v5185_v25 }
   0xe   :  { %4930 = vmatmul.mubr.msk.bf16.vlgmr.msra.gmra.mrb[0].mxu0 %vm93_vm0, %v61_v10 }
   0xf   :  { %4933 = vmatprep.mubr.msk.bf16.mxu0 %vm93_vm0, %v62_v11  ;;  %4964 = vmatpush3.bf16.msra.mxu0 %v5185_v25 }
  0x16   :  { %4934 = vmatmul.mubr.msk.bf16.gmra.mrb[4].mxu0 %vm93_vm0, %v63_v16 }
  0x17   :  { %4937 = vmatprep.mubr.msk.bf16.mxu0 %vm93_vm0, %v64_v17 }
  0x1e   :  { %4938 = vmatmul.mubr.msk.bf16.gmra.mrb[8].mxu0 %vm93_vm0, %v65_v22 }
  0x1f   :  { %4941 = vmatprep.mubr.msk.bf16.mxu0 %vm93_vm0, %v66_v23 }
  0x26   :  { %4942 = vmatmul.mubr.msk.bf16.gmra.mrb[12].mxu0 %vm93_vm0, %v67_v26  ;;  %v5186_v26 = vld [vmem:[%s8001_s1 + $0xa0] ss:$72 sps:$4 sm:$0xff]  }
  0x27   :  { %4965 = vmatprep.subr.bf16.mxu0 %v5186_v26 }
  0x28   :  { %4966 = vmatpush3.bf16.msra.mxu0 %v5186_v26 }
  0xe1   :  { %v4931_v30 = vpop.f32.mrb[0].mxu0 }
  0xe2   :  { %v161_v31 = vadd.f32 %v4931_v30, %v5703_v29  ;;  %v152_v32 = vpop.f32.mrb[1].mxu0 }
  0xe3   :  { %v153_v33 = vadd.f32 %v152_v32, %v5703_v29  ;;  %v4932_v34 = vpop.f32.mrb[2].mxu0 }
  0xe4   :  { %v164_v35 = vadd.f32 %v4932_v34, %v5703_v29  ;;  %v155_v36 = vpop.f32.mrb[3].mxu0  ;;  %v217_v38 = vmax.f32 %v161_v31, 0.0 }
  0xe5   :  { %v156_v37 = vadd.f32 %v155_v36, %v5703_v29  ;;  %v215_v40 = vmax.f32 %v153_v33, 0.0  ;;  %v5756_v33 = vld [vmem:[%s8004_s3] sm:$0xff]  ;;  %v5764_v36 = vld [vmem:[%s8004_s3 + $0x8] sm:$0xff] }
  0xe6   :  { %v218_v39 = vmax.f32 %v164_v35, 0.0 }
  0xe7   :  { %v216_v41 = vmax.f32 %v156_v37, 0.0 }
  0xe8   :  { %v232_v42 = vpack.c.bf16 %v218_v39, %v217_v38 }
  0xe9   :  { %v4935_v43 = vpop.f32.mrb[4].mxu0  ;;  %v231_v44 = vpack.c.bf16 %v216_v41, %v215_v40 }
  0xea   :  { %v177_v46 = vadd.f32 %v4935_v43, %v5703_v29  ;;  %v168_v47 = vpop.f32.mrb[5].mxu0 }
  0xeb   :  { %v169_v49 = vadd.f32 %v168_v47, %v5703_v29  ;;  %v4936_v50 = vpop.f32.mrb[6].mxu0  ;;  %4947 = vmatprep.mubr.msk.bf16.mxu1 %vm248_vm1, %v231_v44 }
  0xec   :  { %v221_v51 = vmax.f32 %v177_v46, 0.0  ;;  %v180_v52 = vadd.f32 %v4936_v50, %v5703_v29  ;;  %v171_v53 = vpop.f32.mrb[7].mxu0  ;;  %4948 = vmatmul.mubr.msk.bf16.vlgmr.msra.gmra.mrb[0].mxu1 %vm248_vm1, %v232_v42  ;;  %v372_v50 = vld [vmem:[%s8004_s3 + $0x10] sm:$0xff] }
  0xed   :  { %v219_v54 = vmax.f32 %v169_v49, 0.0  ;;  %v172_v55 = vadd.f32 %v171_v53, %v5703_v29  ;;  %465 = vmatpush1.bf16.msra.mxu1 %v5179_v45  ;;  %v5784_v45 = vld [vmem:[%s8004_s3 + $0x18] sm:$0xff] }
  0xee   :  { %v222_v57 = vmax.f32 %v180_v52, 0.0  ;;  %466 = vmatprep.subr.bf16.mxu1 %v5184_v48 }
  0xef   :  { %v220_v58 = vmax.f32 %v172_v55, 0.0 }
  0xf0   :  { %v234_v59 = vpack.c.bf16 %v222_v57, %v221_v51 }
  0xf1   :  { %v233_v60 = vpack.c.bf16 %v220_v58, %v219_v54  ;;  %v4939_v61 = vpop.f32.mrb[8].mxu0  ;;  %467 = vmatpush1.bf16.msra.mxu1 %v5182_v56 }
  0xf2   :  { %v193_v62 = vadd.f32 %v4939_v61, %v5703_v29  ;;  %v184_v63 = vpop.f32.mrb[9].mxu0  ;;  %v375_v61 = vld [vmem:[%s8004_s3 + $0x28] sm:$0xff] }
  0xf3   :  { %4951 = vmatprep.mubr.msk.bf16.mxu1 %vm248_vm1, %v233_v60  ;;  %v185_v0 = vadd.f32 %v184_v63, %v5703_v29  ;;  %v4940_v1 = vpop.f32.mrb[10].mxu0  ;;  %v374_v60 = vld [vmem:[%s8004_s3 + $0x20] sm:$0xff] }
  0xf4   :  { %4952 = vmatmul.mubr.msk.bf16.gmra.mrb[4].mxu1 %vm248_vm1, %v234_v59  ;;  %v225_v2 = vmax.f32 %v193_v62, 0.0  ;;  %v196_v3 = vadd.f32 %v4940_v1, %v5703_v29  ;;  %v187_v4 = vpop.f32.mrb[11].mxu0 }
  0xf5   :  { %v223_v5 = vmax.f32 %v185_v0, 0.0  ;;  %v188_v6 = vadd.f32 %v187_v4, %v5703_v29 }
  0xf6   :  { %v226_v7 = vmax.f32 %v196_v3, 0.0 }
  0xf7   :  { %v224_v8 = vmax.f32 %v188_v6, 0.0 }
  0xf8   :  { %v236_v9 = vpack.c.bf16 %v226_v7, %v225_v2 }
  0xf9   :  { %v235_v10 = vpack.c.bf16 %v224_v8, %v223_v5  ;;  %v4943_v11 = vpop.f32.mrb[12].mxu0 }
  0xfa   :  { %v209_v12 = vadd.f32 %v4943_v11, %v5703_v29  ;;  %v200_v13 = vpop.f32.mrb[13].mxu0  ;;  %v376_v11 = vld [vmem:[%s8004_s3 + $0x30] sm:$0xff] }
  0xfb   :  { %v201_v14 = vadd.f32 %v200_v13, %v5703_v29  ;;  %v4944_v15 = vpop.f32.mrb[14].mxu0  ;;  %4955 = vmatprep.mubr.msk.bf16.mxu1 %vm248_vm1, %v235_v10 }
  0xfc   :  { %v229_v16 = vmax.f32 %v209_v12, 0.0  ;;  %v212_v17 = vadd.f32 %v4944_v15, %v5703_v29  ;;  %v203_v18 = vpop.f32.mrb[15].mxu0  ;;  %4956 = vmatmul.mubr.msk.bf16.gmra.mrb[8].mxu1 %vm248_vm1, %v236_v9  ;;  %v377_v12 = vld [vmem:[%s8004_s3 + $0x38] sm:$0xff] }
  0xfd   :  { %v227_v19 = vmax.f32 %v201_v14, 0.0  ;;  %v204_v20 = vadd.f32 %v203_v18, %v5703_v29 }
  0xfe   :  { %v230_v21 = vmax.f32 %v212_v17, 0.0 }
  0xff   :  { %v228_v22 = vmax.f32 %v204_v20, 0.0 }
 0x100   :  { %v238_v23 = vpack.c.bf16 %v230_v21, %v229_v16 }
 0x101   :  { %v237_v24 = vpack.c.bf16 %v228_v22, %v227_v19 }
 0x103   :  { %4959 = vmatprep.mubr.msk.bf16.mxu1 %vm248_vm1, %v237_v24 }
 0x104   :  { %4960 = vmatmul.mubr.msk.bf16.gmra.mrb[12].mxu1 %vm248_vm1, %v238_v23 }
 0x105   :  { %496 = vmatprep.mubr.bf16.mxu1 %v8006_v27 }
 0x1bf   :  { %v4949_v29 = vpop.f32.mrb[0].mxu1 }
 0x1c0   :  { %v307_v30 = vpop.f32.mrb[1].mxu1  ;;  %v5770_v38 = vadd.f32 %v4949_v29, %v5748_v28 }
 0x1c1   :  { %v5751_v31 = vadd.f32 %v307_v30, %v5748_v28  ;;  %v4950_v32 = vpop.f32.mrb[2].mxu1 }
 0x1c2   :  { %v5759_v34 = vadd.f32 %v4950_v32, %v5748_v28  ;;  %v310_v35 = vpop.f32.mrb[3].mxu1  ;;  %8045 = vst [vmem:[#allocation5_spill] sm:$0xff] %v5770_v38  ;;  %v380_v56 = vadd.f32 %v372_v50, %v5770_v38 }
 0x1c3   :  { %8042 = vst [vmem:[#allocation2_spill] sm:$0xff] %v5751_v31  ;;  %v5767_v37 = vadd.f32 %v310_v35, %v5748_v28  ;;  %v378_v39 = vadd.f32 %v5756_v33, %v5751_v31 }
 0x1c4   :  { %8043 = vst [vmem:[#allocation3_spill] sm:$0xff] %v5759_v34  ;;  %v578_v42 = vpack.c.bf16 %v5759_v34, %v5770_v38  ;;  %v381_v53 = vadd.f32 %v5784_v45, %v5759_v34 }
 0x1c5   :  { %8044 = vst [vmem:[#allocation4_spill] sm:$0xff] %v5767_v37  ;;  %v379_v40 = vadd.f32 %v5764_v36, %v5767_v37  ;;  %v577_v41 = vpack.c.bf16 %v5767_v37, %v5751_v31 }
 0x1c6   :  { %v395_v58 = vpack.c.bf16 %v381_v53, %v380_v56  ;;  %v8007_v53 = vmov 0.0  }
 0x1c7   :  { %v394_v43 = vpack.c.bf16 %v379_v40, %v378_v39  ;;  %v4953_v44 = vpop.f32.mrb[4].mxu1  ;;  %4967 = vmatprep.mubr.msk.bf16.mxu0 %vm439_vm2, %v577_v41 }
 0x1c8   :  { %v5787_v46 = vadd.f32 %v4953_v44, %v5748_v28  ;;  %v323_v47 = vpop.f32.mrb[5].mxu1  ;;  %4968 = vmatmul.mubr.msk.bf16.vlgmr.msra.gmra.mrb[16].mxu0 %vm439_vm2, %v578_v42  ;;  %v18_v42 = vlaneseq }
 0x1c9   :  { %v5791_v48 = vadd.f32 %v323_v47, %v5748_v28  ;;  %v4954_v49 = vpop.f32.mrb[6].mxu1  ;;  %4505 = vmatmul.mubr.msk.bf16.vlgmr.msra.gmra.mrb[16].mxu1 %vm439_vm2, %v394_v43  ;;  %v4500_v47 = vld [vmem:[%s8003_s2 + $0x13] ss:$8 sm:$0x3] }
 0x1ca   :  { %8046 = vst [vmem:[#allocation6_spill] sm:$0xff] %v5787_v46  ;;  %v5798_v51 = vadd.f32 %v4954_v49, %v5748_v28  ;;  %v326_v52 = vpop.f32.mrb[7].mxu1  ;;  %506 = vmatprep.mubr.bf16.mxu1 %v8006_v27  ;;  %v384_v19 = vadd.f32 %v376_v11, %v5787_v46  ;;  %v5889_v43 = vand.u32 127, %v18_v42  ;;  %v5891_v44 = vshrl.u32 %v18_v42, 7 }
 0x1cb   :  { %8047 = vst [vmem:[#allocation7_spill] sm:$0xff] %v5791_v48  ;;  %v5804_v54 = vadd.f32 %v326_v52, %v5748_v28  ;;  %v382_v4 = vadd.f32 %v374_v60, %v5791_v48  ;;  %v5908_v52 = vld [vmem:[%s8003_s2 + $0x14] ss:$0 sm:$0xff] }
 0x1cc   :  { %8048 = vst [vmem:[#allocation8_spill] sm:$0xff] %v5798_v51  ;;  %v580_v55 = vpack.c.bf16 %v5798_v51, %v5787_v46  ;;  %v385_v20 = vadd.f32 %v377_v12, %v5798_v51  ;;  %8058 = vst [vmem:[#allocation18_spill] sm:$0xff] %v5889_v43  ;;  %vm32_vm3 = vcmp.ge.s32.totalorder %v5889_v43, 16  ;;  %vm33_vm4 = vcmp.lt.s32.totalorder %v5889_v43, 24 }
 0x1cd   :  { %8049 = vst [vmem:[#allocation9_spill] sm:$0xff] %v5804_v54  ;;  %v579_v57 = vpack.c.bf16 %v5804_v54, %v5791_v48  ;;  %v383_v5 = vadd.f32 %v375_v61, %v5804_v54  ;;  %8059 = vst [vmem:[#allocation19_spill] sm:$0xff] %v5891_v44  ;;  %vm21_vm5 = vcmp.lt.s32.totalorder %v5889_v43, 8  ;;  %v5903_v49 = vsub.s32 1, %v5891_v44 }
 0x1ce   :  { %v397_v24 = vpack.c.bf16 %v385_v20, %v384_v19  ;;  %vm34_vm6 = vmand %vm32_vm3, %vm33_vm4  ;;  %vm38_vm7 = vcmp.ge.s32.totalorder %v5889_v43, 24  ;;  %vm39_vm8 = vcmp.lt.s32.totalorder %v5889_v43, 32  ;;  %vm26_vm9 = vcmp.ge.s32.totalorder %v5889_v43, 8 }
 0x1cf   :  { %4971 = vmatprep.mubr.msk.bf16.mxu0 %vm439_vm2, %v579_v57  ;;  %v4957_v59 = vpop.f32.mrb[8].mxu1  ;;  %v396_v9 = vpack.c.bf16 %v383_v5, %v382_v4  ;;  %8061 = vst [vmem:[#allocation21_spill] sm:$0xff] %v5903_v49  ;;  %v4478_v56 = vsel %vm34_vm6, 1.0, %v8007_v53  ;;  %vm27_vm10 = vcmp.lt.s32.totalorder %v5889_v43, 16  ;;  %vm5959_vm11 = vmand %vm38_vm7, %vm39_vm8 }
 0x1d0   :  { %4972 = vmatmul.mubr.msk.bf16.gmra.mrb[20].mxu0 %vm439_vm2, %v580_v55  ;;  %v5820_v62 = vadd.f32 %v4957_v59, %v5748_v28  ;;  %v339_v63 = vpop.f32.mrb[9].mxu1  ;;  %v4476_v55 = vsel %vm21_vm5, 1.0, %v8007_v53  ;;  %v5921_v4 = vpack.c.bf16 %v4478_v56, %v4478_v56  ;;  %vm28_vm12 = vmand %vm26_vm9, %vm27_vm10 }
 0x1d1   :  { %4506 = vmatmul.mubr.msk.bf16.gmra.mrb[20].mxu1 %vm439_vm2, %v395_v58  ;;  %v5824_v0 = vadd.f32 %v339_v63, %v5748_v28  ;;  %v4958_v1 = vpop.f32.mrb[10].mxu1 }
 0x1d2   :  { %8050 = vst [vmem:[#allocation10_spill] sm:$0xff] %v5820_v62  ;;  %516 = vmatprep.mubr.bf16.mxu1 %v8006_v27  ;;  %v5828_v2 = vadd.f32 %v4958_v1, %v5748_v28  ;;  %v342_v3 = vpop.f32.mrb[11].mxu1  ;;  %v388_v29 = vadd.f32 %v372_v50, %v5820_v62  ;;  %8063 = vst [vmem:[#allocation23_spill] sm:$0xff] %v5921_v4 }
 0x1d3   :  { %8051 = vst [vmem:[#allocation11_spill] sm:$0xff] %v5824_v0  ;;  %v5833_v6 = vadd.f32 %v342_v3, %v5748_v28  ;;  %v386_v25 = vadd.f32 %v5756_v33, %v5824_v0  ;;  %v5919_v3 = vpack.c.bf16 %v4476_v55, %v4476_v55 }
 0x1d4   :  { %8052 = vst [vmem:[#allocation12_spill] sm:$0xff] %v5828_v2  ;;  %v582_v7 = vpack.c.bf16 %v5828_v2, %v5820_v62  ;;  %v389_v30 = vadd.f32 %v5784_v45, %v5828_v2  ;;  %v5896_v45 = vsub.s32 0, %v5891_v44 }
 0x1d5   :  { %8053 = vst [vmem:[#allocation13_spill] sm:$0xff] %v5833_v6  ;;  %v581_v8 = vpack.c.bf16 %v5833_v6, %v5824_v0  ;;  %v387_v26 = vadd.f32 %v5764_v36, %v5833_v6  ;;  %8062 = vst [vmem:[#allocation22_spill] sm:$0xff] %v5919_v3 }
 0x1d6   :  { %v399_v32 = vpack.c.bf16 %v389_v30, %v388_v29  ;;  %8060 = vst [vmem:[#allocation20_spill] sm:$0xff] %v5896_v45  ;;  %v5913_v57 = vrot.slane %v4500_v47, %v5896_v45 }
 0x1d7   :  { %v4961_v10 = vpop.f32.mrb[12].mxu1  ;;  %4975 = vmatprep.mubr.msk.bf16.mxu0 %vm439_vm2, %v581_v8 }
 0x1d8   :  { %v5847_v13 = vadd.f32 %v4961_v10, %v5748_v28  ;;  %v355_v14 = vpop.f32.mrb[13].mxu1  ;;  %4976 = vmatmul.mubr.msk.bf16.gmra.mrb[24].mxu0 %vm439_vm2, %v582_v7 }
 0x1d9   :  { %4507 = vmatmul.mubr.msk.bf16.gmra.mrb[24].mxu1 %vm439_vm2, %v396_v9  ;;  %v5852_v15 = vadd.f32 %v355_v14, %v5748_v28  ;;  %v4962_v16 = vpop.f32.mrb[14].mxu1 }
 0x1da   :  { %8054 = vst [vmem:[#allocation14_spill] sm:$0xff] %v5847_v13  ;;  %526 = vmatprep.mubr.bf16.mxu1 %v8006_v27  ;;  %v5856_v17 = vadd.f32 %v4962_v16, %v5748_v28  ;;  %v358_v18 = vpop.f32.mrb[15].mxu1  ;;  %v392_v39 = vadd.f32 %v376_v11, %v5847_v13 }
 0x1db   :  { %8055 = vst [vmem:[#allocation15_spill] sm:$0xff] %v5852_v15  ;;  %v5861_v21 = vadd.f32 %v358_v18, %v5748_v28  ;;  %v398_v28 = vpack.c.bf16 %v387_v26, %v386_v25  ;;  %v390_v35 = vadd.f32 %v374_v60, %v5852_v15  ;;  %v5916_v60 = vrot.slane %v4500_v47, %v5903_v49 }
 0x1dc   :  { %8056 = vst [vmem:[#allocation16_spill] sm:$0xff] %v5856_v17  ;;  %v584_v22 = vpack.c.bf16 %v5856_v17, %v5847_v13  ;;  %v393_v40 = vadd.f32 %v377_v12, %v5856_v17 }
 0x1dd   :  { %8057 = vst [vmem:[#allocation17_spill] sm:$0xff] %v5861_v21  ;;  %v583_v23 = vpack.c.bf16 %v5861_v21, %v5852_v15  ;;  %v391_v33 = vadd.f32 %v375_v61, %v5861_v21 }
 0x1de   :  { %v401_v41 = vpack.c.bf16 %v393_v40, %v392_v39 }
 0x1df   :  { %4979 = vmatprep.mubr.msk.bf16.mxu0 %vm439_vm2, %v583_v23  ;;  %v400_v36 = vpack.c.bf16 %v391_v33, %v390_v35 }
 0x1e0   :  { %4980 = vmatmul.mubr.msk.bf16.gmra.mrb[28].mxu0 %vm439_vm2, %v584_v22 }
 0x1e1   :  { %4508 = vmatmul.mubr.msk.bf16.gmra.mrb[28].mxu1 %vm439_vm2, %v397_v24 }
 0x1e2   :  { %536 = vmatprep.mubr.bf16.mxu1 %v8006_v27 }
 0x1e9   :  { %4509 = vmatmul.mubr.msk.bf16.gmra.mrb[32].mxu1 %vm439_vm2, %v398_v28 }
 0x1ea   :  { %546 = vmatprep.mubr.bf16.mxu1 %v8006_v27 }
 0x1f1   :  { %4510 = vmatmul.mubr.msk.bf16.gmra.mrb[36].mxu1 %vm439_vm2, %v399_v32 }
 0x1f2   :  { %556 = vmatprep.mubr.bf16.mxu1 %v8006_v27 }
 0x1f9   :  { %4511 = vmatmul.mubr.msk.bf16.gmra.mrb[40].mxu1 %vm439_vm2, %v400_v36 }
 0x1fa   :  { %566 = vmatprep.mubr.bf16.mxu1 %v8006_v27 }
 0x201   :  { %4512 = vmatmul.mubr.msk.bf16.gmra.mrb[44].mxu1 %vm439_vm2, %v401_v41 }
 0x29b   :  { %v4969_v50 = vpop.f32.mrb[16].mxu0 }
 0x29c   :  { %v498_v58 = vpop.f32.mrb[16].mxu1  ;;  %v660_v59 = vpop.f32.mrb[17].mxu0  ;;  %v669_v1 = vadd.f32 %v4969_v50, %v5908_v52 }
 0x29d   :  { %v500_v61 = vpop.f32.mrb[17].mxu1  ;;  %v4970_v63 = vpop.f32.mrb[18].mxu0  ;;  %v499_v9 = vadd.f32 %v498_v58, %v5913_v57  ;;  %v661_v10 = vadd.f32 %v660_v59, %v5908_v52 }
 0x29e   :  { %v672_v5 = vadd.f32 %v4970_v63, %v5908_v52  ;;  %v502_v7 = vpop.f32.mrb[18].mxu1  ;;  %v663_v8 = vpop.f32.mrb[19].mxu0  ;;  %v501_v16 = vadd.f32 %v500_v61, %v5916_v60 }
 0x29f   :  { %v503_v11 = vadd.f32 %v502_v7, %v5913_v57  ;;  %v664_v12 = vadd.f32 %v663_v8, %v5908_v52  ;;  %v504_v14 = vpop.f32.mrb[19].mxu1  ;;  %v4479_v8 = vsel %vm5959_vm11, 1.0, %v8007_v53 }
 0x2a0   :  { %v5929_v18 = vpack.c.bf16 %v672_v5, %v669_v1  ;;  %v505_v19 = vadd.f32 %v504_v14, %v5916_v60 }
 0x2a1   :  { %v5932_v20 = vpack.c.bf16 %v503_v11, %v499_v9  ;;  %v5934_v22 = vpack.c.bf16 %v664_v12, %v661_v10 }
 0x2a2   :  { %v5936_v23 = vpack.c.bf16 %v505_v19, %v501_v16  ;;  %v760_v39 = vmul.bf16 %v5929_v18, %v5921_v4  ;;  %v752_v7 = vmul.bf16 %v5929_v18, %v5919_v3  ;;  %v4477_v19 = vsel %vm28_vm12, 1.0, %v8007_v53 }
 0x2a3   :  { %v4973_v24 = vpop.f32.mrb[20].mxu0  ;;  %4659 = vmatprep.mubr.msk.bf16.mxu1 %vm439_vm2, %v5932_v20  ;;  %v759_v25 = vmul.bf16 %v5934_v22, %v5921_v4  ;;  %v751_v26 = vmul.bf16 %v5934_v22, %v5919_v3 }
 0x2a4   :  { %v508_v28 = vpop.f32.mrb[20].mxu1  ;;  %v676_v29 = vpop.f32.mrb[21].mxu0  ;;  %v743_v30 = vmul.bf16 %v5936_v23, %v5921_v4  ;;  %v735_v32 = vmul.bf16 %v5936_v23, %v5919_v3  ;;  %v685_v41 = vadd.f32 %v4973_v24, %v5908_v52  ;;  %v5994_v24 = vpack.c.bf16 %v4479_v8, %v4479_v8 }
 0x2a5   :  { %v509_v35 = vadd.f32 %v508_v28, %v5913_v57  ;;  %v510_v33 = vpop.f32.mrb[21].mxu1  ;;  %v4974_v36 = vpop.f32.mrb[22].mxu0  ;;  %4667 = vmatprep.subr.bf16.mxu0 %v759_v25  ;;  %v677_v56 = vadd.f32 %v676_v29, %v5908_v52 }
 0x2a6   :  { %v688_v42 = vadd.f32 %v4974_v36, %v5908_v52  ;;  %v512_v47 = vpop.f32.mrb[22].mxu1  ;;  %v679_v50 = vpop.f32.mrb[23].mxu0  ;;  %5139 = vmatprep.subr.msk.bf16.mxu1 %vm439_vm2, %v743_v30  ;;  %4668 = vmatpush3.bf16.msra.mxu0 %v751_v26  ;;  %v780_v55 = vsel %vm439_vm2, %v735_v32, 0  ;;  %v511_v63 = vadd.f32 %v510_v33, %v5916_v60  ;;  %8066 = vst [vmem:[#allocation24_spill] sm:$0xff] %v5994_v24 }
 0x2a7   :  { %v513_v58 = vadd.f32 %v512_v47, %v5913_v57  ;;  %v680_v59 = vadd.f32 %v679_v50, %v5908_v52  ;;  %v514_v61 = vpop.f32.mrb[23].mxu1  ;;  %4644 = vmatpush3.bf16.xpose.msra.mxu1 %v780_v55  ;;  %4669 = vmatprep.subr.bf16.mxu0 %v760_v39  ;;  %v6008_v50 = vpack.c.bf16 %v4477_v19, %v4477_v19 }
 0x2a8   :  { %v5971_v1 = vpack.c.bf16 %v688_v42, %v685_v41  ;;  %v515_v5 = vadd.f32 %v514_v61, %v5916_v60  ;;  %v763_v8 = vmul.bf16 %v5934_v22, %v5994_v24 }
 0x2a9   :  { %v5983_v9 = vpack.c.bf16 %v513_v58, %v509_v35  ;;  %v5985_v10 = vpack.c.bf16 %v680_v59, %v677_v56  ;;  %8067 = vst [vmem:[#allocation25_spill] sm:$0xff] %v6008_v50 }
 0x2aa   :  { %v5987_v11 = vpack.c.bf16 %v515_v5, %v511_v63  ;;  %4670 = vmatpush3.bf16.msra.mxu0 %v752_v7  ;;  %v762_v35 = vmul.bf16 %v5971_v1, %v5921_v4  ;;  %v754_v63 = vmul.bf16 %v5971_v1, %v5919_v3 }
 0x2ab   :  { %v761_v12 = vmul.bf16 %v5985_v10, %v5921_v4  ;;  %v753_v14 = vmul.bf16 %v5985_v10, %v5919_v3  ;;  %v4977_v16 = vpop.f32.mrb[24].mxu0 }
 0x2ac   :  { %v518_v25 = vpop.f32.mrb[24].mxu1  ;;  %v744_v26 = vmul.bf16 %v5987_v11, %v5921_v4  ;;  %v736_v28 = vmul.bf16 %v5987_v11, %v5919_v3  ;;  %v692_v29 = vpop.f32.mrb[25].mxu0  ;;  %v701_v33 = vadd.f32 %v4977_v16, %v5908_v52 }
 0x2ad   :  { %v519_v30 = vadd.f32 %v518_v25, %v5913_v57  ;;  %v520_v32 = vpop.f32.mrb[25].mxu1  ;;  %4671 = vmatprep.subr.bf16.mxu0 %v761_v12  ;;  %v693_v36 = vadd.f32 %v692_v29, %v5908_v52  ;;  %v4978_v39 = vpop.f32.mrb[26].mxu0 }
 0x2ae   :  { %v522_v40 = vpop.f32.mrb[26].mxu1  ;;  %5140 = vmatprep.subr.msk.bf16.mxu1 %vm439_vm2, %v744_v26  ;;  %4672 = vmatpush3.bf16.msra.mxu0 %v753_v14  ;;  %v783_v41 = vsel %vm439_vm2, %v736_v28, 0  ;;  %v704_v42 = vadd.f32 %v4978_v39, %v5908_v52  ;;  %v695_v47 = vpop.f32.mrb[27].mxu0  ;;  %v521_v59 = vadd.f32 %v520_v32, %v5916_v60  ;;  %v755_v26 = vmul.bf16 %v5934_v22, %v6008_v50 }
 0x2af   :  { %v523_v55 = vadd.f32 %v522_v40, %v5913_v57  ;;  %v524_v56 = vpop.f32.mrb[27].mxu1  ;;  %4646 = vmatpush3.bf16.xpose.msra.mxu1 %v783_v41  ;;  %4673 = vmatprep.subr.bf16.mxu0 %v762_v35  ;;  %v696_v58 = vadd.f32 %v695_v47, %v5908_v52  ;;  %v764_v35 = vmul.bf16 %v5929_v18, %v5994_v24 }
 0x2b0   :  { %v525_v61 = vadd.f32 %v524_v56, %v5916_v60  ;;  %v6016_v5 = vpack.c.bf16 %v704_v42, %v701_v33 }
 0x2b1   :  { %v6018_v7 = vpack.c.bf16 %v523_v55, %v519_v30  ;;  %v6022_v12 = vpack.c.bf16 %v696_v58, %v693_v36 }
 0x2b2   :  { %v6024_v14 = vpack.c.bf16 %v525_v61, %v521_v59  ;;  %4674 = vmatpush3.bf16.msra.mxu0 %v754_v63  ;;  %v756_v61 = vmul.bf16 %v5929_v18, %v6008_v50 }
 0x2b3   :  { %4675 = vmatprep.subr.bf16.mxu0 %v763_v8  ;;  %v4981_v16 = vpop.f32.mrb[28].mxu0 }
 0x2b4   :  { %v528_v19 = vpop.f32.mrb[28].mxu1  ;;  %v745_v25 = vmul.bf16 %v6024_v14, %v5921_v4  ;;  %v737_v28 = vmul.bf16 %v6024_v14, %v5919_v3  ;;  %v708_v29 = vpop.f32.mrb[29].mxu0  ;;  %v717_v33 = vadd.f32 %v4981_v16, %v5908_v52  ;;  %v765_v16 = vmul.bf16 %v5985_v10, %v5994_v24 }
 0x2b5   :  { %v529_v30 = vadd.f32 %v528_v19, %v5913_v57  ;;  %v530_v32 = vpop.f32.mrb[29].mxu1  ;;  %v709_v36 = vadd.f32 %v708_v29, %v5908_v52  ;;  %v4982_v39 = vpop.f32.mrb[30].mxu0  ;;  %v766_v29 = vmul.bf16 %v5971_v1, %v5994_v24 }
 0x2b6   :  { %v532_v40 = vpop.f32.mrb[30].mxu1  ;;  %5141 = vmatprep.subr.msk.bf16.mxu1 %vm439_vm2, %v745_v25  ;;  %4676 = vmatpush3.bf16.msra.mxu0 %v755_v26  ;;  %v786_v22 = vsel %vm439_vm2, %v737_v28, 0  ;;  %v720_v41 = vadd.f32 %v4982_v39, %v5908_v52  ;;  %v711_v42 = vpop.f32.mrb[31].mxu0  ;;  %v531_v58 = vadd.f32 %v530_v32, %v5916_v60  ;;  %v757_v26 = vmul.bf16 %v5985_v10, %v6008_v50 }
 0x2b7   :  { %v533_v47 = vadd.f32 %v532_v40, %v5913_v57  ;;  %v534_v55 = vpop.f32.mrb[31].mxu1  ;;  %4648 = vmatpush3.bf16.xpose.msra.mxu1 %v786_v22  ;;  %4677 = vmatprep.subr.bf16.mxu0 %v764_v35  ;;  %v712_v56 = vadd.f32 %v711_v42, %v5908_v52  ;;  %v758_v22 = vmul.bf16 %v5971_v1, %v6008_v50 }
 0x2b8   :  { %v535_v59 = vadd.f32 %v534_v55, %v5916_v60  ;;  %v6046_v63 = vpack.c.bf16 %v720_v41, %v717_v33  ;;  %v747_v33 = vmul.bf16 %v5936_v23, %v5994_v24  ;;  %v748_v1 = vmul.bf16 %v5987_v11, %v5994_v24 }
 0x2b9   :  { %v6048_v8 = vpack.c.bf16 %v533_v47, %v529_v30  ;;  %v6052_v19 = vpack.c.bf16 %v712_v56, %v709_v36  ;;  %v739_v47 = vmul.bf16 %v5936_v23, %v6008_v50 }
 0x2ba   :  { %v6054_v25 = vpack.c.bf16 %v535_v59, %v531_v58  ;;  %4678 = vmatpush3.bf16.msra.mxu0 %v756_v61 }
 0x2bb   :  { %4679 = vmatprep.subr.bf16.mxu0 %v765_v16  ;;  %v792_v16 = vsel %vm439_vm2, %v739_v47, 0 }
 0x2bc   :  { %v746_v52 = vmul.bf16 %v6054_v25, %v5921_v4  ;;  %v738_v18 = vmul.bf16 %v6054_v25, %v5919_v3  ;;  %v538_v28 = vpop.f32.mrb[32].mxu1 }
 0x2bd   :  { %v539_v30 = vadd.f32 %v538_v28, %v5913_v57  ;;  %v540_v32 = vpop.f32.mrb[33].mxu1 }
 0x2be   :  { %5142 = vmatprep.subr.msk.bf16.mxu1 %vm439_vm2, %v746_v52  ;;  %4680 = vmatpush3.bf16.msra.mxu0 %v757_v26  ;;  %v789_v35 = vsel %vm439_vm2, %v738_v18, 0  ;;  %v541_v10 = vadd.f32 %v540_v32, %v5916_v60  ;;  %v542_v36 = vpop.f32.mrb[34].mxu1 }
 0x2bf   :  { %4650 = vmatpush3.bf16.xpose.msra.mxu1 %v789_v35  ;;  %4681 = vmatprep.subr.bf16.mxu0 %v766_v29  ;;  %v543_v39 = vadd.f32 %v542_v36, %v5913_v57  ;;  %v544_v40 = vpop.f32.mrb[35].mxu1 }
 0x2c0   :  { %5143 = vmatprep.subr.msk.bf16.mxu1 %vm439_vm2, %v747_v33  ;;  %v545_v41 = vadd.f32 %v544_v40, %v5916_v60 }
 0x2c1   :  { %v6075_v42 = vpack.c.bf16 %v543_v39, %v539_v30  ;;  %v740_v30 = vmul.bf16 %v5987_v11, %v6008_v50  ;;  %v749_v39 = vmul.bf16 %v6024_v14, %v5994_v24 }
 0x2c2   :  { %4682 = vmatpush3.bf16.msra.mxu0 %v758_v22  ;;  %v6079_v55 = vpack.c.bf16 %v545_v41, %v541_v10 }
 0x2c3   :  { %v795_v36 = vsel %vm439_vm2, %v740_v30, 0 }
 0x2c4   :  { %v548_v56 = vpop.f32.mrb[36].mxu1  ;;  %v1427_v58 = vmul.bf16 %v6079_v55, %v5921_v4 }
 0x2c5   :  { %v549_v59 = vadd.f32 %v548_v56, %v5913_v57  ;;  %v550_v61 = vpop.f32.mrb[37].mxu1 }
 0x2c6   :  { %v551_v52 = vadd.f32 %v550_v61, %v5916_v60  ;;  %v552_v26 = vpop.f32.mrb[38].mxu1  ;;  %5147 = vmatprep.subr.msk.bf16.mxu0 %vm439_vm2, %v1427_v58  ;;  %v741_v58 = vmul.bf16 %v6024_v14, %v6008_v50 }
 0x2c7   :  { %4652 = vmatpush3.bf16.xpose.msra.mxu1 %v792_v16  ;;  %v553_v23 = vadd.f32 %v552_v26, %v5913_v57  ;;  %v554_v18 = vpop.f32.mrb[39].mxu1  ;;  %v750_v26 = vmul.bf16 %v6054_v25, %v5994_v24 }
 0x2c8   :  { %5144 = vmatprep.subr.msk.bf16.mxu1 %vm439_vm2, %v748_v1  ;;  %v555_v28 = vadd.f32 %v554_v18, %v5916_v60 }
 0x2c9   :  { %v6092_v29 = vpack.c.bf16 %v553_v23, %v549_v59 }
 0x2ca   :  { %v6096_v32 = vpack.c.bf16 %v555_v28, %v551_v52  ;;  %v798_v52 = vsel %vm439_vm2, %v741_v58, 0  ;;  %v1448_v58 = vmul.bf16 %v6016_v5, %v5994_v24 }
 0x2cc   :  { %v558_v35 = vpop.f32.mrb[40].mxu1 }
 0x2cd   :  { %v559_v33 = vadd.f32 %v558_v35, %v5913_v57  ;;  %v560_v10 = vpop.f32.mrb[41].mxu1 }
 0x2ce   :  { %v561_v40 = vadd.f32 %v560_v10, %v5916_v60  ;;  %v562_v22 = vpop.f32.mrb[42].mxu1 }
 0x2cf   :  { %4654 = vmatpush3.bf16.xpose.msra.mxu1 %v795_v36  ;;  %v563_v41 = vadd.f32 %v562_v22, %v5913_v57  ;;  %v564_v47 = vpop.f32.mrb[43].mxu1  ;;  %v1443_v36 = vmul.bf16 %v6022_v12, %v5921_v4  ;;  %v1437_v22 = vmul.bf16 %v6052_v19, %v5919_v3 }
 0x2d0   :  { %5145 = vmatprep.subr.msk.bf16.mxu1 %vm439_vm2, %v749_v39  ;;  %v565_v11 = vadd.f32 %v564_v47, %v5916_v60  ;;  %v1447_v47 = vmul.bf16 %v6022_v12, %v5994_v24 }
 0x2d1   :  { %v6106_v56 = vpack.c.bf16 %v563_v41, %v559_v33  ;;  %v742_v33 = vmul.bf16 %v6054_v25, %v6008_v50  ;;  %v1436_v25 = vmul.bf16 %v6016_v5, %v5919_v3  ;;  %v1446_v41 = vmul.bf16 %v6046_v63, %v5921_v4 }
 0x2d2   :  { %v6110_v59 = vpack.c.bf16 %v565_v11, %v561_v40  ;;  %v1445_v40 = vmul.bf16 %v6052_v19, %v5921_v4  ;;  %v1439_v11 = vmul.bf16 %v6022_v12, %v6008_v50 }
 0x2d3   :  { %v801_v39 = vsel %vm439_vm2, %v742_v33, 0 }
 0x2d4   :  { %v568_v61 = vpop.f32.mrb[44].mxu1 }
 0x2d5   :  { %v569_v16 = vadd.f32 %v568_v61, %v5913_v57  ;;  %v570_v1 = vpop.f32.mrb[45].mxu1  ;;  %v1449_v61 = vmul.bf16 %v6052_v19, %v5994_v24 }
 0x2d6   :  { %v571_v23 = vadd.f32 %v570_v1, %v5916_v60  ;;  %v572_v18 = vpop.f32.mrb[46].mxu1 }
 0x2d7   :  { %4656 = vmatpush3.bf16.xpose.msra.mxu1 %v798_v52  ;;  %v573_v28 = vadd.f32 %v572_v18, %v5913_v57  ;;  %v574_v30 = vpop.f32.mrb[47].mxu1  ;;  %v1435_v57 = vmul.bf16 %v6022_v12, %v5919_v3  ;;  %v1441_v12 = vmul.bf16 %v6052_v19, %v6008_v50 }
 0x2d8   :  { %5146 = vmatprep.subr.msk.bf16.mxu1 %vm439_vm2, %v750_v26  ;;  %v575_v14 = vadd.f32 %v574_v30, %v5916_v60  ;;  %v1444_v60 = vmul.bf16 %v6016_v5, %v5921_v4 }
 0x2d9   :  { %v6120_v35 = vpack.c.bf16 %v573_v28, %v569_v16  ;;  %v1450_v16 = vmul.bf16 %v6046_v63, %v5994_v24 }
 0x2da   :  { %v6124_v10 = vpack.c.bf16 %v575_v14, %v571_v23 }
 0x2db   :  { %8068 = vst [vmem:[#allocation26_spill] sm:$0xff] %v6120_v35 }
 0x2df   :  { %4658 = vmatpush3.bf16.xpose.msra.mxu1 %v801_v39 }
 0x2e0   :  { %4731 = vmatprep.subr.bf16.mxu1 %v1443_v36 }
 0x2e6   :  { %4660 = vmatmul.mubr.msk.bf16.vlgmr.msra.gmra.mrb[48].mxu1 %vm439_vm2, %v5932_v20  ;;  %v1438_v20 = vmul.bf16 %v6046_v63, %v5919_v3 }
 0x2e7   :  { %4661 = vmatprep.mubr.msk.bf16.mxu1 %vm439_vm2, %v5983_v9  ;;  %4732 = vmatpush3.bf16.msra.mxu1 %v1435_v57 }
 0x2e8   :  { %4733 = vmatprep.subr.bf16.mxu1 %v1444_v60 }
 0x2eb   :  { %4734 = vmatpush3.bf16.msra.mxu1 %v1436_v25 }
 0x2ec   :  { %4735 = vmatprep.subr.bf16.mxu1 %v1445_v40 }
 0x2ee   :  { %4662 = vmatmul.mubr.msk.bf16.gmra.mrb[52].mxu1 %vm439_vm2, %v5983_v9  ;;  %v1440_v9 = vmul.bf16 %v6016_v5, %v6008_v50 }
 0x2ef   :  { %4663 = vmatprep.mubr.msk.bf16.mxu1 %vm439_vm2, %v6018_v7  ;;  %4736 = vmatpush3.bf16.msra.mxu1 %v1437_v22 }
 0x2f0   :  { %4737 = vmatprep.subr.bf16.mxu1 %v1446_v41 }
 0x2f3   :  { %4738 = vmatpush3.bf16.msra.mxu1 %v1438_v20 }
 0x2f4   :  { %4739 = vmatprep.subr.bf16.mxu1 %v1447_v47 }
 0x2f6   :  { %4664 = vmatmul.mubr.msk.bf16.gmra.mrb[56].mxu1 %vm439_vm2, %v6018_v7  ;;  %v1442_v7 = vmul.bf16 %v6046_v63, %v6008_v50 }
 0x2f7   :  { %4665 = vmatprep.mubr.msk.bf16.mxu1 %vm439_vm2, %v6048_v8  ;;  %4740 = vmatpush3.bf16.msra.mxu1 %v1439_v11 }
 0x2f8   :  { %4741 = vmatprep.subr.bf16.mxu1 %v1448_v58 }
 0x2fb   :  { %4742 = vmatpush3.bf16.msra.mxu1 %v1440_v9 }
 0x2fc   :  { %4743 = vmatprep.subr.bf16.mxu1 %v1449_v61 }
 0x2fe   :  { %4666 = vmatmul.mubr.msk.bf16.gmra.mrb[60].mxu1 %vm439_vm2, %v6048_v8 }
 0x2ff   :  { %4744 = vmatpush3.bf16.msra.mxu1 %v1441_v12 }
 0x300   :  { %4745 = vmatprep.subr.bf16.mxu1 %v1450_v16 }
 0x303   :  { %4746 = vmatpush3.bf16.msra.mxu1 %v1442_v7 }
 0x3b9   :  { %v6173_v5 = vpop.f32.mrb[48].mxu1 }
 0x3ba   :  { %v6175_v1 = vpop.f32.mrb[49].mxu1  ;;  %v990_v19 = vsel %vm989_vm13, %v6173_v5, -inf  ;;  %v901_v52 = vsel %vm900_vm14, %v6173_v5, -inf }
 0x3bb   :  { %991 = vmax.xlane.f32.xlu1 %v990_v19  ;;  %902 = vmax.xlane.f32.xlu0 %v901_v52  ;;  %v6181_v8 = vpop.f32.mrb[50].mxu1  ;;  %v1198_v63 = vsel %vm989_vm13, %v6175_v1, -inf  ;;  %v1110_v30 = vsel %vm900_vm14, %v6175_v1, -inf }
 0x3bc   :  { %v6183_v26 = vpop.f32.mrb[51].mxu1  ;;  %v993_v23 = vsel %vm989_vm13, %v6181_v8, -inf  ;;  %v904_v14 = vsel %vm900_vm14, %v6181_v8, -inf }
 0x3bd   :  { %v1201_v39 = vsel %vm989_vm13, %v6183_v26, -inf  ;;  %v1113_v57 = vsel %vm900_vm14, %v6183_v26, -inf }
 0x3bf   :  { %1199 = vmax.xlane.f32.xlu0 %v1198_v63  ;;  %994 = vmax.xlane.f32.xlu1 %v993_v23 }
 0x3c1   :  { %v6189_v18 = vpop.f32.mrb[52].mxu1 }
 0x3c2   :  { %v6191_v28 = vpop.f32.mrb[53].mxu1  ;;  %v996_v40 = vsel %vm989_vm13, %v6189_v18, -inf  ;;  %v907_v47 = vsel %vm900_vm14, %v6189_v18, -inf }
 0x3c3   :  { %1111 = vmax.xlane.f32.xlu0 %v1110_v30  ;;  %905 = vmax.xlane.f32.xlu1 %v904_v14  ;;  %v6197_v33 = vpop.f32.mrb[54].mxu1  ;;  %v1204_v61 = vsel %vm989_vm13, %v6191_v28, -inf  ;;  %v1116_v19 = vsel %vm900_vm14, %v6191_v28, -inf }
 0x3c4   :  { %v6199_v36 = vpop.f32.mrb[55].mxu1  ;;  %v999_v22 = vsel %vm989_vm13, %v6197_v33, -inf  ;;  %v910_v63 = vsel %vm900_vm14, %v6197_v33, -inf }
 0x3c5   :  { %v1207_v11 = vsel %vm989_vm13, %v6199_v36, -inf  ;;  %v1119_v12 = vsel %vm900_vm14, %v6199_v36, -inf }
 0x3c7   :  { %1202 = vmax.xlane.f32.xlu0 %v1201_v39  ;;  %1114 = vmax.xlane.f32.xlu1 %v1113_v57 }
 0x3c9   :  { %v6205_v60 = vpop.f32.mrb[56].mxu1 }
 0x3ca   :  { %v6207_v25 = vpop.f32.mrb[57].mxu1  ;;  %v1002_v30 = vsel %vm989_vm13, %v6205_v60, -inf  ;;  %v913_v39 = vsel %vm900_vm14, %v6205_v60, -inf }
 0x3cb   :  { %997 = vmax.xlane.f32.xlu0 %v996_v40  ;;  %1000 = vmax.xlane.f32.xlu1 %v999_v22  ;;  %v6213_v41 = vpop.f32.mrb[58].mxu1  ;;  %v1210_v40 = vsel %vm989_vm13, %v6207_v25, -inf }
 0x3cc   :  { %v6215_v20 = vpop.f32.mrb[59].mxu1  ;;  %v1005_v52 = vsel %vm989_vm13, %v6213_v41, -inf  ;;  %v916_v23 = vsel %vm900_vm14, %v6213_v41, -inf }
 0x3cd   :  { %v1213_v14 = vsel %vm989_vm13, %v6215_v20, -inf  ;;  %v1125_v57 = vsel %vm900_vm14, %v6215_v20, -inf }
 0x3cf   :  { %908 = vmax.xlane.f32.xlu0 %v907_v47  ;;  %1208 = vmax.xlane.f32.xlu1 %v1207_v11  ;;  %v1122_v47 = vsel %vm900_vm14, %v6207_v25, -inf }
 0x3d1   :  { %v6221_v58 = vpop.f32.mrb[60].mxu1 }
 0x3d2   :  { %v6223_v9 = vpop.f32.mrb[61].mxu1 }
 0x3d3   :  { %1205 = vmax.xlane.f32.xlu0 %v1204_v61  ;;  %1120 = vmax.xlane.f32.xlu1 %v1119_v12  ;;  %v6229_v16 = vpop.f32.mrb[62].mxu1  ;;  %v1008_v61 = vsel %vm989_vm13, %v6221_v58, -inf }
 0x3d4   :  { %v6231_v7 = vpop.f32.mrb[63].mxu1  ;;  %v1011_v22 = vsel %vm989_vm13, %v6229_v16, -inf  ;;  %v922_v11 = vsel %vm900_vm14, %v6229_v16, -inf }
 0x3d5   :  { %v1219_v12 = vsel %vm989_vm13, %v6231_v7, -inf }
 0x3d7   :  { %1117 = vmax.xlane.f32.xlu0 %v1116_v19  ;;  %1006 = vmax.xlane.f32.xlu1 %v1005_v52  ;;  %v919_v19 = vsel %vm900_vm14, %v6221_v58, -inf  ;;  %v1131_v52 = vsel %vm900_vm14, %v6231_v7, -inf }
 0x3db   :  { %911 = vmax.xlane.f32.xlu0 %v910_v63  ;;  %917 = vmax.xlane.f32.xlu1 %v916_v23  ;;  %v1216_v63 = vsel %vm989_vm13, %v6223_v9, -inf  ;;  %v1128_v23 = vsel %vm900_vm14, %v6223_v9, -inf }
 0x3df   :  { %1003 = vmax.xlane.f32.xlu0 %v1002_v30  ;;  %1214 = vmax.xlane.f32.xlu1 %v1213_v14 }
 0x3e3   :  { %914 = vmax.xlane.f32.xlu0 %v913_v39  ;;  %1126 = vmax.xlane.f32.xlu1 %v1125_v57 }
 0x3e7   :  { %1211 = vmax.xlane.f32.xlu0 %v1210_v40  ;;  %1012 = vmax.xlane.f32.xlu1 %v1011_v22 }
 0x3eb   :  { %1123 = vmax.xlane.f32.xlu0 %v1122_v47  ;;  %923 = vmax.xlane.f32.xlu1 %v922_v11 }
 0x3ef   :  { %1009 = vmax.xlane.f32.xlu0 %v1008_v61  ;;  %1220 = vmax.xlane.f32.xlu1 %v1219_v12 }
 0x3f3   :  { %920 = vmax.xlane.f32.xlu0 %v919_v19  ;;  %1132 = vmax.xlane.f32.xlu1 %v1131_v52 }
 0x3f7   :  { %1217 = vmax.xlane.f32.xlu0 %v1216_v63 }
 0x3fb   :  { %1129 = vmax.xlane.f32.xlu0 %v1128_v23 }
 0x448   :  { %v992_v30 = vpop.xlane.xlu1 %991  ;;  %v903_v14 = vpop.xlane.xlu0 %902 }
 0x449   :  { %v1014_v39 = vsub.f32 %v6173_v5, %v992_v30 }
 0x44b   :  { %v1022_v57 = vmul.f32 1.442695, %v1014_v39 }
 0x44c   :  { %v1200_v40 = vpop.xlane.xlu0 %1199  ;;  %v995_v22 = vpop.xlane.xlu1 %994 }
 0x44d   :  { %5219 = vpow2.f32 %v1022_v57  ;;  %v1222_v47 = vsub.f32 %v6175_v1, %v1200_v40  ;;  %v1015_v11 = vsub.f32 %v6181_v8, %v995_v22 }
 0x44f   :  { %v1230_v61 = vmul.f32 1.442695, %v1222_v47  ;;  %v1024_v12 = vmul.f32 1.442695, %v1015_v11 }
 0x450   :  { %v1112_v19 = vpop.xlane.xlu0 %1111  ;;  %v906_v22 = vpop.xlane.xlu1 %905 }
 0x451   :  { %5221 = vpow2.f32 %v1230_v61  ;;  %v1134_v53 = vsub.f32 %v6175_v1, %v1112_v19  ;;  %v926_v21 = vsub.f32 %v6181_v8, %v906_v22 }
 0x452   :  { %5223 = vpow2.f32 %v1024_v12 }
 0x453   :  { %v1142_v45 = vmul.f32 1.442695, %v1134_v53  ;;  %v935_v15 = vmul.f32 1.442695, %v926_v21 }
 0x454   :  { %v1203_v52 = vpop.xlane.xlu0 %1202  ;;  %v1115_v61 = vpop.xlane.xlu1 %1114 }
 0x455   :  { %v1223_v63 = vsub.f32 %v6183_v26, %v1203_v52 }
 0x457   :  { %v6273_v23 = vpop.eup %5219  ;;  %v1232_v27 = vmul.f32 1.442695, %v1223_v63 }
 0x458   :  { %v998_v30 = vpop.xlane.xlu0 %997  ;;  %1046 = vrot.lane.b32.xlu1 %v6273_v23, %s5602_s11  ;;  %v1001_v43 = vpop.xlane.xlu1 %1000 }
 0x459   :  { %5225 = vpow2.f32 %v1232_v27  ;;  %v925_v27 = vsub.f32 %v6173_v5, %v903_v14  ;;  %v1135_v5 = vsub.f32 %v6183_v26, %v1115_v61  ;;  %v1017_v0 = vsub.f32 %v6197_v33, %v1001_v43 }
 0x45b   :  { %v6277_v39 = vpop.eup %5221  ;;  %v933_v63 = vmul.f32 1.442695, %v925_v27  ;;  %v1144_v1 = vmul.f32 1.442695, %v1135_v5  ;;  %v1028_v46 = vmul.f32 1.442695, %v1017_v0 }
 0x45c   :  { %v6279_v57 = vpop.eup %5223  ;;  %v6281_v40 = vpop.xlane.xlu0 %908  ;;  %1254 = vrot.lane.b32.xlu0 %v6277_v39, %s5602_s11 }
 0x45d   :  { %1048 = vrot.lane.b32.xlu1 %v6279_v57, %s5602_s11  ;;  %5227 = vpow2.f32 %v933_v63  ;;  %v1209_v44 = vpop.xlane.xlu1 %1208  ;;  %v927_v37 = vsub.f32 %v6189_v18, %v6281_v40 }
 0x45e   :  { %5229 = vpow2.f32 %v1142_v45 }
 0x45f   :  { %5231 = vpow2.f32 %v935_v15 }
 0x460   :  { %v1206_v47 = vpop.xlane.xlu0 %1205  ;;  %5233 = vpow2.f32 %v1144_v1  ;;  %v1016_v1 = vsub.f32 %v6189_v18, %v998_v30 }
 0x461   :  { %v6300_v13 = vpop.xlane.xlu1 %1120  ;;  %v1224_v26 = vsub.f32 %v6191_v28, %v1206_v47 }
 0x463   :  { %v6287_v11 = vpop.eup %5225  ;;  %v1234_v61 = vmul.f32 1.442695, %v1224_v26 }
 0x464   :  { %v6289_v12 = vpop.xlane.xlu0 %1117  ;;  %1256 = vrot.lane.b32.xlu1 %v6287_v11, %s5602_s11 }
 0x465   :  { %v1007_v45 = vpop.xlane.xlu1 %1006  ;;  %5235 = vpow2.f32 %v1234_v61  ;;  %v1225_v61 = vsub.f32 %v6199_v36, %v1209_v44 }
 0x467   :  { %v6303_v14 = vpop.eup %5227  ;;  %v1236_v43 = vmul.f32 1.442695, %v1225_v61 }
 0x468   :  { %v6294_v52 = vpop.xlane.xlu0 %911  ;;  %v949_v19 = vsel %vm900_vm14, %v6303_v14, 0.0  ;;  %v6307_v53 = vpop.eup %5229 }
 0x469   :  { %v1158_v21 = vsel %vm900_vm14, %v6307_v53, 0.0  ;;  %v6313_v8 = vpop.xlane.xlu1 %917  ;;  %v6316_v22 = vpop.eup %5231 }
 0x46a   :  { %v6321_v62 = vpop.eup %5233  ;;  %v930_v18 = vsub.f32 %v6213_v41, %v6313_v8 }
 0x46b   :  { %v1161_v26 = vsel %vm900_vm14, %v6321_v62, 0.0 }
 0x46c   :  { %v1004_v49 = vpop.xlane.xlu0 %1003 }
 0x46d   :  { %v1018_v5 = vsub.f32 %v6205_v60, %v1004_v49  ;;  %v1215_v2 = vpop.xlane.xlu1 %1214  ;;  %v1026_v49 = vmul.f32 1.442695, %v1016_v1 }
 0x46e   :  { %v1227_v44 = vsub.f32 %v6215_v20, %v1215_v2 }
 0x46f   :  { %v1030_v6 = vmul.f32 1.442695, %v1018_v5 }
 0x470   :  { %v6297_v17 = vpop.xlane.xlu0 %914 }
 0x471   :  { %v6330_v51 = vpop.xlane.xlu1 %1126  ;;  %5237 = vpow2.f32 %v1030_v6  ;;  %v1019_v6 = vsub.f32 %v6213_v41, %v1007_v45  ;;  %v1240_v45 = vmul.f32 1.442695, %v1227_v44 }
 0x472   :  { %5239 = vpow2.f32 %v1026_v49 }
 0x474   :  { %v1212_v27 = vpop.xlane.xlu0 %1211 }
 0x475   :  { %v1226_v47 = vsub.f32 %v6207_v25, %v1212_v27  ;;  %v1013_v48 = vpop.xlane.xlu1 %1012 }
 0x476   :  { %v1021_v49 = vsub.f32 %v6229_v16, %v1013_v48 }
 0x477   :  { %v1238_v54 = vmul.f32 1.442695, %v1226_v47 }
 0x478   :  { %v6309_v63 = vpop.xlane.xlu0 %1123  ;;  %v1036_v2 = vmul.f32 1.442695, %v1021_v49 }
 0x479   :  { %5241 = vpow2.f32 %v1238_v54  ;;  %v6342_v0 = vpop.xlane.xlu1 %923  ;;  %v1032_v54 = vmul.f32 1.442695, %v1019_v6 }
 0x47a   :  { %5243 = vpow2.f32 %v1028_v46 }
 0x47b   :  { %950 = vadd.xlane.f32.xlu0 %v949_v19  ;;  %v952_v19 = vsel %vm900_vm14, %v6316_v22, 0.0 }
 0x47c   :  { %v1010_v15 = vpop.xlane.xlu0 %1009 }
 0x47f   :  { %1159 = vadd.xlane.f32.xlu0 %v1158_v21 }
 0x480   :  { %v6324_v21 = vpop.xlane.xlu0 %920 }
 0x484   :  { %v1218_v30 = vpop.xlane.xlu0 %1217 }
 0x485   :  { %v1228_v5 = vsub.f32 %v6223_v9, %v1218_v30  ;;  %v1221_v30 = vpop.xlane.xlu1 %1220 }
 0x488   :  { %953 = vadd.xlane.f32.xlu1 %v952_v19  ;;  %v1020_v19 = vsub.f32 %v6221_v58, %v1010_v15  ;;  %v1242_v15 = vmul.f32 1.442695, %v1228_v5 }
 0x489   :  { %v1133_v49 = vpop.xlane.xlu1 %1132 }
 0x48a   :  { %v1034_v27 = vmul.f32 1.442695, %v1020_v19 }
 0x48c   :  { %1162 = vadd.xlane.f32.xlu1 %v1161_v26  ;;  %v6335_v26 = vpop.eup %5235  ;;  %5245 = vpow2.f32 %v1034_v27  ;;  %v1229_v27 = vsub.f32 %v6231_v7, %v1221_v30  ;;  %v1136_v30 = vsub.f32 %v6191_v28, %v6289_v12  ;;  %v937_v28 = vmul.f32 1.442695, %v927_v37 }
 0x48d   :  { %v6340_v1 = vpop.eup %5237  ;;  %5247 = vpow2.f32 %v1236_v43  ;;  %v1138_v12 = vsub.f32 %v6207_v25, %v6309_v63 }
 0x48e   :  { %5249 = vpow2.f32 %v1242_v15  ;;  %v6347_v46 = vpop.eup %5239  ;;  %v1244_v48 = vmul.f32 1.442695, %v1229_v27  ;;  %v1146_v38 = vmul.f32 1.442695, %v1136_v30 }
 0x48f   :  { %v6349_v47 = vpop.eup %5241  ;;  %5251 = vpow2.f32 %v1032_v54 }
 0x490   :  { %v6356_v19 = vpop.eup %5243  ;;  %5253 = vpow2.f32 %v1240_v45  ;;  %v1137_v45 = vsub.f32 %v6199_v36, %v6300_v13  ;;  %v1139_v13 = vsub.f32 %v6215_v20, %v6330_v51  ;;  %v943_v20 = vmul.f32 1.442695, %v930_v18 }
 0x491   :  { %5255 = vpow2.f32 %v1036_v2  ;;  %v1130_v2 = vpop.xlane.xlu0 %1129 }
 0x492   :  { %5257 = vpow2.f32 %v1244_v48  ;;  %v1148_v27 = vmul.f32 1.442695, %v1137_v45  ;;  %v928_v48 = vsub.f32 %v6197_v33, %v6294_v52  ;;  %v1152_v40 = vmul.f32 1.442695, %v1139_v13 }
 0x493   :  { %v929_v52 = vsub.f32 %v6205_v60, %v6297_v17  ;;  %v1150_v45 = vmul.f32 1.442695, %v1138_v12  ;;  %v1140_v41 = vsub.f32 %v6223_v9, %v1130_v2 }
 0x494   :  { %5259 = vpow2.f32 %v1148_v27  ;;  %v939_v35 = vmul.f32 1.442695, %v928_v48 }
 0x495   :  { %1258 = vrot.lane.b32.xlu0 %v6335_v26, %s5602_s11  ;;  %5261 = vpow2.f32 %v1146_v38  ;;  %v941_v25 = vmul.f32 1.442695, %v929_v52 }
 0x496   :  { %v6358_v61 = vpop.eup %5245  ;;  %5263 = vpow2.f32 %v939_v35 }
 0x497   :  { %v6365_v5 = vpop.eup %5247  ;;  %5265 = vpow2.f32 %v937_v28 }
 0x498   :  { %v6367_v43 = vpop.eup %5249  ;;  %5267 = vpow2.f32 %v1152_v40 }
 0x499   :  { %1054 = vrot.lane.b32.xlu0 %v6340_v1, %s5602_s11  ;;  %v6373_v6 = vpop.eup %5251  ;;  %5269 = vpow2.f32 %v1150_v45 }
 0x49a   :  { %v6377_v15 = vpop.eup %5253  ;;  %5271 = vpow2.f32 %v943_v20 }
 0x49b   :  { %v6381_v54 = vpop.eup %5255  ;;  %5273 = vpow2.f32 %v941_v25  ;;  %v931_v25 = vsub.f32 %v6221_v58, %v6324_v21 }
 0x49c   :  { %v6385_v44 = vpop.eup %5257 }
 0x49d   :  { %1262 = vrot.lane.b32.xlu0 %v6349_v47, %s5602_s11  ;;  %1050 = vrot.lane.b32.xlu1 %v6347_v46, %s5602_s11 }
 0x49e   :  { %v6409_v35 = vpop.eup %5259 }
 0x49f   :  { %v6413_v63 = vpop.eup %5261 }
 0x4a0   :  { %v6417_v8 = vpop.eup %5263  ;;  %v1164_v30 = vsel %vm900_vm14, %v6413_v63, 0.0 }
 0x4a1   :  { %1058 = vrot.lane.b32.xlu0 %v6358_v61, %s5602_s11  ;;  %1052 = vrot.lane.b32.xlu1 %v6356_v19, %s5602_s11  ;;  %v6421_v9 = vpop.eup %5265 }
 0x4a2   :  { %v6425_v2 = vpop.eup %5267  ;;  %v955_v27 = vsel %vm900_vm14, %v6421_v9, 0.0 }
 0x4a3   :  { %v6429_v48 = vpop.eup %5269  ;;  %v1173_v13 = vsel %vm900_vm14, %v6425_v2, 0.0 }
 0x4a4   :  { %v1170_v28 = vsel %vm900_vm14, %v6429_v48, 0.0 }
 0x4a5   :  { %1266 = vrot.lane.b32.xlu0 %v6367_v43, %s5602_s11  ;;  %1260 = vrot.lane.b32.xlu1 %v6365_v5, %s5602_s11 }
 0x4a9   :  { %1056 = vrot.lane.b32.xlu1 %v6373_v6, %s5602_s11 }
 0x4ad   :  { %1264 = vrot.lane.b32.xlu1 %v6377_v15, %s5602_s11 }
 0x4b1   :  { %1060 = vrot.lane.b32.xlu1 %v6381_v54, %s5602_s11 }
 0x4b5   :  { %1268 = vrot.lane.b32.xlu1 %v6385_v44, %s5602_s11 }
 0x4ca   :  { %v1047_v34 = vpop.permute.xlu1 %1046 }
 0x4cb   :  { %v1070_v60 = vsel %vm900_vm14, %v1047_v34, 0.0  ;;  %v958_v34 = vsel %vm900_vm14, %v6417_v8, 0.0 }
 0x4ce   :  { %v1255_v31 = vpop.permute.xlu0 %1254 }
 0x4cf   :  { %v1278_v36 = vsel %vm900_vm14, %v1255_v31, 0.0  ;;  %v1049_v33 = vpop.permute.xlu1 %1048  ;;  %v1141_v31 = vsub.f32 %v6231_v7, %v1133_v49  ;;  %v1167_v7 = vsel %vm900_vm14, %v6409_v35, 0.0  ;;  %v1154_v49 = vmul.f32 1.442695, %v1140_v41 }
 0x4d0   :  { %1279 = vadd.xlane.f32.xlu0 %v1278_v36  ;;  %v1073_v38 = vsel %vm900_vm14, %v1049_v33, 0.0  ;;  %v6433_v36 = vpop.eup %5271 }
 0x4d1   :  { %v1156_v17 = vmul.f32 1.442695, %v1141_v31  ;;  %v6437_v12 = vpop.eup %5273  ;;  %v964_v33 = vsel %vm900_vm14, %v6433_v36, 0.0 }
 0x4d2   :  { %v961_v40 = vsel %vm900_vm14, %v6437_v12, 0.0 }
 0x4d3   :  { %5275 = vpow2.f32 %v1156_v17  ;;  %v932_v17 = vsub.f32 %v6229_v16, %v6342_v0 }
 0x4d4   :  { %5277 = vpow2.f32 %v1154_v49 }
 0x4d6   :  { %v1257_v51 = vpop.permute.xlu1 %1256 }
 0x4d7   :  { %v1281_v37 = vsel %vm900_vm14, %v1257_v51, 0.0 }
 0x4d8   :  { %1282 = vadd.xlane.f32.xlu0 %v1281_v37 }
 0x4d9   :  { %1074 = vadd.xlane.f32.xlu1 %v1073_v38 }
 0x4dc   :  { %1071 = vadd.xlane.f32.xlu0 %v1070_v60  ;;  %v945_v60 = vmul.f32 1.442695, %v931_v25 }
 0x4dd   :  { %1168 = vadd.xlane.f32.xlu1 %v1167_v7  ;;  %v6441_v18 = vpop.eup %5275 }
 0x4de   :  { %v6445_v52 = vpop.eup %5277  ;;  %v1179_v45 = vsel %vm900_vm14, %v6441_v18, 0.0  ;;  %5279 = vpow2.f32 %v945_v60 }
 0x4df   :  { %v1176_v51 = vsel %vm900_vm14, %v6445_v52, 0.0 }
 0x4e0   :  { %1165 = vadd.xlane.f32.xlu0 %v1164_v30 }
 0x4e1   :  { %959 = vadd.xlane.f32.xlu1 %v958_v34  ;;  %v947_v34 = vmul.f32 1.442695, %v932_v17 }
 0x4e3   :  { %5281 = vpow2.f32 %v947_v34 }
 0x4e4   :  { %956 = vadd.xlane.f32.xlu0 %v955_v27 }
 0x4e5   :  { %1174 = vadd.xlane.f32.xlu1 %v1173_v13 }
 0x4e8   :  { %1171 = vadd.xlane.f32.xlu0 %v1170_v28 }
 0x4e9   :  { %965 = vadd.xlane.f32.xlu1 %v964_v33 }
 0x4ec   :  { %962 = vadd.xlane.f32.xlu0 %v961_v40 }
 0x4ed   :  { %1180 = vadd.xlane.f32.xlu1 %v1179_v45 }
 0x4f0   :  { %1177 = vadd.xlane.f32.xlu0 %v1176_v51 }
 0x508   :  { %v951_v20 = vpop.xlane.xlu0 %950 }
 0x50c   :  { %v1160_v31 = vpop.xlane.xlu0 %1159 }
 0x510   :  { %v1259_v38 = vpop.permute.xlu0 %1258 }
 0x511   :  { %v1284_v13 = vsel %vm900_vm14, %v1259_v38, 0.0  ;;  %v6462_v38 = vpop.eup %5279 }
 0x512   :  { %v967_v17 = vsel %vm900_vm14, %v6462_v38, 0.0 }
 0x514   :  { %v1055_v7 = vpop.permute.xlu0 %1054 }
 0x515   :  { %v954_v37 = vpop.xlane.xlu1 %953  ;;  %v1082_v16 = vsel %vm900_vm14, %v1055_v7, 0.0  ;;  %v6467_v7 = vpop.eup %5281 }
 0x518   :  { %v1263_v33 = vpop.permute.xlu0 %1262 }
 0x519   :  { %v1163_v41 = vpop.xlane.xlu1 %1162  ;;  %v1290_v45 = vsel %vm900_vm14, %v1263_v33, 0.0 }
 0x51c   :  { %v1059_v0 = vpop.permute.xlu0 %1058 }
 0x51d   :  { %v1051_v49 = vpop.permute.xlu1 %1050 }
 0x51e   :  { %v1076_v30 = vsel %vm900_vm14, %v1051_v49, 0.0 }
 0x51f   :  { %1077 = vadd.xlane.f32.xlu0 %v1076_v30 }
 0x520   :  { %v1267_v49 = vpop.permute.xlu0 %1266 }
 0x521   :  { %v1053_v27 = vpop.permute.xlu1 %1052  ;;  %v1296_v34 = vsel %vm900_vm14, %v1267_v49, 0.0 }
 0x522   :  { %v1079_v28 = vsel %vm900_vm14, %v1053_v27, 0.0  ;;  %v970_v27 = vsel %vm900_vm14, %v6467_v7, 0.0 }
 0x523   :  { %1285 = vadd.xlane.f32.xlu0 %v1284_v13  ;;  %1080 = vadd.xlane.f32.xlu1 %v1079_v28  ;;  %v1088_v28 = vsel %vm900_vm14, %v1059_v0, 0.0 }
 0x525   :  { %v1261_v58 = vpop.permute.xlu1 %1260 }
 0x526   :  { %v1287_v21 = vsel %vm900_vm14, %v1261_v58, 0.0 }
 0x527   :  { %1083 = vadd.xlane.f32.xlu0 %v1082_v16  ;;  %1288 = vadd.xlane.f32.xlu1 %v1287_v21 }
 0x529   :  { %v1057_v40 = vpop.permute.xlu1 %1056 }
 0x52a   :  { %v1085_v51 = vsel %vm900_vm14, %v1057_v40, 0.0 }
 0x52b   :  { %1291 = vadd.xlane.f32.xlu0 %v1290_v45  ;;  %1086 = vadd.xlane.f32.xlu1 %v1085_v51 }
 0x52d   :  { %v1265_v25 = vpop.permute.xlu1 %1264 }
 0x52e   :  { %v1293_v60 = vsel %vm900_vm14, %v1265_v25, 0.0 }
 0x52f   :  { %968 = vadd.xlane.f32.xlu0 %v967_v17  ;;  %1294 = vadd.xlane.f32.xlu1 %v1293_v60 }
 0x531   :  { %v1061_v30 = vpop.permute.xlu1 %1060 }
 0x532   :  { %v1091_v58 = vsel %vm900_vm14, %v1061_v30, 0.0 }
 0x533   :  { %1297 = vadd.xlane.f32.xlu0 %v1296_v34  ;;  %971 = vadd.xlane.f32.xlu1 %v970_v27 }
 0x535   :  { %v1269_v13 = vpop.permute.xlu1 %1268 }
 0x536   :  { %v1299_v33 = vsel %vm900_vm14, %v1269_v13, 0.0 }
 0x537   :  { %1089 = vadd.xlane.f32.xlu0 %v1088_v28  ;;  %1300 = vadd.xlane.f32.xlu1 %v1299_v33 }
 0x53b   :  { %1092 = vadd.xlane.f32.xlu1 %v1091_v58 }
 0x55d   :  { %v1280_v16 = vpop.xlane.xlu0 %1279 }
 0x55e   :  { %5283 = vrcp.f32 %v1280_v16 }
 0x55f   :  { %5285 = vrcp.f32 %v1160_v31 }
 0x560   :  { %5287 = vrcp.f32 %v1163_v41 }
 0x561   :  { %5289 = vrcp.f32 %v951_v20 }
 0x565   :  { %v1283_v21 = vpop.xlane.xlu0 %1282 }
 0x566   :  { %5291 = vrcp.f32 %v1283_v21  ;;  %v1075_v40 = vpop.xlane.xlu1 %1074 }
 0x567   :  { %5293 = vrcp.f32 %v1075_v40  ;;  %v1428_v40 = vmul.bf16 %v6096_v32, %v5921_v4 }
 0x568   :  { %5295 = vrcp.f32 %v954_v37  ;;  %v5284_v0 = vpop.eup %5283 }
 0x569   :  { %v1072_v45 = vpop.xlane.xlu0 %1071  ;;  %v5286_v51 = vpop.eup %5285  ;;  %v1310_v60 = vmul.f32 %v5284_v0, %v6277_v39 }
 0x56a   :  { %5297 = vrcp.f32 %v1072_v45  ;;  %v5288_v25 = vpop.eup %5287  ;;  %v1190_v34 = vmul.f32 %v5286_v51, %v6307_v53  ;;  %v1421_v45 = vmul.bf16 %v6110_v59, %v5919_v3  ;;  %v1430_v51 = vmul.bf16 %v6124_v10, %v5921_v4 }
 0x56b   :  { %v5290_v17 = vpop.eup %5289  ;;  %v1191_v31 = vmul.f32 %v5288_v25, %v6321_v62  ;;  %v1419_v62 = vmul.bf16 %v6079_v55, %v5919_v3  ;;  %v1422_v25 = vmul.bf16 %v6124_v10, %v5919_v3 }
 0x56c   :  { %v1326_v37 = vsel %vm900_vm14, %v1190_v34, %v1310_v60  ;;  %v981_v58 = vmul.f32 %v5290_v17, %v6303_v14  ;;  %v1470_v0 = vsel %vm439_vm2, %v1421_v45, 0 }
 0x56d   :  { %v1464_v21 = vsel %vm439_vm2, %v1419_v62, 0  ;;  %v1166_v17 = vpop.xlane.xlu0 %1165  ;;  %v1473_v60 = vsel %vm439_vm2, %v1422_v25, 0 }
 0x570   :  { %v5292_v49 = vpop.eup %5291 }
 0x571   :  { %v5294_v30 = vpop.eup %5293  ;;  %v1311_v20 = vmul.f32 %v5292_v49, %v6287_v11  ;;  %v1431_v49 = vmul.bf16 %v6079_v55, %v5994_v24  ;;  %v957_v34 = vpop.xlane.xlu0 %956 }
 0x572   :  { %v5296_v41 = vpop.eup %5295  ;;  %v1103_v27 = vmul.f32 %v5294_v30, %v6279_v57  ;;  %v1169_v30 = vpop.xlane.xlu1 %1168 }
 0x573   :  { %v1327_v13 = vsel %vm900_vm14, %v1191_v31, %v1311_v20  ;;  %v982_v39 = vmul.f32 %v5296_v41, %v6316_v22  ;;  %v1429_v22 = vmul.bf16 %v6110_v59, %v5921_v4  ;;  %v1423_v31 = vmul.bf16 %v6079_v55, %v6008_v50 }
 0x574   :  { %v5298_v28 = vpop.eup %5297  ;;  %v1335_v33 = vpack.c.bf16 %v1327_v13, %v1326_v37  ;;  %v1424_v13 = vmul.bf16 %v6096_v32, %v6008_v50  ;;  %v1433_v55 = vmul.bf16 %v6110_v59, %v5994_v24  ;;  %5299 = vrcp.f32 %v1169_v30 }
 0x575   :  { %v1102_v16 = vmul.f32 %v5298_v28, %v6273_v23  ;;  %v1319_v57 = vsel %vm900_vm14, %v982_v39, %v1103_v27  ;;  %v1420_v23 = vmul.bf16 %v6096_v32, %v5919_v3  ;;  %v1476_v41 = vsel %vm439_vm2, %v1423_v31, 0  ;;  %v1172_v37 = vpop.xlane.xlu0 %1171 }
 0x576   :  { %1374 = vmatprep.mubr.bf16.mxu0 %v1335_v33  ;;  %v960_v20 = vpop.xlane.xlu1 %959  ;;  %v1432_v27 = vmul.bf16 %v6096_v32, %v5994_v24  ;;  %v1434_v32 = vmul.bf16 %v6124_v10, %v5994_v24 }
 0x577   :  { %v1318_v11 = vsel %vm900_vm14, %v981_v58, %v1102_v16  ;;  %v1467_v14 = vsel %vm439_vm2, %v1420_v23, 0  ;;  %v1479_v58 = vsel %vm439_vm2, %v1424_v13, 0  ;;  %v1425_v16 = vmul.bf16 %v6110_v59, %v6008_v50 }
 0x578   :  { %v1334_v53 = vpack.c.bf16 %v1319_v57, %v1318_v11  ;;  %5301 = vrcp.f32 %v960_v20 }
 0x579   :  { %v963_v33 = vpop.xlane.xlu0 %962  ;;  %v1482_v11 = vsel %vm439_vm2, %v1425_v16, 0 }
 0x57a   :  { %1375 = vmatmul.mubr.bf16.vlgmr.msra.gmra.mrb[32].mxu0 %v1334_v53  ;;  %v1175_v28 = vpop.xlane.xlu1 %1174 }
 0x57b   :  { %4708 = vmatpush3.bf16.xpose.msra.mxu0 %v1464_v21  ;;  %v1426_v21 = vmul.bf16 %v6124_v10, %v6008_v50 }
 0x57c   :  { %5148 = vmatprep.subr.msk.bf16.mxu0 %vm439_vm2, %v1428_v40 }
 0x57d   :  { %v1178_v62 = vpop.xlane.xlu0 %1177  ;;  %v1485_v59 = vsel %vm439_vm2, %v1426_v21, 0 }
 0x57e   :  { %v966_v39 = vpop.xlane.xlu1 %965  ;;  %v5300_v10 = vpop.eup %5299 }
 0x582   :  { %v1181_v57 = vpop.xlane.xlu1 %1180 }
 0x583   :  { %4710 = vmatpush3.bf16.xpose.msra.mxu0 %v1467_v14 }
 0x584   :  { %5149 = vmatprep.subr.msk.bf16.mxu0 %vm439_vm2, %v1429_v22 }
 0x58b   :  { %4712 = vmatpush3.bf16.xpose.msra.mxu0 %v1470_v0 }
 0x58c   :  { %5150 = vmatprep.subr.msk.bf16.mxu0 %vm439_vm2, %v1430_v51  ;;  %v5302_v51 = vpop.eup %5301 }
 0x593   :  { %4714 = vmatpush3.bf16.xpose.msra.mxu0 %v1473_v60 }
 0x594   :  { %5151 = vmatprep.subr.msk.bf16.mxu0 %vm439_vm2, %v1431_v49 }
 0x59b   :  { %4716 = vmatpush3.bf16.xpose.msra.mxu0 %v1476_v41 }
 0x59c   :  { %5152 = vmatprep.subr.msk.bf16.mxu0 %vm439_vm2, %v1432_v27 }
 0x5a3   :  { %4718 = vmatpush3.bf16.xpose.msra.mxu0 %v1479_v58  ;;  %v984_v58 = vmul.f32 %v5302_v51, %v6417_v8 }
 0x5a4   :  { %5153 = vmatprep.subr.msk.bf16.mxu0 %vm439_vm2, %v1433_v55 }
 0x5ab   :  { %4720 = vmatpush3.bf16.xpose.msra.mxu0 %v1482_v11 }
 0x5ac   :  { %5154 = vmatprep.subr.msk.bf16.mxu0 %vm439_vm2, %v1434_v32  ;;  %v1078_v53 = vpop.xlane.xlu0 %1077 }
 0x5b0   :  { %v1286_v40 = vpop.xlane.xlu0 %1285  ;;  %v1081_v23 = vpop.xlane.xlu1 %1080 }
 0x5b1   :  { %5303 = vrcp.f32 %v1286_v40 }
 0x5b2   :  { %5305 = vrcp.f32 %v1081_v23 }
 0x5b3   :  { %5307 = vrcp.f32 %v1078_v53  ;;  %4722 = vmatpush3.bf16.xpose.msra.mxu0 %v1485_v59 }
 0x5b4   :  { %5309 = vrcp.f32 %v1166_v17  ;;  %v1084_v14 = vpop.xlane.xlu0 %1083  ;;  %v1289_v22 = vpop.xlane.xlu1 %1288 }
 0x5b5   :  { %5311 = vrcp.f32 %v957_v34 }
 0x5b6   :  { %5313 = vrcp.f32 %v1289_v22 }
 0x5b7   :  { %5315 = vrcp.f32 %v1175_v28 }
 0x5b8   :  { %5317 = vrcp.f32 %v966_v39  ;;  %v1292_v45 = vpop.xlane.xlu0 %1291  ;;  %v1087_v0 = vpop.xlane.xlu1 %1086 }
 0x5b9   :  { %5319 = vrcp.f32 %v1292_v45 }
 0x5ba   :  { %5321 = vrcp.f32 %v1087_v0 }
 0x5bb   :  { %v5304_v25 = vpop.eup %5303  ;;  %5323 = vrcp.f32 %v1084_v14 }
 0x5bc   :  { %v5306_v60 = vpop.eup %5305  ;;  %5325 = vrcp.f32 %v1172_v37  ;;  %v969_v49 = vpop.xlane.xlu0 %968  ;;  %v1312_v41 = vmul.f32 %v5304_v25, %v6335_v26 }
 0x5bd   :  { %v1295_v30 = vpop.xlane.xlu1 %1294  ;;  %v5308_v31 = vpop.eup %5307  ;;  %5327 = vrcp.f32 %v963_v33  ;;  %v1105_v34 = vmul.f32 %v5306_v60, %v6356_v19  ;;  %v1193_v33 = vmul.f32 %v5300_v10, %v6409_v35 }
 0x5be   :  { %v5310_v17 = vpop.eup %5309  ;;  %5329 = vrcp.f32 %v1295_v30  ;;  %v1104_v55 = vmul.f32 %v5308_v31, %v6347_v46 }
 0x5bf   :  { %v5312_v20 = vpop.eup %5311  ;;  %5331 = vrcp.f32 %v1181_v57  ;;  %v1192_v37 = vmul.f32 %v5310_v17, %v6413_v63  ;;  %v1321_v26 = vsel %vm900_vm14, %v984_v58, %v1105_v34 }
 0x5c0   :  { %v5314_v27 = vpop.eup %5313  ;;  %v1298_v13 = vpop.xlane.xlu0 %1297  ;;  %v983_v19 = vmul.f32 %v5312_v20, %v6421_v9 }
 0x5c1   :  { %v972_v28 = vpop.xlane.xlu1 %971  ;;  %v5316_v39 = vpop.eup %5315  ;;  %v1313_v16 = vmul.f32 %v5314_v27, %v6365_v5  ;;  %5333 = vrcp.f32 %v1298_v13  ;;  %v1328_v8 = vsel %vm900_vm14, %v1192_v37, %v1312_v41 }
 0x5c2   :  { %v5318_v11 = vpop.eup %5317  ;;  %5335 = vrcp.f32 %v1178_v62  ;;  %v1320_v35 = vsel %vm900_vm14, %v983_v19, %v1104_v55  ;;  %v1195_v51 = vmul.f32 %v5316_v39, %v6425_v2 }
 0x5c3   :  { %v5320_v32 = vpop.eup %5319  ;;  %v1329_v46 = vsel %vm900_vm14, %v1193_v33, %v1313_v16  ;;  %5337 = vrcp.f32 %v969_v49  ;;  %v1336_v40 = vpack.c.bf16 %v1321_v26, %v1320_v35  ;;  %v986_v45 = vmul.f32 %v5318_v11, %v6433_v36 }
 0x5c4   :  { %v5322_v53 = vpop.eup %5321  ;;  %v1090_v57 = vpop.xlane.xlu0 %1089  ;;  %v1337_v21 = vpack.c.bf16 %v1329_v46, %v1328_v8  ;;  %v1314_v59 = vmul.f32 %v5320_v32, %v6349_v47 }
 0x5c5   :  { %v1301_v63 = vpop.xlane.xlu1 %1300  ;;  %v5324_v5 = vpop.eup %5323  ;;  %5339 = vrcp.f32 %v1090_v57  ;;  %v1107_v9 = vmul.f32 %v5322_v53, %v6373_v6 }
 0x5c6   :  { %v5326_v23 = vpop.eup %5325  ;;  %5341 = vrcp.f32 %v1301_v63  ;;  %1382 = vmatprep.mubr.bf16.mxu0 %v1337_v21  ;;  %v1106_v0 = vmul.f32 %v5324_v5, %v6340_v1 }
 0x5c7   :  { %v5328_v62 = vpop.eup %5327  ;;  %5343 = vrcp.f32 %v972_v28  ;;  %1383 = vmatmul.mubr.bf16.gmra.mrb[36].mxu0 %v1336_v40  ;;  %v1194_v10 = vmul.f32 %v5326_v23, %v6429_v48  ;;  %v1323_v60 = vsel %vm900_vm14, %v986_v45, %v1107_v9 }
 0x5c8   :  { %v5330_v14 = vpop.eup %5329  ;;  %v985_v6 = vmul.f32 %v5328_v62, %v6437_v12 }
 0x5c9   :  { %v1093_v22 = vpop.xlane.xlu1 %1092  ;;  %v1315_v25 = vmul.f32 %v5330_v14, %v6377_v15  ;;  %v5332_v49 = vpop.eup %5331  ;;  %v1330_v47 = vsel %vm900_vm14, %v1194_v10, %v1314_v59 }
 0x5ca   :  { %5345 = vrcp.f32 %v1093_v22  ;;  %v1322_v1 = vsel %vm900_vm14, %v985_v6, %v1106_v0  ;;  %v1197_v27 = vmul.f32 %v5332_v49, %v6441_v18 }
 0x5cb   :  { %v1331_v30 = vsel %vm900_vm14, %v1195_v51, %v1315_v25  ;;  %v5334_v31 = vpop.eup %5333  ;;  %v1338_v34 = vpack.c.bf16 %v1323_v60, %v1322_v1 }
 0x5cc   :  { %v1339_v36 = vpack.c.bf16 %v1331_v30, %v1330_v47  ;;  %v5336_v17 = vpop.eup %5335  ;;  %v1316_v15 = vmul.f32 %v5334_v31, %v6367_v43 }
 0x5cd   :  { %v5338_v48 = vpop.eup %5337  ;;  %v1196_v41 = vmul.f32 %v5336_v17, %v6445_v52 }
 0x5ce   :  { %1390 = vmatprep.mubr.bf16.mxu0 %v1339_v36  ;;  %v987_v33 = vmul.f32 %v5338_v48, %v6462_v38 }
 0x5cf   :  { %v5340_v2 = vpop.eup %5339  ;;  %1391 = vmatmul.mubr.bf16.gmra.mrb[40].mxu0 %v1338_v34  ;;  %v1332_v55 = vsel %vm900_vm14, %v1196_v41, %v1316_v15 }
 0x5d0   :  { %v5342_v12 = vpop.eup %5341  ;;  %v1108_v28 = vmul.f32 %v5340_v2, %v6358_v61  ;;  %v8069_v61 = vld [vmem:[#allocation26_spill] sm:$0xff] }
 0x5d1   :  { %v5344_v20 = vpop.eup %5343  ;;  %v1317_v13 = vmul.f32 %v5342_v12, %v6385_v44 }
 0x5d2   :  { %v988_v43 = vmul.f32 %v5344_v20, %v6467_v7  ;;  %v1324_v52 = vsel %vm900_vm14, %v987_v33, %v1108_v28 }
 0x5d3   :  { %v1333_v39 = vsel %vm900_vm14, %v1197_v27, %v1317_v13 }
 0x5d4   :  { %v5346_v58 = vpop.eup %5345  ;;  %v1341_v37 = vpack.c.bf16 %v1333_v39, %v1332_v55 }
 0x5d5   :  { %v1109_v16 = vmul.f32 %v5346_v58, %v6381_v54 }
 0x5d6   :  { %1398 = vmatprep.mubr.bf16.mxu0 %v1341_v37 }
 0x5d7   :  { %v1325_v18 = vsel %vm900_vm14, %v988_v43, %v1109_v16 }
 0x5d8   :  { %v1340_v44 = vpack.c.bf16 %v1325_v18, %v1324_v52 }
 0x5da   :  { %1399 = vmatmul.mubr.bf16.gmra.mrb[44].mxu0 %v1340_v44 }
 0x5db   :  { %4723 = vmatprep.mubr.msk.bf16.mxu0 %vm439_vm2, %v6075_v42 }
 0x5e2   :  { %4724 = vmatmul.mubr.msk.bf16.vlgmr.msra.gmra.mrb[48].mxu0 %vm439_vm2, %v6075_v42 }
 0x5e3   :  { %4725 = vmatprep.mubr.msk.bf16.mxu0 %vm439_vm2, %v6092_v29 }
 0x5ea   :  { %4726 = vmatmul.mubr.msk.bf16.gmra.mrb[52].mxu0 %vm439_vm2, %v6092_v29 }
 0x5eb   :  { %4727 = vmatprep.mubr.msk.bf16.mxu0 %vm439_vm2, %v6106_v56 }
 0x5f2   :  { %4728 = vmatmul.mubr.msk.bf16.gmra.mrb[56].mxu0 %vm439_vm2, %v6106_v56 }
 0x5f3   :  { %4729 = vmatprep.mubr.msk.bf16.mxu0 %vm439_vm2, %v8069_v61 }
 0x5fa   :  { %4730 = vmatmul.mubr.msk.bf16.gmra.mrb[60].mxu0 %vm439_vm2, %v8069_v61 }
 0x64d   :  { %v4683_v54 = vpop.f32.mrb[32].mxu0 }
 0x64e   :  { %v4684_v42 = vpop.f32.mrb[33].mxu0 }
 0x64f   :  { %v6584_v38 = vadd.f32 %v4684_v42, %v4683_v54  ;;  %v4686_v7 = vpop.f32.mrb[34].mxu0 }
 0x650   :  { %v4687_v11 = vpop.f32.mrb[35].mxu0 }
 0x651   :  { %v6586_v19 = vadd.f32 %v4687_v11, %v4686_v7 }
 0x69a   :  { %v4689_v26 = vpop.f32.mrb[36].mxu0 }
 0x69b   :  { %v4690_v32 = vpop.f32.mrb[37].mxu0 }
 0x69c   :  { %v6590_v56 = vadd.f32 %v4690_v32, %v4689_v26  ;;  %v4692_v8 = vpop.f32.mrb[38].mxu0 }
 0x69d   :  { %v4693_v46 = vpop.f32.mrb[39].mxu0 }
 0x69e   :  { %v6592_v53 = vadd.f32 %v4693_v46, %v4692_v8 }
 0x6a2   :  { %v4695_v63 = vpop.f32.mrb[40].mxu0 }
 0x6a3   :  { %v4696_v21 = vpop.f32.mrb[41].mxu0 }
 0x6a4   :  { %v6596_v35 = vadd.f32 %v4696_v21, %v4695_v63  ;;  %v4698_v5 = vpop.f32.mrb[42].mxu0 }
 0x6a5   :  { %v4699_v40 = vpop.f32.mrb[43].mxu0 }
 0x6a6   :  { %v6598_v23 = vadd.f32 %v4699_v40, %v4698_v5 }
 0x6ad   :  { %v4701_v62 = vpop.f32.mrb[44].mxu0 }
 0x6ae   :  { %v4702_v59 = vpop.f32.mrb[45].mxu0 }
 0x6af   :  { %v6602_v14 = vadd.f32 %v4702_v59, %v4701_v62  ;;  %v4704_v22 = vpop.f32.mrb[46].mxu0 }
 0x6b0   :  { %v4705_v45 = vpop.f32.mrb[47].mxu0 }
 0x6b1   :  { %8070 = vst [vmem:[#allocation26_spill] sm:$0xff] %v6602_v14  ;;  %v6604_v0 = vadd.f32 %v4705_v45, %v4704_v22 }
 0x6b5   :  { %v6608_v51 = vpop.f32.mrb[48].mxu0 }
 0x6b6   :  { %v6610_v25 = vpop.f32.mrb[49].mxu0  ;;  %v1672_v6 = vsel %vm989_vm13, %v6608_v51, -inf  ;;  %v1584_v30 = vsel %vm900_vm14, %v6608_v51, -inf }
 0x6b7   :  { %1673 = vmax.xlane.f32.xlu0 %v1672_v6  ;;  %v6614_v60 = vpop.f32.mrb[50].mxu0  ;;  %v1880_v17 = vsel %vm989_vm13, %v6610_v25, -inf  ;;  %v1792_v15 = vsel %vm900_vm14, %v6610_v25, -inf }
 0x6b8   :  { %v6616_v49 = vpop.f32.mrb[51].mxu0  ;;  %v1675_v47 = vsel %vm989_vm13, %v6614_v60, -inf  ;;  %v1587_v31 = vsel %vm900_vm14, %v6614_v60, -inf }
 0x6b9   :  { %1676 = vmax.xlane.f32.xlu1 %v1675_v47  ;;  %v1883_v2 = vsel %vm989_vm13, %v6616_v49, -inf  ;;  %v1795_v12 = vsel %vm900_vm14, %v6616_v49, -inf }
 0x6bb   :  { %1585 = vmax.xlane.f32.xlu0 %v1584_v30 }
 0x6bd   :  { %1588 = vmax.xlane.f32.xlu1 %v1587_v31  ;;  %v6624_v36 = vpop.f32.mrb[52].mxu0 }
 0x6be   :  { %v6626_v1 = vpop.f32.mrb[53].mxu0  ;;  %v1678_v27 = vsel %vm989_vm13, %v6624_v36, -inf  ;;  %v1590_v55 = vsel %vm900_vm14, %v6624_v36, -inf }
 0x6bf   :  { %1881 = vmax.xlane.f32.xlu0 %v1880_v17  ;;  %v6630_v34 = vpop.f32.mrb[54].mxu0  ;;  %v1886_v43 = vsel %vm989_vm13, %v6626_v1, -inf  ;;  %v1798_v44 = vsel %vm900_vm14, %v6626_v1, -inf }
 0x6c0   :  { %v6632_v48 = vpop.f32.mrb[55].mxu0  ;;  %v1681_v58 = vsel %vm989_vm13, %v6630_v34, -inf  ;;  %v1593_v39 = vsel %vm900_vm14, %v6630_v34, -inf }
 0x6c1   :  { %1884 = vmax.xlane.f32.xlu1 %v1883_v2  ;;  %v1889_v18 = vsel %vm989_vm13, %v6632_v48, -inf  ;;  %v1801_v61 = vsel %vm900_vm14, %v6632_v48, -inf }
 0x6c3   :  { %1793 = vmax.xlane.f32.xlu0 %v1792_v15 }
 0x6c5   :  { %1796 = vmax.xlane.f32.xlu1 %v1795_v12  ;;  %v6640_v20 = vpop.f32.mrb[56].mxu0 }
 0x6c6   :  { %v6642_v41 = vpop.f32.mrb[57].mxu0  ;;  %v1684_v54 = vsel %vm989_vm13, %v6640_v20, -inf  ;;  %v1596_v7 = vsel %vm900_vm14, %v6640_v20, -inf }
 0x6c7   :  { %1679 = vmax.xlane.f32.xlu0 %v1678_v27  ;;  %v6646_v13 = vpop.f32.mrb[58].mxu0  ;;  %v1892_v26 = vsel %vm989_vm13, %v6642_v41, -inf  ;;  %v1804_v8 = vsel %vm900_vm14, %v6642_v41, -inf }
 0x6c8   :  { %v6648_v28 = vpop.f32.mrb[59].mxu0  ;;  %v1687_v42 = vsel %vm989_vm13, %v6646_v13, -inf  ;;  %v1599_v11 = vsel %vm900_vm14, %v6646_v13, -inf }
 0x6c9   :  { %1682 = vmax.xlane.f32.xlu1 %v1681_v58  ;;  %v1895_v32 = vsel %vm989_vm13, %v6648_v28, -inf  ;;  %v1807_v46 = vsel %vm900_vm14, %v6648_v28, -inf }
 0x6cb   :  { %1591 = vmax.xlane.f32.xlu0 %v1590_v55 }
 0x6cd   :  { %1594 = vmax.xlane.f32.xlu1 %v1593_v39  ;;  %v6656_v37 = vpop.f32.mrb[60].mxu0 }
 0x6ce   :  { %v6658_v33 = vpop.f32.mrb[61].mxu0  ;;  %v1690_v63 = vsel %vm989_vm13, %v6656_v37, -inf  ;;  %v1602_v5 = vsel %vm900_vm14, %v6656_v37, -inf }
 0x6cf   :  { %1887 = vmax.xlane.f32.xlu0 %v1886_v43  ;;  %v6662_v16 = vpop.f32.mrb[62].mxu0  ;;  %v1898_v62 = vsel %vm989_vm13, %v6658_v33, -inf  ;;  %v1810_v22 = vsel %vm900_vm14, %v6658_v33, -inf }
 0x6d0   :  { %v6664_v52 = vpop.f32.mrb[63].mxu0  ;;  %v1693_v21 = vsel %vm989_vm13, %v6662_v16, -inf  ;;  %v1605_v40 = vsel %vm900_vm14, %v6662_v16, -inf }
 0x6d1   :  { %1890 = vmax.xlane.f32.xlu1 %v1889_v18  ;;  %v1901_v59 = vsel %vm989_vm13, %v6664_v52, -inf  ;;  %v1813_v45 = vsel %vm900_vm14, %v6664_v52, -inf }
 0x6d3   :  { %1799 = vmax.xlane.f32.xlu0 %v1798_v44 }
 0x6d5   :  { %1802 = vmax.xlane.f32.xlu1 %v1801_v61 }
 0x6d7   :  { %1685 = vmax.xlane.f32.xlu0 %v1684_v54 }
 0x6d9   :  { %1688 = vmax.xlane.f32.xlu1 %v1687_v42 }
 0x6db   :  { %1597 = vmax.xlane.f32.xlu0 %v1596_v7 }
 0x6dd   :  { %1600 = vmax.xlane.f32.xlu1 %v1599_v11 }
 0x6df   :  { %1893 = vmax.xlane.f32.xlu0 %v1892_v26 }
 0x6e1   :  { %1896 = vmax.xlane.f32.xlu1 %v1895_v32 }
 0x6e3   :  { %1805 = vmax.xlane.f32.xlu0 %v1804_v8 }
 0x6e5   :  { %1808 = vmax.xlane.f32.xlu1 %v1807_v46 }
 0x6e7   :  { %1691 = vmax.xlane.f32.xlu0 %v1690_v63 }
 0x6e9   :  { %1694 = vmax.xlane.f32.xlu1 %v1693_v21 }
 0x6eb   :  { %1603 = vmax.xlane.f32.xlu0 %v1602_v5 }
 0x6ed   :  { %1606 = vmax.xlane.f32.xlu1 %v1605_v40 }
 0x6ef   :  { %1899 = vmax.xlane.f32.xlu0 %v1898_v62 }
 0x6f1   :  { %1902 = vmax.xlane.f32.xlu1 %v1901_v59 }
 0x6f3   :  { %1811 = vmax.xlane.f32.xlu0 %v1810_v22 }
 0x6f5   :  { %1814 = vmax.xlane.f32.xlu1 %v1813_v45 }
 0x744   :  { %v1674_v6 = vpop.xlane.xlu0 %1673 }
 0x745   :  { %v1696_v47 = vsub.f32 %v6608_v51, %v1674_v6 }
 0x746   :  { %v1677_v30 = vpop.xlane.xlu1 %1676 }
 0x747   :  { %v1704_v31 = vmul.f32 1.442695, %v1696_v47  ;;  %v1697_v17 = vsub.f32 %v6614_v60, %v1677_v30 }
 0x748   :  { %v1586_v2 = vpop.xlane.xlu0 %1585 }
 0x749   :  { %5347 = vpow2.f32 %v1704_v31  ;;  %v1706_v15 = vmul.f32 1.442695, %v1697_v17  ;;  %v1608_v7 = vsub.f32 %v6608_v51, %v1586_v2 }
 0x74a   :  { %v1589_v12 = vpop.xlane.xlu1 %1588 }
 0x74b   :  { %5349 = vpow2.f32 %v1706_v15  ;;  %v1616_v26 = vmul.f32 1.442695, %v1608_v7  ;;  %v1609_v8 = vsub.f32 %v6614_v60, %v1589_v12 }
 0x74c   :  { %v1882_v27 = vpop.xlane.xlu0 %1881 }
 0x74d   :  { %v1904_v58 = vsub.f32 %v6610_v25, %v1882_v27  ;;  %v1618_v21 = vmul.f32 1.442695, %v1609_v8 }
 0x74e   :  { %v1885_v55 = vpop.xlane.xlu1 %1884 }
 0x74f   :  { %v1912_v39 = vmul.f32 1.442695, %v1904_v58  ;;  %v1905_v43 = vsub.f32 %v6616_v49, %v1885_v55 }
 0x750   :  { %v1794_v11 = vpop.xlane.xlu0 %1793 }
 0x751   :  { %5351 = vpow2.f32 %v1912_v39  ;;  %v1914_v18 = vmul.f32 1.442695, %v1905_v43  ;;  %v1816_v32 = vsub.f32 %v6610_v25, %v1794_v11 }
 0x752   :  { %v1797_v63 = vpop.xlane.xlu1 %1796 }
 0x753   :  { %v6708_v44 = vpop.eup %5347  ;;  %5353 = vpow2.f32 %v1914_v18  ;;  %v1824_v46 = vmul.f32 1.442695, %v1816_v32  ;;  %v1817_v5 = vsub.f32 %v6616_v49, %v1797_v63 }
 0x754   :  { %1728 = vrot.lane.b32.xlu1 %v6708_v44, %s5602_s11  ;;  %5355 = vpow2.f32 %v1616_v26  ;;  %v1680_v59 = vpop.xlane.xlu0 %1679 }
 0x755   :  { %v6712_v61 = vpop.eup %5349  ;;  %5357 = vpow2.f32 %v1824_v46  ;;  %v1826_v40 = vmul.f32 1.442695, %v1817_v5  ;;  %v1698_v31 = vsub.f32 %v6624_v36, %v1680_v59 }
 0x756   :  { %5359 = vpow2.f32 %v1618_v21  ;;  %v1683_v51 = vpop.xlane.xlu1 %1682 }
 0x757   :  { %5361 = vpow2.f32 %v1826_v40  ;;  %v1699_v2 = vsub.f32 %v6630_v34, %v1683_v51  ;;  %v1708_v27 = vmul.f32 1.442695, %v1698_v31 }
 0x758   :  { %1730 = vrot.lane.b32.xlu1 %v6712_v61, %s5602_s11  ;;  %v1592_v60 = vpop.xlane.xlu0 %1591 }
 0x759   :  { %v1710_v55 = vmul.f32 1.442695, %v1699_v2  ;;  %5363 = vpow2.f32 %v1708_v27  ;;  %v1610_v63 = vsub.f32 %v6624_v36, %v1592_v60 }
 0x75a   :  { %v6738_v6 = vpop.xlane.xlu1 %1594 }
 0x75b   :  { %v6716_v54 = vpop.eup %5351  ;;  %5365 = vpow2.f32 %v1710_v55  ;;  %v1620_v40 = vmul.f32 1.442695, %v1610_v63 }
 0x75c   :  { %1936 = vrot.lane.b32.xlu0 %v6716_v54, %s5602_s11  ;;  %v1888_v17 = vpop.xlane.xlu0 %1887 }
 0x75d   :  { %v6720_v42 = vpop.eup %5353  ;;  %v1906_v58 = vsub.f32 %v6626_v1, %v1888_v17 }
 0x75e   :  { %1938 = vrot.lane.b32.xlu1 %v6720_v42, %s5602_s11  ;;  %v6728_v62 = vpop.eup %5355  ;;  %v1891_v15 = vpop.xlane.xlu1 %1890 }
 0x75f   :  { %v1632_v22 = vsel %vm900_vm14, %v6728_v62, 0.0  ;;  %v6732_v25 = vpop.eup %5357  ;;  %v1907_v39 = vsub.f32 %v6632_v48, %v1891_v15  ;;  %v1916_v43 = vmul.f32 1.442695, %v1906_v58 }
 0x760   :  { %v6734_v45 = vpop.eup %5359  ;;  %v1840_v49 = vsel %vm900_vm14, %v6732_v25, 0.0  ;;  %v1800_v46 = vpop.xlane.xlu0 %1799 }
 0x761   :  { %v1635_v47 = vsel %vm900_vm14, %v6734_v45, 0.0  ;;  %v6742_v30 = vpop.eup %5361  ;;  %v1918_v18 = vmul.f32 1.442695, %v1907_v39  ;;  %5367 = vpow2.f32 %v1916_v43  ;;  %v1818_v59 = vsub.f32 %v6626_v1, %v1800_v46 }
 0x762   :  { %v1843_v12 = vsel %vm900_vm14, %v6742_v30, 0.0  ;;  %v1803_v8 = vpop.xlane.xlu1 %1802 }
 0x763   :  { %5369 = vpow2.f32 %v1918_v18  ;;  %v6750_v7 = vpop.eup %5363 }
 0x764   :  { %v1686_v5 = vpop.xlane.xlu0 %1685  ;;  %5371 = vpow2.f32 %v1620_v40 }
 0x765   :  { %v6754_v11 = vpop.eup %5365  ;;  %v1700_v18 = vsub.f32 %v6640_v20, %v1686_v5 }
 0x766   :  { %v1689_v21 = vpop.xlane.xlu1 %1688 }
 0x767   :  { %v1701_v39 = vsub.f32 %v6646_v13, %v1689_v21 }
 0x769   :  { %v1714_v46 = vmul.f32 1.442695, %v1701_v39 }
 0x76a   :  { %v6768_v51 = vpop.xlane.xlu1 %1600 }
 0x76b   :  { %v6758_v26 = vpop.eup %5367 }
 0x76d   :  { %v6762_v32 = vpop.eup %5369 }
 0x76e   :  { %v1897_v17 = vpop.xlane.xlu1 %1896  ;;  %v6773_v15 = vpop.eup %5371 }
 0x76f   :  { %v1638_v1 = vsel %vm900_vm14, %v6773_v15, 0.0  ;;  %v1909_v63 = vsub.f32 %v6648_v28, %v1897_v17 }
 0x772   :  { %v6775_v36 = vpop.xlane.xlu1 %1808 }
 0x77b   :  { %1633 = vadd.xlane.f32.xlu0 %v1632_v22  ;;  %v1819_v22 = vsub.f32 %v6632_v48, %v1803_v8  ;;  %v1695_v48 = vpop.xlane.xlu1 %1694 }
 0x77c   :  { %v1703_v21 = vsub.f32 %v6662_v16, %v1695_v48 }
 0x77d   :  { %v1830_v31 = vmul.f32 1.442695, %v1819_v22 }
 0x77f   :  { %1841 = vadd.xlane.f32.xlu0 %v1840_v49  ;;  %v1828_v49 = vmul.f32 1.442695, %v1818_v59  ;;  %v6789_v8 = vpop.xlane.xlu1 %1606  ;;  %v1712_v59 = vmul.f32 1.442695, %v1700_v18 }
 0x781   :  { %5373 = vpow2.f32 %v1828_v49  ;;  %v1922_v49 = vmul.f32 1.442695, %v1909_v63 }
 0x782   :  { %1636 = vadd.xlane.f32.xlu1 %v1635_v47  ;;  %v6771_v47 = vpop.xlane.xlu0 %1597  ;;  %5375 = vpow2.f32 %v1830_v31 }
 0x783   :  { %5377 = vpow2.f32 %v1714_v46  ;;  %v1903_v31 = vpop.xlane.xlu1 %1902 }
 0x784   :  { %5379 = vpow2.f32 %v1712_v59  ;;  %v1911_v39 = vsub.f32 %v6664_v52, %v1903_v31 }
 0x785   :  { %5381 = vpow2.f32 %v1922_v49 }
 0x786   :  { %1844 = vadd.xlane.f32.xlu1 %v1843_v12  ;;  %v1894_v2 = vpop.xlane.xlu0 %1893 }
 0x787   :  { %v1908_v22 = vsub.f32 %v6642_v41, %v1894_v2  ;;  %v1926_v2 = vmul.f32 1.442695, %v1911_v39 }
 0x78a   :  { %v1806_v60 = vpop.xlane.xlu0 %1805 }
 0x78b   :  { %v6779_v12 = vpop.eup %5373 }
 0x78c   :  { %v6781_v27 = vpop.eup %5375  ;;  %v1846_v58 = vsel %vm900_vm14, %v6779_v12, 0.0 }
 0x78d   :  { %v1849_v43 = vsel %vm900_vm14, %v6781_v27, 0.0  ;;  %v6799_v46 = vpop.eup %5377 }
 0x78e   :  { %v1692_v55 = vpop.xlane.xlu0 %1691  ;;  %v6803_v63 = vpop.eup %5379 }
 0x78f   :  { %v1702_v5 = vsub.f32 %v6656_v37, %v1692_v55  ;;  %v6807_v55 = vpop.eup %5381 }
 0x791   :  { %v1716_v17 = vmul.f32 1.442695, %v1702_v5  ;;  %v1611_v5 = vsub.f32 %v6630_v34, %v6738_v6  ;;  %v1815_v6 = vpop.xlane.xlu1 %1814 }
 0x792   :  { %v6792_v40 = vpop.xlane.xlu0 %1603 }
 0x795   :  { %1732 = vrot.lane.b32.xlu0 %v6750_v7, %s5602_s11 }
 0x797   :  { %1734 = vrot.lane.b32.xlu1 %v6754_v11, %s5602_s11 }
 0x799   :  { %1940 = vrot.lane.b32.xlu0 %v6758_v26, %s5602_s11 }
 0x79b   :  { %1942 = vrot.lane.b32.xlu1 %v6762_v32, %s5602_s11 }
 0x7b8   :  { %1639 = vadd.xlane.f32.xlu0 %v1638_v1  ;;  %v1920_v1 = vmul.f32 1.442695, %v1908_v22 }
 0x7ba   :  { %5383 = vpow2.f32 %v1920_v1  ;;  %v1820_v1 = vsub.f32 %v6642_v41, %v1806_v60  ;;  %v1613_v41 = vsub.f32 %v6646_v13, %v6768_v51 }
 0x7bc   :  { %1847 = vadd.xlane.f32.xlu0 %v1846_v58  ;;  %v1900_v58 = vpop.xlane.xlu0 %1899  ;;  %v1626_v10 = vmul.f32 1.442695, %v1613_v41 }
 0x7bd   :  { %v1910_v18 = vsub.f32 %v6658_v33, %v1900_v58  ;;  %v1612_v58 = vsub.f32 %v6640_v20, %v6771_v47  ;;  %v1823_v20 = vsub.f32 %v6664_v52, %v1815_v6 }
 0x7bf   :  { %1850 = vadd.xlane.f32.xlu1 %v1849_v43  ;;  %v1718_v43 = vmul.f32 1.442695, %v1703_v21  ;;  %v1924_v48 = vmul.f32 1.442695, %v1910_v18  ;;  %v1821_v18 = vsub.f32 %v6648_v28, %v6775_v36  ;;  %v1838_v28 = vmul.f32 1.442695, %v1823_v20 }
 0x7c0   :  { %v1812_v39 = vpop.xlane.xlu0 %1811 }
 0x7c1   :  { %5385 = vpow2.f32 %v1718_v43  ;;  %v1832_v43 = vmul.f32 1.442695, %v1820_v1  ;;  %v1834_v60 = vmul.f32 1.442695, %v1821_v18 }
 0x7c2   :  { %5387 = vpow2.f32 %v1716_v17  ;;  %v1622_v17 = vmul.f32 1.442695, %v1611_v5 }
 0x7c3   :  { %5389 = vpow2.f32 %v1926_v2  ;;  %v1624_v2 = vmul.f32 1.442695, %v1612_v58 }
 0x7c4   :  { %5391 = vpow2.f32 %v1924_v48  ;;  %v6811_v59 = vpop.eup %5383  ;;  %v1822_v48 = vsub.f32 %v6658_v33, %v1812_v39 }
 0x7c5   :  { %5393 = vpow2.f32 %v1832_v43 }
 0x7c6   :  { %5395 = vpow2.f32 %v1622_v17  ;;  %v1836_v34 = vmul.f32 1.442695, %v1822_v48  ;;  %v1729_v5 = vpop.permute.xlu1 %1728 }
 0x7c7   :  { %5397 = vpow2.f32 %v1624_v2 }
 0x7c8   :  { %5399 = vpow2.f32 %v1834_v60  ;;  %v1752_v60 = vsel %vm900_vm14, %v1729_v5, 0.0 }
 0x7c9   :  { %5401 = vpow2.f32 %v1836_v34 }
 0x7ca   :  { %5403 = vpow2.f32 %v1626_v10  ;;  %v1731_v18 = vpop.permute.xlu1 %1730 }
 0x7cb   :  { %v6815_v22 = vpop.eup %5385  ;;  %5405 = vpow2.f32 %v1838_v28 }
 0x7cc   :  { %v6819_v49 = vpop.eup %5387 }
 0x7cd   :  { %v6823_v21 = vpop.eup %5389 }
 0x7ce   :  { %v6827_v31 = vpop.eup %5391  ;;  %v1937_v39 = vpop.permute.xlu0 %1936 }
 0x7cf   :  { %v6842_v47 = vpop.eup %5393  ;;  %v1960_v28 = vsel %vm900_vm14, %v1937_v39, 0.0 }
 0x7d0   :  { %1738 = vrot.lane.b32.xlu1 %v6799_v46, %s5602_s11  ;;  %v6844_v36 = vpop.eup %5395  ;;  %v1852_v33 = vsel %vm900_vm14, %v6842_v47, 0.0  ;;  %v1939_v34 = vpop.permute.xlu1 %1938 }
 0x7d1   :  { %v6848_v1 = vpop.eup %5397  ;;  %v1641_v13 = vsel %vm900_vm14, %v6844_v36, 0.0 }
 0x7d2   :  { %1736 = vrot.lane.b32.xlu0 %v6803_v63, %s5602_s11  ;;  %v6852_v51 = vpop.eup %5399  ;;  %v1644_v52 = vsel %vm900_vm14, %v6848_v1, 0.0 }
 0x7d3   :  { %v6856_v10 = vpop.eup %5401  ;;  %v1855_v58 = vsel %vm900_vm14, %v6852_v51, 0.0 }
 0x7d4   :  { %1946 = vrot.lane.b32.xlu1 %v6807_v55, %s5602_s11  ;;  %v6860_v43 = vpop.eup %5403  ;;  %v1858_v17 = vsel %vm900_vm14, %v6856_v10, 0.0 }
 0x7d5   :  { %v1647_v2 = vsel %vm900_vm14, %v6860_v43, 0.0  ;;  %v6866_v48 = vpop.eup %5405 }
 0x7d6   :  { %1944 = vrot.lane.b32.xlu0 %v6811_v59, %s5602_s11  ;;  %v1861_v6 = vsel %vm900_vm14, %v6866_v48, 0.0 }
 0x7d8   :  { %1742 = vrot.lane.b32.xlu1 %v6815_v22, %s5602_s11 }
 0x7da   :  { %1740 = vrot.lane.b32.xlu0 %v6819_v49, %s5602_s11 }
 0x7dc   :  { %1950 = vrot.lane.b32.xlu1 %v6823_v21, %s5602_s11 }
 0x7de   :  { %1948 = vrot.lane.b32.xlu0 %v6827_v31, %s5602_s11 }
 0x7fd   :  { %1853 = vadd.xlane.f32.xlu0 %v1852_v33 }
 0x800   :  { %1642 = vadd.xlane.f32.xlu1 %v1641_v13  ;;  %v1755_v13 = vsel %vm900_vm14, %v1731_v18, 0.0 }
 0x801   :  { %1645 = vadd.xlane.f32.xlu0 %v1644_v52 }
 0x804   :  { %1856 = vadd.xlane.f32.xlu1 %v1855_v58  ;;  %v1963_v58 = vsel %vm900_vm14, %v1939_v34, 0.0  ;;  %v1614_v34 = vsub.f32 %v6656_v37, %v6792_v40 }
 0x805   :  { %1859 = vadd.xlane.f32.xlu0 %v1858_v17 }
 0x808   :  { %v6868_v41 = vpop.xlane.xlu0 %1633  ;;  %1648 = vadd.xlane.f32.xlu1 %v1647_v2 }
 0x809   :  { %1753 = vadd.xlane.f32.xlu0 %v1752_v60 }
 0x80c   :  { %v6873_v20 = vpop.xlane.xlu0 %1841  ;;  %1862 = vadd.xlane.f32.xlu1 %v1861_v6 }
 0x80d   :  { %1961 = vadd.xlane.f32.xlu0 %v1960_v28 }
 0x80f   :  { %v6876_v33 = vpop.xlane.xlu1 %1636 }
 0x810   :  { %v1733_v52 = vpop.permute.xlu0 %1732  ;;  %1756 = vadd.xlane.f32.xlu1 %v1755_v13  ;;  %v1615_v13 = vsub.f32 %v6662_v16, %v6789_v8 }
 0x811   :  { %1964 = vadd.xlane.f32.xlu0 %v1963_v58  ;;  %v1758_v17 = vsel %vm900_vm14, %v1733_v52, 0.0  ;;  %v1628_v52 = vmul.f32 1.442695, %v1614_v34 }
 0x813   :  { %v6880_v5 = vpop.xlane.xlu1 %1844  ;;  %5407 = vpow2.f32 %v1628_v52 }
 0x814   :  { %v1941_v2 = vpop.permute.xlu0 %1940 }
 0x815   :  { %1759 = vadd.xlane.f32.xlu0 %v1758_v17  ;;  %v1966_v6 = vsel %vm900_vm14, %v1941_v2, 0.0  ;;  %v1630_v17 = vmul.f32 1.442695, %v1615_v13 }
 0x817   :  { %v1735_v60 = vpop.permute.xlu1 %1734  ;;  %5409 = vpow2.f32 %v1630_v17 }
 0x818   :  { %v1761_v39 = vsel %vm900_vm14, %v1735_v60, 0.0  ;;  %5411 = vrcp.f32 %v6868_v41 }
 0x819   :  { %1967 = vadd.xlane.f32.xlu0 %v1966_v6  ;;  %1762 = vadd.xlane.f32.xlu1 %v1761_v39  ;;  %5413 = vrcp.f32 %v6873_v20 }
 0x81a   :  { %5415 = vrcp.f32 %v6876_v33 }
 0x81b   :  { %v1943_v28 = vpop.permute.xlu1 %1942 }
 0x81c   :  { %v1969_v18 = vsel %vm900_vm14, %v1943_v28, 0.0 }
 0x81d   :  { %1970 = vadd.xlane.f32.xlu1 %v1969_v18  ;;  %v6897_v8 = vpop.eup %5407 }
 0x81e   :  { %v1650_v17 = vsel %vm900_vm14, %v6897_v8, 0.0 }
 0x821   :  { %v6900_v52 = vpop.eup %5409 }
 0x822   :  { %v5412_v29 = vpop.eup %5411 }
 0x823   :  { %v5414_v24 = vpop.eup %5413 }
 0x824   :  { %v5416_v3 = vpop.eup %5415 }
 0x845   :  { %v6890_v58 = vpop.xlane.xlu0 %1639 }
 0x849   :  { %v1848_v2 = vpop.xlane.xlu0 %1847 }
 0x84c   :  { %v6892_v60 = vpop.xlane.xlu1 %1850 }
 0x84d   :  { %v1737_v6 = vpop.permute.xlu0 %1736 }
 0x84e   :  { %v1764_v39 = vsel %vm900_vm14, %v1737_v6, 0.0 }
 0x84f   :  { %1765 = vadd.xlane.f32.xlu0 %v1764_v39 }
 0x850   :  { %v1739_v28 = vpop.permute.xlu1 %1738 }
 0x851   :  { %v1945_v18 = vpop.permute.xlu0 %1944  ;;  %v1767_v37 = vsel %vm900_vm14, %v1739_v28, 0.0  ;;  %v1653_v28 = vsel %vm900_vm14, %v6900_v52, 0.0 }
 0x852   :  { %1768 = vadd.xlane.f32.xlu1 %v1767_v37  ;;  %v1972_v16 = vsel %vm900_vm14, %v1945_v18, 0.0 }
 0x853   :  { %1973 = vadd.xlane.f32.xlu0 %v1972_v16 }
 0x854   :  { %v1947_v40 = vpop.permute.xlu1 %1946 }
 0x855   :  { %v1741_v34 = vpop.permute.xlu0 %1740  ;;  %v1975_v13 = vsel %vm900_vm14, %v1947_v40, 0.0 }
 0x856   :  { %1976 = vadd.xlane.f32.xlu1 %v1975_v13  ;;  %v1770_v40 = vsel %vm900_vm14, %v1741_v34, 0.0 }
 0x857   :  { %1651 = vadd.xlane.f32.xlu0 %v1650_v17  ;;  %v5187_v17 = vld [vmem:[%s8001_s1 + $0x14] ss:$72 sps:$4 sm:$0xff]  }
 0x858   :  { %v1743_v6 = vpop.permute.xlu1 %1742  ;;  %4983 = vmatprep.subr.bf16.mxu1 %v5187_v17 }
 0x859   :  { %v1949_v39 = vpop.permute.xlu0 %1948  ;;  %v1773_v13 = vsel %vm900_vm14, %v1743_v6, 0.0 }
 0x85a   :  { %1654 = vadd.xlane.f32.xlu1 %v1653_v28  ;;  %v1978_v18 = vsel %vm900_vm14, %v1949_v39, 0.0 }
 0x85b   :  { %1979 = vadd.xlane.f32.xlu0 %v1978_v18 }
 0x85c   :  { %v1951_v37 = vpop.permute.xlu1 %1950 }
 0x85d   :  { %v1981_v16 = vsel %vm900_vm14, %v1951_v37, 0.0 }
 0x85e   :  { %1982 = vadd.xlane.f32.xlu1 %v1981_v16 }
 0x85f   :  { %1771 = vadd.xlane.f32.xlu0 %v1770_v40 }
 0x862   :  { %1774 = vadd.xlane.f32.xlu1 %v1773_v13 }
 0x88a   :  { %v6913_v9 = vpop.xlane.xlu0 %1853 }
 0x88d   :  { %v1643_v28 = vpop.xlane.xlu1 %1642 }
 0x88e   :  { %v6915_v39 = vpop.xlane.xlu0 %1645 }
 0x891   :  { %v6917_v18 = vpop.xlane.xlu1 %1856 }
 0x892   :  { %v6919_v37 = vpop.xlane.xlu0 %1859 }
 0x895   :  { %v6921_v16 = vpop.xlane.xlu1 %1648 }
 0x896   :  { %v1754_v34 = vpop.xlane.xlu0 %1753 }
 0x899   :  { %v6925_v6 = vpop.xlane.xlu1 %1862 }
 0x89a   :  { %v1962_v40 = vpop.xlane.xlu0 %1961 }
 0x89b   :  { %5417 = vrcp.f32 %v1962_v40 }
 0x89c   :  { %5419 = vrcp.f32 %v1754_v34 }
 0x89d   :  { %5421 = vrcp.f32 %v6880_v5  ;;  %v1757_v13 = vpop.xlane.xlu1 %1756 }
 0x89e   :  { %5423 = vrcp.f32 %v1757_v13  ;;  %v1965_v57 = vpop.xlane.xlu0 %1964 }
 0x89f   :  { %5425 = vrcp.f32 %v1965_v57  ;;  %v1665_v57 = vmul.f32 %v5416_v3, %v6734_v45 }
 0x8a0   :  { %5427 = vrcp.f32 %v1848_v2 }
 0x8a1   :  { %5429 = vrcp.f32 %v1643_v28  ;;  %v1872_v28 = vmul.f32 %v5414_v24, %v6732_v25  ;;  %v5188_v24 = vld [vmem:[%s8001_s1 + $0xa4] ss:$72 sps:$4 sm:$0xff]  }
 0x8a2   :  { %v1760_v50 = vpop.xlane.xlu0 %1759 }
 0x8a3   :  { %5431 = vrcp.f32 %v1760_v50 }
 0x8a5   :  { %v5418_v41 = vpop.eup %5417 }
 0x8a6   :  { %v5420_v20 = vpop.eup %5419  ;;  %v1968_v4 = vpop.xlane.xlu0 %1967  ;;  %v1992_v5 = vmul.f32 %v5418_v41, %v6716_v54  ;;  %v1664_v54 = vmul.f32 %v5412_v29, %v6728_v62 }
 0x8a7   :  { %v1763_v33 = vpop.xlane.xlu1 %1762  ;;  %v5422_v14 = vpop.eup %5421  ;;  %5433 = vrcp.f32 %v1968_v4  ;;  %v1784_v13 = vmul.f32 %v5420_v20, %v6708_v44 }
 0x8a8   :  { %v5424_v34 = vpop.eup %5423  ;;  %5435 = vrcp.f32 %v1763_v33  ;;  %v1873_v4 = vmul.f32 %v5422_v14, %v6742_v30  ;;  %v2008_v45 = vsel %vm900_vm14, %v1872_v28, %v1992_v5 }
 0x8a9   :  { %v5426_v40 = vpop.eup %5425  ;;  %5437 = vrcp.f32 %v6892_v60  ;;  %v1785_v2 = vmul.f32 %v5424_v34, %v6712_v61  ;;  %v2000_v61 = vsel %vm900_vm14, %v1664_v54, %v1784_v13 }
 0x8aa   :  { %5439 = vrcp.f32 %v6890_v58  ;;  %v1993_v33 = vmul.f32 %v5426_v40, %v6720_v42  ;;  %v5428_v58 = vpop.eup %5427 }
 0x8ab   :  { %v1971_v50 = vpop.xlane.xlu1 %1970  ;;  %v2001_v3 = vsel %vm900_vm14, %v1665_v57, %v1785_v2  ;;  %v5430_v14 = vpop.eup %5429  ;;  %v1874_v13 = vmul.f32 %v5428_v58, %v6779_v12 }
 0x8ac   :  { %5441 = vrcp.f32 %v1971_v50  ;;  %v2009_v44 = vsel %vm900_vm14, %v1873_v4, %v1993_v33  ;;  %v2016_v41 = vpack.c.bf16 %v2001_v3, %v2000_v61  ;;  %v1667_v40 = vmul.f32 %v5430_v14, %v6844_v36 }
 0x8ad   :  { %v2017_v60 = vpack.c.bf16 %v2009_v44, %v2008_v45  ;;  %v5432_v42 = vpop.eup %5431  ;;  %5443 = vrcp.f32 %v6913_v9 }
 0x8ae   :  { %v1786_v57 = vmul.f32 %v5432_v42, %v6750_v7  ;;  %5445 = vrcp.f32 %v6921_v16 }
 0x8af   :  { %2056 = vmatprep.mubr.bf16.mxu1 %v2017_v60 }
 0x8b0   :  { %2057 = vmatmul.mubr.bf16.vlgmr.msra.gmra.mrb[64].mxu1 %v2016_v41 }
 0x8b1   :  { %v5434_v29 = vpop.eup %5433  ;;  %4984 = vmatpush3.bf16.msra.mxu1 %v5187_v17 }
 0x8b2   :  { %v5436_v62 = vpop.eup %5435  ;;  %4985 = vmatprep.subr.bf16.mxu1 %v5188_v24  ;;  %v1994_v34 = vmul.f32 %v5434_v29, %v6758_v26 }
 0x8b3   :  { %v5438_v25 = vpop.eup %5437  ;;  %v1787_v30 = vmul.f32 %v5436_v62, %v6754_v11 }
 0x8b4   :  { %v5440_v20 = vpop.eup %5439  ;;  %v1875_v2 = vmul.f32 %v5438_v25, %v6781_v27  ;;  %v2010_v11 = vsel %vm900_vm14, %v1874_v13, %v1994_v34 }
 0x8b5   :  { %4986 = vmatpush3.bf16.msra.mxu1 %v5188_v24  ;;  %v1666_v50 = vmul.f32 %v5440_v20, %v6773_v15  ;;  %v2003_v28 = vsel %vm900_vm14, %v1667_v40, %v1787_v30 }
 0x8b6   :  { %v5442_v5 = vpop.eup %5441 }
 0x8b7   :  { %v1995_v17 = vmul.f32 %v5442_v5, %v6762_v32  ;;  %v2002_v36 = vsel %vm900_vm14, %v1666_v50, %v1786_v57  ;;  %v5444_v54 = vpop.eup %5443 }
 0x8b8   :  { %v2018_v33 = vpack.c.bf16 %v2003_v28, %v2002_v36  ;;  %v5446_v45 = vpop.eup %5445 }
 0x8b9   :  { %v2011_v26 = vsel %vm900_vm14, %v1875_v2, %v1995_v17 }
 0x8ba   :  { %v2019_v4 = vpack.c.bf16 %v2011_v26, %v2010_v11 }
 0x8bc   :  { %2064 = vmatprep.mubr.bf16.mxu1 %v2019_v4 }
 0x8bd   :  { %2065 = vmatmul.mubr.bf16.gmra.mrb[68].mxu1 %v2018_v33 }
 0x8dc   :  { %v1766_v7 = vpop.xlane.xlu0 %1765 }
 0x8dd   :  { %5447 = vrcp.f32 %v1766_v7 }
 0x8df   :  { %v1769_v32 = vpop.xlane.xlu1 %1768 }
 0x8e0   :  { %5449 = vrcp.f32 %v1769_v32  ;;  %v1974_v15 = vpop.xlane.xlu0 %1973  ;;  %v8071_v32 = vpack.c.bf16 %v6586_v19, %v6584_v38 }
 0x8e1   :  { %5451 = vrcp.f32 %v1974_v15 }
 0x8e2   :  { %5453 = vrcp.f32 %v6917_v18 }
 0x8e3   :  { %5455 = vrcp.f32 %v6915_v39  ;;  %v1977_v12 = vpop.xlane.xlu1 %1976 }
 0x8e4   :  { %5457 = vrcp.f32 %v1977_v12  ;;  %v1652_v27 = vpop.xlane.xlu0 %1651 }
 0x8e5   :  { %5459 = vrcp.f32 %v6919_v37  ;;  %v1669_v37 = vmul.f32 %v5446_v45, %v6860_v43 }
 0x8e7   :  { %v1655_v3 = vpop.xlane.xlu1 %1654  ;;  %v5448_v44 = vpop.eup %5447 }
 0x8e8   :  { %v1980_v9 = vpop.xlane.xlu0 %1979  ;;  %v1788_v42 = vmul.f32 %v5448_v44, %v6803_v63 }
 0x8e9   :  { %5461 = vrcp.f32 %v1980_v9 }
 0x8ea   :  { %v5450_v16 = vpop.eup %5449  ;;  %5463 = vrcp.f32 %v6925_v6  ;;  %v1876_v6 = vmul.f32 %v5444_v54, %v6842_v47 }
 0x8eb   :  { %v5452_v60 = vpop.eup %5451  ;;  %5465 = vrcp.f32 %v1652_v27  ;;  %v1983_v61 = vpop.xlane.xlu1 %1982  ;;  %v1789_v58 = vmul.f32 %v5450_v16, %v6799_v46 }
 0x8ec   :  { %v5454_v18 = vpop.eup %5453  ;;  %5467 = vrcp.f32 %v1983_v61  ;;  %v1772_v39 = vpop.xlane.xlu0 %1771  ;;  %v1996_v24 = vmul.f32 %v5452_v60, %v6811_v59 }
 0x8ed   :  { %v5456_v41 = vpop.eup %5455  ;;  %5469 = vrcp.f32 %v1772_v39  ;;  %v1877_v62 = vmul.f32 %v5454_v18, %v6852_v51  ;;  %v2005_v30 = vsel %vm900_vm14, %v1669_v37, %v1789_v58 }
 0x8ee   :  { %v5458_v14 = vpop.eup %5457  ;;  %5471 = vrcp.f32 %v1655_v3  ;;  %v1668_v46 = vmul.f32 %v5456_v41, %v6848_v1  ;;  %v2012_v59 = vsel %vm900_vm14, %v1876_v6, %v1996_v24 }
 0x8ef   :  { %v1775_v29 = vpop.xlane.xlu1 %1774  ;;  %v1997_v25 = vmul.f32 %v5458_v14, %v6807_v55  ;;  %v5460_v34 = vpop.eup %5459 }
 0x8f0   :  { %5473 = vrcp.f32 %v1775_v29  ;;  %v2004_v63 = vsel %vm900_vm14, %v1668_v46, %v1788_v42  ;;  %v1878_v13 = vmul.f32 %v5460_v34, %v6856_v10 }
 0x8f1   :  { %v2013_v20 = vsel %vm900_vm14, %v1877_v62, %v1997_v25  ;;  %v2020_v40 = vpack.c.bf16 %v2005_v30, %v2004_v63  ;;  %v7010_v62 = vld [vmem:[%s8003_s2 + $0x15] ss:$0 sm:$0xff] }
 0x8f2   :  { %v2021_v43 = vpack.c.bf16 %v2013_v20, %v2012_v59 }
 0x8f3   :  { %v5462_v5 = vpop.eup %5461 }
 0x8f4   :  { %v5464_v47 = vpop.eup %5463  ;;  %2072 = vmatprep.mubr.bf16.mxu1 %v2021_v43  ;;  %v1998_v55 = vmul.f32 %v5462_v5, %v6827_v31  ;;  %v8076_v43 = vld [vmem:[#allocation2_spill] sm:$0xff] }
 0x8f5   :  { %v5466_v51 = vpop.eup %5465  ;;  %2073 = vmatmul.mubr.bf16.gmra.mrb[72].mxu1 %v2020_v40  ;;  %v1879_v2 = vmul.f32 %v5464_v47, %v6866_v48  ;;  %v8077_v47 = vld [vmem:[#allocation5_spill] sm:$0xff] }
 0x8f6   :  { %v5468_v57 = vpop.eup %5467  ;;  %v2014_v28 = vsel %vm900_vm14, %v1878_v13, %v1998_v55  ;;  %v1670_v33 = vmul.f32 %v5466_v51, %v6897_v8  ;;  %v8074_v8 = vld [vmem:[#allocation26_spill] sm:$0xff]  ;;  %v8078_v55 = vld [vmem:[#allocation4_spill] sm:$0xff]  ;;  %v8079_v13 = vld [vmem:[#allocation3_spill] sm:$0xff] }
 0x8f7   :  { %v5470_v1 = vpop.eup %5469  ;;  %v1999_v17 = vmul.f32 %v5468_v57, %v6823_v21 }
 0x8f8   :  { %v5472_v50 = vpop.eup %5471  ;;  %v1790_v26 = vmul.f32 %v5470_v1, %v6819_v49  ;;  %v8072_v49 = vpack.c.bf16 %v6592_v53, %v6590_v56 }
 0x8f9   :  { %v2015_v11 = vsel %vm900_vm14, %v1879_v2, %v1999_v17  ;;  %v1671_v31 = vmul.f32 %v5472_v50, %v6900_v52  ;;  %v8075_v52 = vpack.c.bf16 %v6604_v0, %v8074_v8 }
 0x8fa   :  { %v5474_v4 = vpop.eup %5473  ;;  %v2023_v36 = vpack.c.bf16 %v2015_v11, %v2014_v28  ;;  %v2006_v10 = vsel %vm900_vm14, %v1670_v33, %v1790_v26 }
 0x8fb   :  { %v1791_v7 = vmul.f32 %v5474_v4, %v6815_v22  ;;  %v8073_v22 = vpack.c.bf16 %v6598_v23, %v6596_v35 }
 0x8fc   :  { %2080 = vmatprep.mubr.bf16.mxu1 %v2023_v36 }
 0x8fd   :  { %v2007_v21 = vsel %vm900_vm14, %v1671_v31, %v1791_v7  ;;  %v8080_v31 = vld [vmem:[#allocation7_spill] sm:$0xff] }
 0x8fe   :  { %v2022_v48 = vpack.c.bf16 %v2007_v21, %v2006_v10 }
 0x900   :  { %2081 = vmatmul.mubr.bf16.gmra.mrb[76].mxu1 %v2022_v48 }
 0x901   :  { %4987 = vmatprep.mubr.msk.bf16.mxu1 %vm439_vm2, %v8071_v32  ;;  %v8081_v32 = vld [vmem:[#allocation6_spill] sm:$0xff] }
 0x908   :  { %4988 = vmatmul.mubr.msk.bf16.vlgmr.msra.gmra.mrb[80].mxu1 %vm439_vm2, %v8072_v49 }
 0x909   :  { %4991 = vmatprep.mubr.msk.bf16.mxu1 %vm439_vm2, %v8073_v22  ;;  %v8082_v22 = vld [vmem:[#allocation9_spill] sm:$0xff] }
 0x910   :  { %4992 = vmatmul.mubr.msk.bf16.gmra.mrb[84].mxu1 %vm439_vm2, %v8075_v52 }
 0x983   :  { %v4747_v15 = vpop.f32.mrb[64].mxu1 }
 0x984   :  { %v4748_v12 = vpop.f32.mrb[65].mxu1 }
 0x985   :  { %v4749_v38 = vadd.f32 %v4748_v12, %v4747_v15  ;;  %v4750_v19 = vpop.f32.mrb[66].mxu1  ;;  %v8083_v15 = vld [vmem:[#allocation8_spill] sm:$0xff] }
 0x986   :  { %v4751_v27 = vpop.f32.mrb[67].mxu1 }
 0x987   :  { %v4752_v54 = vadd.f32 %v4751_v27, %v4750_v19 }
 0x989   :  { %v2093_v3 = vpack.c.bf16 %v4752_v54, %v4749_v38  ;;  %v5189_v54 = vld [vmem:[%s8001_s1 + $0x18] ss:$72 sps:$4 sm:$0xff]  }
 0x98a   :  { %5003 = vmatprep.subr.bf16.mxu0 %v5189_v54 }
 0x98b   :  { %4995 = vmatprep.mubr.msk.bf16.mxu1 %vm439_vm2, %v2093_v3  ;;  %5004 = vmatpush3.bf16.msra.mxu0 %v5189_v54 }
 0x990   :  { %v4753_v56 = vpop.f32.mrb[68].mxu1 }
 0x991   :  { %v4754_v53 = vpop.f32.mrb[69].mxu1 }
 0x992   :  { %v4755_v45 = vadd.f32 %v4754_v53, %v4753_v56  ;;  %v4756_v35 = vpop.f32.mrb[70].mxu1 }
 0x993   :  { %v4757_v23 = vpop.f32.mrb[71].mxu1 }
 0x994   :  { %v4758_v9 = vadd.f32 %v4757_v23, %v4756_v35 }
 0x996   :  { %v2094_v44 = vpack.c.bf16 %v4758_v9, %v4755_v45 }
 0x998   :  { %4996 = vmatmul.mubr.msk.bf16.gmra.mrb[88].mxu1 %vm439_vm2, %v2094_v44 }
 0x9c8   :  { %v4759_v0 = vpop.f32.mrb[72].mxu1 }
 0x9c9   :  { %v4760_v16 = vpop.f32.mrb[73].mxu1 }
 0x9ca   :  { %v4761_v60 = vadd.f32 %v4760_v16, %v4759_v0  ;;  %v4762_v61 = vpop.f32.mrb[74].mxu1 }
 0x9cb   :  { %v4763_v18 = vpop.f32.mrb[75].mxu1 }
 0x9cc   :  { %v4764_v39 = vadd.f32 %v4763_v18, %v4762_v61 }
 0x9ce   :  { %v2095_v58 = vpack.c.bf16 %v4764_v39, %v4761_v60 }
 0x9d0   :  { %4999 = vmatprep.mubr.msk.bf16.mxu1 %vm439_vm2, %v2095_v58 }
 0x9d3   :  { %v4765_v41 = vpop.f32.mrb[76].mxu1 }
 0x9d4   :  { %v4766_v24 = vpop.f32.mrb[77].mxu1 }
 0x9d5   :  { %v4767_v14 = vadd.f32 %v4766_v24, %v4765_v41  ;;  %v4768_v37 = vpop.f32.mrb[78].mxu1 }
 0x9d6   :  { %v4769_v42 = vpop.f32.mrb[79].mxu1 }
 0x9d7   :  { %v4770_v29 = vadd.f32 %v4769_v42, %v4768_v37 }
 0x9d9   :  { %v2096_v6 = vpack.c.bf16 %v4770_v29, %v4767_v14 }
 0x9db   :  { %v4989_v25 = vpop.f32.mrb[80].mxu1  ;;  %5000 = vmatmul.mubr.msk.bf16.gmra.mrb[92].mxu1 %vm439_vm2, %v2096_v6 }
 0x9dc   :  { %v2172_v46 = vpop.f32.mrb[81].mxu1  ;;  %v2181_v30 = vadd.f32 %v4989_v25, %v7010_v62 }
 0x9dd   :  { %v2173_v59 = vadd.f32 %v2172_v46, %v7010_v62  ;;  %v4990_v20 = vpop.f32.mrb[82].mxu1 }
 0x9de   :  { %v2175_v34 = vpop.f32.mrb[83].mxu1  ;;  %v2184_v5 = vadd.f32 %v4990_v20, %v7010_v62  ;;  %v2237_v51 = vadd.f32 %v2181_v30, %v8077_v47 }
 0x9df   :  { %v2235_v63 = vadd.f32 %v2173_v59, %v8076_v43  ;;  %v2176_v40 = vadd.f32 %v2175_v34, %v7010_v62 }
 0x9e0   :  { %v2238_v2 = vadd.f32 %v2184_v5, %v8079_v13  ;;  %v2258_v36 = vsel %vm439_vm2, %v2237_v51, 0.0 }
 0x9e1   :  { %v2236_v57 = vadd.f32 %v2176_v40, %v8078_v55  ;;  %v2252_v1 = vsel %vm439_vm2, %v2235_v63, 0.0 }
 0x9e2   :  { %2253 = vadd.xlane.f32.xlu0 %v2252_v1  ;;  %v2261_v48 = vsel %vm439_vm2, %v2238_v2, 0.0 }
 0x9e3   :  { %v4993_v17 = vpop.f32.mrb[84].mxu1  ;;  %v2255_v50 = vsel %vm439_vm2, %v2236_v57, 0.0 }
 0x9e4   :  { %2256 = vadd.xlane.f32.xlu1 %v2255_v50  ;;  %v2188_v28 = vpop.f32.mrb[85].mxu1  ;;  %v2197_v11 = vadd.f32 %v4993_v17, %v7010_v62 }
 0x9e5   :  { %v2189_v26 = vadd.f32 %v2188_v28, %v7010_v62  ;;  %v4994_v4 = vpop.f32.mrb[86].mxu1 }
 0x9e6   :  { %2259 = vadd.xlane.f32.xlu0 %v2258_v36  ;;  %v2191_v33 = vpop.f32.mrb[87].mxu1  ;;  %v2200_v10 = vadd.f32 %v4994_v4, %v7010_v62  ;;  %v2241_v49 = vadd.f32 %v2197_v11, %v8081_v32  ;;  %v8084_v4 = vld [vmem:[#allocation11_spill] sm:$0xff]  ;;  %v8086_v32 = vld [vmem:[#allocation10_spill] sm:$0xff] }
 0x9e7   :  { %v2239_v7 = vadd.f32 %v2189_v26, %v8080_v31  ;;  %v2192_v21 = vadd.f32 %v2191_v33, %v7010_v62 }
 0x9e8   :  { %2262 = vadd.xlane.f32.xlu1 %v2261_v48  ;;  %v2242_v12 = vadd.f32 %v2200_v10, %v8083_v15  ;;  %v2270_v19 = vsel %vm439_vm2, %v2241_v49, 0.0  ;;  %v8085_v10 = vld [vmem:[#allocation13_spill] sm:$0xff] }
 0x9e9   :  { %v2240_v8 = vadd.f32 %v2192_v21, %v8082_v22  ;;  %v2264_v52 = vsel %vm439_vm2, %v2239_v7, 0.0 }
 0x9ea   :  { %2265 = vadd.xlane.f32.xlu0 %v2264_v52  ;;  %v2273_v27 = vsel %vm439_vm2, %v2242_v12, 0.0 }
 0x9eb   :  { %v2267_v38 = vsel %vm439_vm2, %v2240_v8, 0.0 }
 0x9ec   :  { %2268 = vadd.xlane.f32.xlu1 %v2267_v38 }
 0x9ee   :  { %2271 = vadd.xlane.f32.xlu0 %v2270_v19  ;;  %v5190_v19 = vld [vmem:[%s8001_s1 + $0xa8] ss:$72 sps:$4 sm:$0xff]  }
 0x9ef   :  { %5005 = vmatprep.subr.bf16.mxu0 %v5190_v19 }
 0x9f0   :  { %2274 = vadd.xlane.f32.xlu1 %v2273_v27  ;;  %5006 = vmatpush3.bf16.msra.mxu0 %v5190_v19  ;;  %v8088_v27 = vmov 0.0  }
 0x9f1   :  { %5047 = vmatprep.subr.bf16.mxu0 %v8088_v27 }
 0xa6b   :  { %v4997_v3 = vpop.f32.mrb[88].mxu1 }
 0xa6c   :  { %v2204_v56 = vpop.f32.mrb[89].mxu1  ;;  %v2213_v26 = vadd.f32 %v4997_v3, %v7010_v62 }
 0xa6d   :  { %v4998_v53 = vpop.f32.mrb[90].mxu1 }
 0xa6e   :  { %v2207_v45 = vpop.f32.mrb[91].mxu1 }
 0xa6f   :  { %v2254_v35 = vpop.xlane.xlu0 %2253  ;;  %v2208_v17 = vadd.f32 %v2207_v45, %v7010_v62 }
 0xa70   :  { %v2301_v23 = vmul.f32 0.03125, %v2254_v35 }
 0xa71   :  { %v2257_v9 = vpop.xlane.xlu1 %2256  ;;  %v7087_v21 = vadd.f32 %v2208_v17, %v8085_v10  ;;  %v8093_v17 = vld [vmem:[#allocation19_spill] sm:$0xff] }
 0xa72   :  { %v7040_v44 = vsub.f32 %v2235_v63, %v2301_v23  ;;  %v2302_v0 = vmul.f32 0.03125, %v2257_v9  ;;  %v8089_v23 = vld [vmem:[#allocation15_spill] sm:$0xff] }
 0xa73   :  { %v2260_v16 = vpop.xlane.xlu0 %2259  ;;  %v2279_v15 = vsel %vm439_vm2, %v7087_v21, 0.0 }
 0xa74   :  { %v7042_v60 = vsub.f32 %v2236_v57, %v2302_v0  ;;  %v2303_v61 = vmul.f32 0.03125, %v2260_v16  ;;  %v2333_v18 = vmul.f32 %v7040_v44, %v7040_v44 }
 0xa75   :  { %v2263_v39 = vpop.xlane.xlu1 %2262 }
 0xa76   :  { %v7046_v58 = vsub.f32 %v2237_v51, %v2303_v61  ;;  %v2304_v41 = vmul.f32 0.03125, %v2263_v39  ;;  %v2349_v24 = vsel %vm439_vm2, %v2333_v18, 0.0  ;;  %v2334_v14 = vmul.f32 %v7042_v60, %v7042_v60  ;;  %v8090_v61 = vld [vmem:[#allocation14_spill] sm:$0xff]  ;;  %v8091_v39 = vld [vmem:[#allocation17_spill] sm:$0xff] }
 0xa77   :  { %2350 = vadd.xlane.f32.xlu0 %v2349_v24  ;;  %v2266_v37 = vpop.xlane.xlu0 %2265  ;;  %v2205_v51 = vadd.f32 %v2204_v56, %v7010_v62 }
 0xa78   :  { %v7051_v42 = vsub.f32 %v2238_v2, %v2304_v41  ;;  %v2305_v29 = vmul.f32 0.03125, %v2266_v37  ;;  %v2352_v6 = vsel %vm439_vm2, %v2334_v14, 0.0  ;;  %v2335_v25 = vmul.f32 %v7046_v58, %v7046_v58  ;;  %v8092_v14 = vld [vmem:[#allocation16_spill] sm:$0xff] }
 0xa79   :  { %2353 = vadd.xlane.f32.xlu1 %v2352_v6  ;;  %v2269_v46 = vpop.xlane.xlu1 %2268  ;;  %v7080_v36 = vadd.f32 %v2205_v51, %v8084_v4 }
 0xa7a   :  { %v7056_v30 = vsub.f32 %v2239_v7, %v2305_v29  ;;  %v2306_v59 = vmul.f32 0.03125, %v2269_v46  ;;  %v2355_v20 = vsel %vm439_vm2, %v2335_v25, 0.0  ;;  %v2336_v34 = vmul.f32 %v7051_v42, %v7051_v42 }
 0xa7b   :  { %2356 = vadd.xlane.f32.xlu0 %v2355_v20  ;;  %v2272_v43 = vpop.xlane.xlu0 %2271  ;;  %v2216_v7 = vadd.f32 %v4998_v53, %v7010_v62  ;;  %v2276_v22 = vsel %vm439_vm2, %v7080_v36, 0.0 }
 0xa7c   :  { %v7061_v63 = vsub.f32 %v2240_v8, %v2306_v59  ;;  %v2307_v5 = vmul.f32 0.03125, %v2272_v43  ;;  %v2358_v40 = vsel %vm439_vm2, %v2336_v34, 0.0  ;;  %v2337_v47 = vmul.f32 %v7056_v30, %v7056_v30  ;;  %v8087_v8 = vld [vmem:[#allocation12_spill] sm:$0xff] }
 0xa7d   :  { %2359 = vadd.xlane.f32.xlu1 %v2358_v40  ;;  %v2275_v55 = vpop.xlane.xlu1 %2274  ;;  %v7096_v52 = vadd.f32 %v2216_v7, %v8087_v8 }
 0xa7e   :  { %v7067_v57 = vsub.f32 %v2241_v49, %v2307_v5  ;;  %v2308_v1 = vmul.f32 0.03125, %v2275_v55  ;;  %v2361_v13 = vsel %vm439_vm2, %v2337_v47, 0.0  ;;  %v2338_v2 = vmul.f32 %v7061_v63, %v7061_v63 }
 0xa7f   :  { %2362 = vadd.xlane.f32.xlu0 %v2361_v13  ;;  %v7091_v49 = vadd.f32 %v2213_v26, %v8086_v32  ;;  %v2285_v38 = vsel %vm439_vm2, %v7096_v52, 0.0  ;;  %v2251_v26 = vld [vmem:[%s8003_s2 + $0x10] sm:$0xc0]  ;;  %v2483_v32 = vsub.s32 7, %v8093_v17 }
 0xa80   :  { %v7073_v50 = vsub.f32 %v2242_v12, %v2308_v1  ;;  %v2364_v28 = vsel %vm439_vm2, %v2338_v2, 0.0  ;;  %v2339_v11 = vmul.f32 %v7067_v57, %v7067_v57 }
 0xa81   :  { %2365 = vadd.xlane.f32.xlu1 %v2364_v28  ;;  %v2282_v12 = vsel %vm439_vm2, %v7091_v49, 0.0  ;;  %v2463_v28 = vsub.s32 6, %v8093_v17 }
 0xa82   :  { %v2367_v33 = vsel %vm439_vm2, %v2339_v11, 0.0  ;;  %v2340_v31 = vmul.f32 %v7073_v50, %v7073_v50 }
 0xa83   :  { %2368 = vadd.xlane.f32.xlu0 %v2367_v33 }
 0xa84   :  { %v2370_v48 = vsel %vm439_vm2, %v2340_v31, 0.0 }
 0xa85   :  { %2371 = vadd.xlane.f32.xlu1 %v2370_v48  ;;  %v7138_v48 = vrot.slane %v2251_v26, %v2463_v28 }
 0xa87   :  { %2277 = vadd.xlane.f32.xlu0 %v2276_v22 }
 0xa89   :  { %2280 = vadd.xlane.f32.xlu1 %v2279_v15 }
 0xa8b   :  { %2283 = vadd.xlane.f32.xlu0 %v2282_v12 }
 0xa8d   :  { %2286 = vadd.xlane.f32.xlu1 %v2285_v38 }
 0xaae   :  { %v5001_v54 = vpop.f32.mrb[92].mxu1 }
 0xaaf   :  { %v2220_v3 = vpop.f32.mrb[93].mxu1  ;;  %v2229_v56 = vadd.f32 %v5001_v54, %v7010_v62 }
 0xab0   :  { %v2221_v53 = vadd.f32 %v2220_v3, %v7010_v62  ;;  %v5002_v45 = vpop.f32.mrb[94].mxu1 }
 0xab1   :  { %v2223_v35 = vpop.f32.mrb[95].mxu1  ;;  %v2232_v0 = vadd.f32 %v5002_v45, %v7010_v62  ;;  %v7116_v18 = vadd.f32 %v2229_v56, %v8090_v61  ;;  %v7145_v45 = vrot.slane %v2251_v26, %v2483_v32 }
 0xab2   :  { %v7111_v9 = vadd.f32 %v2221_v53, %v8089_v23  ;;  %v2224_v16 = vadd.f32 %v2223_v35, %v7010_v62 }
 0xab3   :  { %v7124_v37 = vadd.f32 %v2232_v0, %v8092_v14  ;;  %v2294_v62 = vsel %vm439_vm2, %v7116_v18, 0.0 }
 0xab4   :  { %v7119_v41 = vadd.f32 %v2224_v16, %v8091_v39  ;;  %v2288_v24 = vsel %vm439_vm2, %v7111_v9, 0.0 }
 0xab5   :  { %2289 = vadd.xlane.f32.xlu0 %v2288_v24  ;;  %v2297_v6 = vsel %vm439_vm2, %v7124_v37, 0.0 }
 0xab6   :  { %v2291_v29 = vsel %vm439_vm2, %v7119_v41, 0.0 }
 0xab7   :  { %2292 = vadd.xlane.f32.xlu1 %v2291_v29 }
 0xab9   :  { %2295 = vadd.xlane.f32.xlu0 %v2294_v62 }
 0xabb   :  { %2298 = vadd.xlane.f32.xlu1 %v2297_v6 }
 0xb04   :  { %v2351_v25 = vpop.xlane.xlu0 %2350 }
 0xb05   :  { %v2397_v46 = vmul.f32 0.03125, %v2351_v25 }
 0xb06   :  { %v2354_v59 = vpop.xlane.xlu1 %2353 }
 0xb07   :  { %v2413_v20 = vadd.f32 1e-05, %v2397_v46  ;;  %v2398_v34 = vmul.f32 0.03125, %v2354_v59 }
 0xb08   :  { %v2357_v43 = vpop.xlane.xlu0 %2356 }
 0xb09   :  { %5475 = vrsqrt.f32 %v2413_v20  ;;  %v2414_v5 = vadd.f32 1e-05, %v2398_v34  ;;  %v2399_v40 = vmul.f32 0.03125, %v2357_v43 }
 0xb0a   :  { %v2360_v47 = vpop.xlane.xlu1 %2359 }
 0xb0b   :  { %5477 = vrsqrt.f32 %v2414_v5  ;;  %v2415_v51 = vadd.f32 1e-05, %v2399_v40  ;;  %v2400_v55 = vmul.f32 0.03125, %v2360_v47 }
 0xb0c   :  { %v2363_v1 = vpop.xlane.xlu0 %2362 }
 0xb0d   :  { %5479 = vrsqrt.f32 %v2415_v51  ;;  %v2416_v13 = vadd.f32 1e-05, %v2400_v55  ;;  %v2401_v2 = vmul.f32 0.03125, %v2363_v1 }
 0xb0e   :  { %v2366_v11 = vpop.xlane.xlu1 %2365 }
 0xb0f   :  { %5481 = vrsqrt.f32 %v2416_v13  ;;  %v2417_v4 = vadd.f32 1e-05, %v2401_v2  ;;  %v2402_v33 = vmul.f32 0.03125, %v2366_v11 }
 0xb10   :  { %v2369_v31 = vpop.xlane.xlu0 %2368 }
 0xb11   :  { %5483 = vrsqrt.f32 %v2417_v4  ;;  %v2418_v7 = vadd.f32 1e-05, %v2402_v33  ;;  %v2403_v10 = vmul.f32 0.03125, %v2369_v31 }
 0xb12   :  { %v2372_v22 = vpop.xlane.xlu1 %2371 }
 0xb13   :  { %v5476_v8 = vpop.eup %5475  ;;  %5485 = vrsqrt.f32 %v2418_v7  ;;  %v2419_v15 = vadd.f32 1e-05, %v2403_v10  ;;  %v2404_v12 = vmul.f32 0.03125, %v2372_v22 }
 0xb14   :  { %v2445_v38 = vmul.f32 %v5476_v8, %v7040_v44  ;;  %v2278_v19 = vpop.xlane.xlu0 %2277 }
 0xb15   :  { %v5478_v54 = vpop.eup %5477  ;;  %5487 = vrsqrt.f32 %v2419_v15  ;;  %v2420_v3 = vadd.f32 1e-05, %v2404_v12  ;;  %v2309_v56 = vmul.f32 0.03125, %v2278_v19 }
 0xb16   :  { %v2446_v53 = vmul.f32 %v5478_v54, %v7042_v60  ;;  %v2281_v35 = vpop.xlane.xlu1 %2280  ;;  %v2465_v23 = vmul.f32 %v7138_v48, %v2445_v38 }
 0xb17   :  { %v5480_v0 = vpop.eup %5479  ;;  %5489 = vrsqrt.f32 %v2420_v3  ;;  %v7149_v16 = vsub.f32 %v7080_v36, %v2309_v56  ;;  %v2310_v44 = vmul.f32 0.03125, %v2281_v35 }
 0xb18   :  { %v2447_v61 = vmul.f32 %v5480_v0, %v7046_v58  ;;  %v2284_v39 = vpop.xlane.xlu0 %2283  ;;  %v2466_v24 = vmul.f32 %v7138_v48, %v2446_v53  ;;  %v7161_v46 = vadd.f32 %v7145_v45, %v2465_v23 }
 0xb19   :  { %v5482_v14 = vpop.eup %5481  ;;  %v7154_v60 = vsub.f32 %v7087_v21, %v2310_v44  ;;  %v2311_v29 = vmul.f32 0.03125, %v2284_v39  ;;  %v2341_v62 = vmul.f32 %v7149_v16, %v7149_v16 }
 0xb1a   :  { %v2467_v6 = vmul.f32 %v7138_v48, %v2447_v61  ;;  %v2448_v25 = vmul.f32 %v5482_v14, %v7051_v42  ;;  %v2287_v36 = vpop.xlane.xlu1 %2286  ;;  %v7164_v58 = vadd.f32 %v7145_v45, %v2466_v24 }
 0xb1b   :  { %v5484_v59 = vpop.eup %5483  ;;  %v7167_v20 = vsub.f32 %v7091_v49, %v2311_v29  ;;  %v2312_v21 = vmul.f32 0.03125, %v2287_v36  ;;  %v2373_v34 = vsel %vm439_vm2, %v2341_v62, 0.0  ;;  %v2342_v43 = vmul.f32 %v7154_v60, %v7154_v60 }
 0xb1c   :  { %v2468_v5 = vmul.f32 %v7138_v48, %v2448_v25  ;;  %v2449_v42 = vmul.f32 %v5484_v59, %v7056_v30  ;;  %2374 = vadd.xlane.f32.xlu0 %v2373_v34  ;;  %v2501_v40 = vpack.c.bf16 %v7164_v58, %v7161_v46  ;;  %v7177_v51 = vadd.f32 %v7145_v45, %v2467_v6  ;;  %v5192_v59 = vld [vmem:[%s8001_s1 + $0xac] ss:$72 sps:$4 sm:$0xff]  }
 0xb1d   :  { %v5486_v47 = vpop.eup %5485  ;;  %v7180_v49 = vsub.f32 %v7096_v52, %v2312_v21  ;;  %v2376_v55 = vsel %vm439_vm2, %v2342_v43, 0.0  ;;  %v2343_v1 = vmul.f32 %v7167_v20, %v7167_v20  ;;  %v5193_v21 = vld [vmem:[%s8001_s1 + $0x13c] ss:$72 sps:$4 sm:$0xff]   ;;  %v5194_v34 = vld [vmem:[%s8001_s1 + $0x1cc] ss:$72 sps:$4 sm:$0xff]  }
 0xb1e   :  { %v7186_v13 = vadd.f32 %v7145_v45, %v2468_v5  ;;  %v2450_v30 = vmul.f32 %v5486_v47, %v7061_v63  ;;  %2377 = vadd.xlane.f32.xlu1 %v2376_v55  ;;  %5007 = vmatprep.mubr.msk.bf16.mxu0 %vm439_vm2, %v2501_v40  ;;  %v2469_v2 = vmul.f32 %v7138_v48, %v2449_v42 }
 0xb1f   :  { %v5488_v11 = vpop.eup %5487  ;;  %v2379_v26 = vsel %vm439_vm2, %v2343_v1, 0.0  ;;  %v2344_v52 = vmul.f32 %v7180_v49, %v7180_v49 }
 0xb20   :  { %v2451_v4 = vmul.f32 %v5488_v11, %v7067_v57  ;;  %2380 = vadd.xlane.f32.xlu0 %v2379_v26  ;;  %v2502_v33 = vpack.c.bf16 %v7186_v13, %v7177_v51  ;;  %v2470_v31 = vmul.f32 %v7138_v48, %v2450_v30  ;;  %v7200_v10 = vadd.f32 %v7145_v45, %v2469_v2 }
 0xb21   :  { %v5490_v63 = vpop.eup %5489  ;;  %v2382_v7 = vsel %vm439_vm2, %v2344_v52, 0.0 }
 0xb22   :  { %v2452_v22 = vmul.f32 %v5490_v63, %v7073_v50  ;;  %2383 = vadd.xlane.f32.xlu1 %v2382_v7  ;;  %5008 = vmatmul.mubr.msk.bf16.vlgmr.msra.gmra.mrb[64].mxu0 %vm439_vm2, %v2502_v33  ;;  %v7205_v8 = vadd.f32 %v7145_v45, %v2470_v31  ;;  %v2471_v57 = vmul.f32 %v7138_v48, %v2451_v4 }
 0xb24   :  { %v2503_v15 = vpack.c.bf16 %v7205_v8, %v7200_v10  ;;  %v2472_v12 = vmul.f32 %v7138_v48, %v2452_v22  ;;  %v7213_v38 = vadd.f32 %v7145_v45, %v2471_v57 }
 0xb26   :  { %5011 = vmatprep.mubr.msk.bf16.mxu0 %vm439_vm2, %v2503_v15  ;;  %v7216_v50 = vadd.f32 %v7145_v45, %v2472_v12 }
 0xb28   :  { %v2504_v19 = vpack.c.bf16 %v7216_v50, %v7213_v38 }
 0xb2a   :  { %5012 = vmatmul.mubr.msk.bf16.gmra.mrb[68].mxu0 %vm439_vm2, %v2504_v19 }
 0xb42   :  { %v2290_v54 = vpop.xlane.xlu0 %2289 }
 0xb43   :  { %v2313_v3 = vmul.f32 0.03125, %v2290_v54 }
 0xb44   :  { %v2293_v56 = vpop.xlane.xlu1 %2292 }
 0xb45   :  { %v7222_v53 = vsub.f32 %v7111_v9, %v2313_v3  ;;  %v2314_v35 = vmul.f32 0.03125, %v2293_v56 }
 0xb46   :  { %v2296_v23 = vpop.xlane.xlu0 %2295 }
 0xb47   :  { %v7225_v0 = vsub.f32 %v7119_v41, %v2314_v35  ;;  %v2315_v44 = vmul.f32 0.03125, %v2296_v23  ;;  %v2345_v61 = vmul.f32 %v7222_v53, %v7222_v53 }
 0xb48   :  { %v2299_v39 = vpop.xlane.xlu1 %2298 }
 0xb49   :  { %v7230_v24 = vsub.f32 %v7116_v18, %v2315_v44  ;;  %v2316_v14 = vmul.f32 0.03125, %v2299_v39  ;;  %v2385_v29 = vsel %vm439_vm2, %v2345_v61, 0.0  ;;  %v2346_v9 = vmul.f32 %v7225_v0, %v7225_v0 }
 0xb4a   :  { %2386 = vadd.xlane.f32.xlu0 %v2385_v29 }
 0xb4b   :  { %v7236_v62 = vsub.f32 %v7124_v37, %v2316_v14  ;;  %v2388_v41 = vsel %vm439_vm2, %v2346_v9, 0.0  ;;  %v2347_v6 = vmul.f32 %v7230_v24, %v7230_v24  ;;  %v5191_v37 = vld [vmem:[%s8001_s1 + $0x1c] ss:$72 sps:$4 sm:$0xff]  }
 0xb4c   :  { %2389 = vadd.xlane.f32.xlu1 %v2388_v41  ;;  %5023 = vmatprep.subr.bf16.mxu1 %v5191_v37 }
 0xb4d   :  { %v2391_v25 = vsel %vm439_vm2, %v2347_v6, 0.0  ;;  %v2348_v18 = vmul.f32 %v7236_v62, %v7236_v62  ;;  %5024 = vmatpush3.bf16.msra.mxu1 %v5191_v37 }
 0xb4e   :  { %2392 = vadd.xlane.f32.xlu0 %v2391_v25  ;;  %5025 = vmatprep.subr.bf16.mxu1 %v5192_v59 }
 0xb4f   :  { %v2394_v36 = vsel %vm439_vm2, %v2348_v18, 0.0 }
 0xb50   :  { %2395 = vadd.xlane.f32.xlu1 %v2394_v36 }
 0xb51   :  { %5026 = vmatpush3.bf16.msra.mxu1 %v5192_v59 }
 0xb52   :  { %5027 = vmatprep.subr.bf16.mxu1 %v5193_v21 }
 0xb55   :  { %5028 = vmatpush3.bf16.msra.mxu1 %v5193_v21 }
 0xb56   :  { %5029 = vmatprep.subr.bf16.mxu1 %v5194_v34 }
 0xb59   :  { %5030 = vmatpush3.bf16.msra.mxu1 %v5194_v34 }
 0xba9   :  { %v2375_v43 = vpop.xlane.xlu0 %2374 }
 0xbaa   :  { %v2405_v5 = vmul.f32 0.03125, %v2375_v43 }
 0xbab   :  { %v2378_v42 = vpop.xlane.xlu1 %2377 }
 0xbac   :  { %v2421_v40 = vadd.f32 1e-05, %v2405_v5  ;;  %v2406_v47 = vmul.f32 0.03125, %v2378_v42 }
 0xbad   :  { %v2381_v55 = vpop.xlane.xlu0 %2380 }
 0xbae   :  { %5491 = vrsqrt.f32 %v2421_v40  ;;  %v2422_v1 = vadd.f32 1e-05, %v2406_v47  ;;  %v2407_v30 = vmul.f32 0.03125, %v2381_v55 }
 0xbaf   :  { %v2384_v2 = vpop.xlane.xlu1 %2383 }
 0xbb0   :  { %5493 = vrsqrt.f32 %v2422_v1  ;;  %v2423_v11 = vadd.f32 1e-05, %v2407_v30  ;;  %v2408_v26 = vmul.f32 0.03125, %v2384_v2 }
 0xbb2   :  { %5495 = vrsqrt.f32 %v2423_v11  ;;  %v2424_v52 = vadd.f32 1e-05, %v2408_v26  ;;  %v2513_v11 = vld [vmem:[%s8003_s2 + $0x20] ss:$0 sm:$0xff] }
 0xbb4   :  { %5497 = vrsqrt.f32 %v2424_v52 }
 0xbb8   :  { %v5492_v4 = vpop.eup %5491 }
 0xbb9   :  { %v2453_v33 = vmul.f32 %v5492_v4, %v7149_v16 }
 0xbba   :  { %v5494_v31 = vpop.eup %5493 }
 0xbbb   :  { %v2454_v63 = vmul.f32 %v5494_v31, %v7154_v60  ;;  %v2473_v7 = vmul.f32 %v7138_v48, %v2453_v33 }
 0xbbc   :  { %v5496_v22 = vpop.eup %5495 }
 0xbbd   :  { %v2455_v57 = vmul.f32 %v5496_v22, %v7167_v20  ;;  %v2474_v15 = vmul.f32 %v7138_v48, %v2454_v63  ;;  %v7264_v54 = vadd.f32 %v7145_v45, %v2473_v7 }
 0xbbe   :  { %v5498_v12 = vpop.eup %5497 }
 0xbbf   :  { %v2456_v19 = vmul.f32 %v5498_v12, %v7180_v49  ;;  %v7267_v3 = vadd.f32 %v7145_v45, %v2474_v15  ;;  %v2475_v16 = vmul.f32 %v7138_v48, %v2455_v57 }
 0xbc1   :  { %v2505_v60 = vpack.c.bf16 %v7267_v3, %v7264_v54  ;;  %v2476_v56 = vmul.f32 %v7138_v48, %v2456_v19  ;;  %v7275_v20 = vadd.f32 %v7145_v45, %v2475_v16 }
 0xbc3   :  { %5015 = vmatprep.mubr.msk.bf16.mxu0 %vm439_vm2, %v2505_v60  ;;  %v7278_v49 = vadd.f32 %v7145_v45, %v2476_v56 }
 0xbc5   :  { %v2506_v35 = vpack.c.bf16 %v7278_v49, %v7275_v20 }
 0xbc7   :  { %5016 = vmatmul.mubr.msk.bf16.gmra.mrb[72].mxu0 %vm439_vm2, %v2506_v35 }
 0xbd7   :  { %v2387_v23 = vpop.xlane.xlu0 %2386 }
 0xbd8   :  { %v2409_v44 = vmul.f32 0.03125, %v2387_v23 }
 0xbd9   :  { %v2390_v61 = vpop.xlane.xlu1 %2389 }
 0xbda   :  { %v2425_v39 = vadd.f32 1e-05, %v2409_v44  ;;  %v2410_v14 = vmul.f32 0.03125, %v2390_v61 }
 0xbdb   :  { %v2393_v29 = vpop.xlane.xlu0 %2392 }
 0xbdc   :  { %5499 = vrsqrt.f32 %v2425_v39  ;;  %v2426_v9 = vadd.f32 1e-05, %v2410_v14  ;;  %v2411_v41 = vmul.f32 0.03125, %v2393_v29 }
 0xbdd   :  { %v2396_v6 = vpop.xlane.xlu1 %2395 }
 0xbde   :  { %5501 = vrsqrt.f32 %v2426_v9  ;;  %v2427_v25 = vadd.f32 1e-05, %v2411_v41  ;;  %v2412_v18 = vmul.f32 0.03125, %v2396_v6 }
 0xbe0   :  { %5503 = vrsqrt.f32 %v2427_v25  ;;  %v2428_v36 = vadd.f32 1e-05, %v2412_v18 }
 0xbe2   :  { %5505 = vrsqrt.f32 %v2428_v36 }
 0xbe6   :  { %v5500_v37 = vpop.eup %5499 }
 0xbe7   :  { %v2457_v59 = vmul.f32 %v5500_v37, %v7222_v53 }
 0xbe8   :  { %v5502_v21 = vpop.eup %5501 }
 0xbe9   :  { %v2458_v34 = vmul.f32 %v5502_v21, %v7225_v0  ;;  %v2477_v43 = vmul.f32 %v7138_v48, %v2457_v59 }
 0xbea   :  { %v5504_v5 = vpop.eup %5503 }
 0xbeb   :  { %v2459_v42 = vmul.f32 %v5504_v5, %v7230_v24  ;;  %v2478_v40 = vmul.f32 %v7138_v48, %v2458_v34  ;;  %v7290_v1 = vadd.f32 %v7145_v45, %v2477_v43 }
 0xbec   :  { %v5506_v47 = vpop.eup %5505 }
 0xbed   :  { %v2460_v55 = vmul.f32 %v5506_v47, %v7236_v62  ;;  %v7293_v30 = vadd.f32 %v7145_v45, %v2478_v40  ;;  %v2479_v53 = vmul.f32 %v7138_v48, %v2459_v42 }
 0xbef   :  { %v2507_v0 = vpack.c.bf16 %v7293_v30, %v7290_v1  ;;  %v2480_v2 = vmul.f32 %v7138_v48, %v2460_v55  ;;  %v7301_v24 = vadd.f32 %v7145_v45, %v2479_v53 }
 0xbf1   :  { %5019 = vmatprep.mubr.msk.bf16.mxu0 %vm439_vm2, %v2507_v0  ;;  %v7304_v62 = vadd.f32 %v7145_v45, %v2480_v2 }
 0xbf3   :  { %v2508_v26 = vpack.c.bf16 %v7304_v62, %v7301_v24 }
 0xbf5   :  { %v5009_v52 = vpop.f32.mrb[64].mxu0  ;;  %5020 = vmatmul.mubr.msk.bf16.gmra.mrb[76].mxu0 %vm439_vm2, %v2508_v26 }
 0xbf6   :  { %v2593_v4 = vadd.f32 %v5009_v52, %v2513_v11  ;;  %v2584_v48 = vpop.f32.mrb[65].mxu0  ;;  %5051 = vmatprep.mubr.msk.bf16.mxu0 %vm5603_vm15, %v8088_v27 }
 0xbf7   :  { %v2585_v33 = vadd.f32 %v2584_v48, %v2513_v11  ;;  %v5010_v31 = vpop.f32.mrb[66].mxu0 }
 0xbf8   :  { %v2596_v63 = vadd.f32 %v5010_v31, %v2513_v11  ;;  %v2587_v7 = vpop.f32.mrb[67].mxu0  ;;  %v2649_v57 = vmax.f32 %v2593_v4, 0.0 }
 0xbf9   :  { %v2588_v22 = vadd.f32 %v2587_v7, %v2513_v11  ;;  %v2647_v15 = vmax.f32 %v2585_v33, 0.0 }
 0xbfa   :  { %v2650_v45 = vmax.f32 %v2596_v63, 0.0 }
 0xbfb   :  { %v2648_v12 = vmax.f32 %v2588_v22, 0.0 }
 0xbfc   :  { %v2664_v19 = vpack.c.bf16 %v2650_v45, %v2649_v57 }
 0xbfd   :  { %v2663_v16 = vpack.c.bf16 %v2648_v12, %v2647_v15  ;;  %v5013_v60 = vpop.f32.mrb[68].mxu0 }
 0xbfe   :  { %v2609_v56 = vadd.f32 %v5013_v60, %v2513_v11  ;;  %v2600_v35 = vpop.f32.mrb[69].mxu0 }
 0xbff   :  { %v2601_v23 = vadd.f32 %v2600_v35, %v2513_v11  ;;  %v5014_v44 = vpop.f32.mrb[70].mxu0  ;;  %5031 = vmatprep.mubr.msk.bf16.mxu1 %vm900_vm14, %v2663_v16  ;;  %v7322_v16 = vld [vmem:[%s8003_s2 + $0x21] ss:$0 sm:$0xff] }
 0xc00   :  { %v2612_v61 = vadd.f32 %v5014_v44, %v2513_v11  ;;  %v2603_v39 = vpop.f32.mrb[71].mxu0  ;;  %5032 = vmatmul.mubr.msk.bf16.vlgmr.msra.gmra.mrb[96].mxu1 %vm900_vm14, %v2664_v19  ;;  %v2653_v29 = vmax.f32 %v2609_v56, 0.0 }
 0xc01   :  { %v2604_v14 = vadd.f32 %v2603_v39, %v2513_v11  ;;  %v2651_v41 = vmax.f32 %v2601_v23, 0.0 }
 0xc02   :  { %v2654_v9 = vmax.f32 %v2612_v61, 0.0 }
 0xc03   :  { %v2652_v6 = vmax.f32 %v2604_v14, 0.0 }
 0xc04   :  { %v2666_v25 = vpack.c.bf16 %v2654_v9, %v2653_v29 }
 0xc05   :  { %v2665_v18 = vpack.c.bf16 %v2652_v6, %v2651_v41 }
 0xc07   :  { %5035 = vmatprep.mubr.msk.bf16.mxu1 %vm900_vm14, %v2665_v18 }
 0xc08   :  { %5036 = vmatmul.mubr.msk.bf16.gmra.mrb[100].mxu1 %vm900_vm14, %v2666_v25 }
 0xc9a   :  { %v5017_v36 = vpop.f32.mrb[72].mxu0 }
 0xc9b   :  { %v2625_v37 = vadd.f32 %v5017_v36, %v2513_v11  ;;  %v2616_v59 = vpop.f32.mrb[73].mxu0 }
 0xc9c   :  { %v2617_v21 = vadd.f32 %v2616_v59, %v2513_v11  ;;  %v5018_v34 = vpop.f32.mrb[74].mxu0 }
 0xc9d   :  { %v2628_v43 = vadd.f32 %v5018_v34, %v2513_v11  ;;  %v2619_v5 = vpop.f32.mrb[75].mxu0  ;;  %v2657_v40 = vmax.f32 %v2625_v37, 0.0 }
 0xc9e   :  { %v2620_v42 = vadd.f32 %v2619_v5, %v2513_v11  ;;  %v2655_v55 = vmax.f32 %v2617_v21, 0.0 }
 0xc9f   :  { %v2658_v47 = vmax.f32 %v2628_v43, 0.0 }
 0xca0   :  { %v2656_v53 = vmax.f32 %v2620_v42, 0.0 }
 0xca1   :  { %v2668_v0 = vpack.c.bf16 %v2658_v47, %v2657_v40 }
 0xca2   :  { %v2667_v2 = vpack.c.bf16 %v2656_v53, %v2655_v55 }
 0xca4   :  { %5039 = vmatprep.mubr.msk.bf16.mxu1 %vm900_vm14, %v2667_v2 }
 0xca5   :  { %5040 = vmatmul.mubr.msk.bf16.gmra.mrb[104].mxu1 %vm900_vm14, %v2668_v0 }
 0xcc8   :  { %v5021_v26 = vpop.f32.mrb[76].mxu0 }
 0xcc9   :  { %v2641_v52 = vadd.f32 %v5021_v26, %v2513_v11  ;;  %v2632_v4 = vpop.f32.mrb[77].mxu0 }
 0xcca   :  { %v2633_v48 = vadd.f32 %v2632_v4, %v2513_v11  ;;  %v5022_v33 = vpop.f32.mrb[78].mxu0 }
 0xccb   :  { %v2644_v31 = vadd.f32 %v5022_v33, %v2513_v11  ;;  %v2635_v63 = vpop.f32.mrb[79].mxu0  ;;  %v2661_v22 = vmax.f32 %v2641_v52, 0.0 }
 0xccc   :  { %v2636_v7 = vadd.f32 %v2635_v63, %v2513_v11  ;;  %v2659_v45 = vmax.f32 %v2633_v48, 0.0 }
 0xccd   :  { %v2662_v57 = vmax.f32 %v2644_v31, 0.0 }
 0xcce   :  { %v2660_v15 = vmax.f32 %v2636_v7, 0.0 }
 0xccf   :  { %v2670_v12 = vpack.c.bf16 %v2662_v57, %v2661_v22 }
 0xcd0   :  { %v2669_v19 = vpack.c.bf16 %v2660_v15, %v2659_v45 }
 0xcd2   :  { %5043 = vmatprep.mubr.msk.bf16.mxu1 %vm900_vm14, %v2669_v19 }
 0xcd3   :  { %v5033_v60 = vpop.f32.mrb[96].mxu1  ;;  %5044 = vmatmul.mubr.msk.bf16.gmra.mrb[108].mxu1 %vm900_vm14, %v2670_v12 }
 0xcd4   :  { %v2762_v56 = vpop.f32.mrb[97].mxu1  ;;  %v2771_v35 = vadd.f32 %v5033_v60, %v7322_v16 }
 0xcd5   :  { %v2763_v11 = vadd.f32 %v2762_v56, %v7322_v16  ;;  %v5034_v23 = vpop.f32.mrb[98].mxu1 }
 0xcd6   :  { %v2765_v44 = vpop.f32.mrb[99].mxu1  ;;  %v2774_v39 = vadd.f32 %v5034_v23, %v7322_v16  ;;  %v2827_v29 = vadd.f32 %v2771_v35, %v7177_v51 }
 0xcd7   :  { %v2825_v61 = vadd.f32 %v2763_v11, %v7161_v46  ;;  %v2766_v14 = vadd.f32 %v2765_v44, %v7322_v16 }
 0xcd8   :  { %v2828_v6 = vadd.f32 %v2774_v39, %v7186_v13  ;;  %v2848_v21 = vsel %vm439_vm2, %v2827_v29, 0.0 }
 0xcd9   :  { %v2826_v9 = vadd.f32 %v2766_v14, %v7164_v58  ;;  %v2842_v41 = vsel %vm439_vm2, %v2825_v61, 0.0 }
 0xcda   :  { %2843 = vadd.xlane.f32.xlu0 %v2842_v41  ;;  %v2851_v43 = vsel %vm439_vm2, %v2828_v6, 0.0 }
 0xcdb   :  { %v5037_v25 = vpop.f32.mrb[100].mxu1  ;;  %v2845_v18 = vsel %vm439_vm2, %v2826_v9, 0.0 }
 0xcdc   :  { %2846 = vadd.xlane.f32.xlu1 %v2845_v18  ;;  %v2778_v36 = vpop.f32.mrb[101].mxu1  ;;  %v2787_v46 = vadd.f32 %v5037_v25, %v7322_v16 }
 0xcdd   :  { %v2779_v37 = vadd.f32 %v2778_v36, %v7322_v16  ;;  %v5038_v59 = vpop.f32.mrb[102].mxu1 }
 0xcde   :  { %v2781_v51 = vpop.f32.mrb[103].mxu1  ;;  %2849 = vadd.xlane.f32.xlu0 %v2848_v21  ;;  %v2790_v34 = vadd.f32 %v5038_v59, %v7322_v16  ;;  %v2831_v5 = vadd.f32 %v2787_v46, %v7213_v38  ;;  %v5195_v38 = vld [vmem:[%s8001_s1 + $0x20] ss:$72 sps:$4 sm:$0xff]  }
 0xcdf   :  { %v2829_v58 = vadd.f32 %v2779_v37, %v7200_v10  ;;  %v2782_v13 = vadd.f32 %v2781_v51, %v7322_v16  ;;  %5048 = vmatpush3.bf16.msra.mxu0 %v5195_v38 }
 0xce0   :  { %2852 = vadd.xlane.f32.xlu1 %v2851_v43  ;;  %v2832_v47 = vadd.f32 %v2790_v34, %v7216_v50  ;;  %v2860_v10 = vsel %vm439_vm2, %v2831_v5, 0.0  ;;  %5049 = vmatprep.subr.bf16.mxu0 %v8088_v27 }
 0xce1   :  { %v2830_v42 = vadd.f32 %v2782_v13, %v7205_v8  ;;  %v2854_v40 = vsel %vm439_vm2, %v2829_v58, 0.0 }
 0xce2   :  { %2855 = vadd.xlane.f32.xlu0 %v2854_v40  ;;  %v2863_v53 = vsel %vm439_vm2, %v2832_v47, 0.0 }
 0xce3   :  { %v2857_v55 = vsel %vm439_vm2, %v2830_v42, 0.0 }
 0xce4   :  { %2858 = vadd.xlane.f32.xlu1 %v2857_v55 }
 0xce6   :  { %2861 = vadd.xlane.f32.xlu0 %v2860_v10 }
 0xce8   :  { %2864 = vadd.xlane.f32.xlu1 %v2863_v53 }
 0xd67   :  { %v2844_v8 = vpop.xlane.xlu0 %2843 }
 0xd68   :  { %v2890_v0 = vmul.f32 0.03125, %v2844_v8 }
 0xd69   :  { %v2847_v2 = vpop.xlane.xlu1 %2846 }
 0xd6a   :  { %v7353_v50 = vsub.f32 %v2825_v61, %v2890_v0  ;;  %v2891_v26 = vmul.f32 0.03125, %v2847_v2 }
 0xd6b   :  { %v2850_v52 = vpop.xlane.xlu0 %2849 }
 0xd6c   :  { %v7355_v4 = vsub.f32 %v2826_v9, %v2891_v26  ;;  %v2892_v48 = vmul.f32 0.03125, %v2850_v52  ;;  %v2922_v33 = vmul.f32 %v7353_v50, %v7353_v50  ;;  %v3091_v26 = vld [vmem:[%s8003_s2] sm:$0xff] }
 0xd6d   :  { %v2853_v31 = vpop.xlane.xlu1 %2852 }
 0xd6e   :  { %v7359_v63 = vsub.f32 %v2827_v29, %v2892_v48  ;;  %v2893_v7 = vmul.f32 0.03125, %v2853_v31  ;;  %v2938_v22 = vsel %vm439_vm2, %v2922_v33, 0.0  ;;  %v2923_v57 = vmul.f32 %v7355_v4, %v7355_v4  ;;  %v5197_v33 = vld [vmem:[%s8001_s1 + $0x28] ss:$72 sps:$4 sm:$0xff]   ;;  %v5198_v31 = vld [vmem:[%s8001_s1 + $0x24] ss:$72 sps:$4 sm:$0xff]  }
 0xd6f   :  { %2939 = vadd.xlane.f32.xlu0 %v2938_v22  ;;  %v2856_v45 = vpop.xlane.xlu0 %2855  ;;  %5075 = vmatprep.subr.bf16.mxu1 %v5197_v33  ;;  %v5200_v22 = vld [vmem:[%s8001_s1 + $0xb4] ss:$72 sps:$4 sm:$0xff]  }
 0xd70   :  { %v7364_v15 = vsub.f32 %v2828_v6, %v2893_v7  ;;  %v2894_v12 = vmul.f32 0.03125, %v2856_v45  ;;  %v2941_v19 = vsel %vm439_vm2, %v2923_v57, 0.0  ;;  %v2924_v60 = vmul.f32 %v7359_v63, %v7359_v63  ;;  %5076 = vmatpush3.bf16.msra.mxu1 %v5197_v33  ;;  %v5199_v7 = vld [vmem:[%s8001_s1 + $0xb8] ss:$72 sps:$4 sm:$0xff]  }
 0xd71   :  { %2942 = vadd.xlane.f32.xlu1 %v2941_v19  ;;  %v2859_v56 = vpop.xlane.xlu1 %2858  ;;  %5077 = vmatprep.subr.bf16.mxu1 %v5199_v7 }
 0xd72   :  { %v7369_v35 = vsub.f32 %v2829_v58, %v2894_v12  ;;  %v2895_v11 = vmul.f32 0.03125, %v2859_v56  ;;  %v2944_v23 = vsel %vm439_vm2, %v2924_v60, 0.0  ;;  %v2925_v44 = vmul.f32 %v7364_v15, %v7364_v15 }
 0xd73   :  { %2945 = vadd.xlane.f32.xlu0 %v2944_v23  ;;  %v2862_v61 = vpop.xlane.xlu0 %2861 }
 0xd74   :  { %v7374_v39 = vsub.f32 %v2830_v42, %v2895_v11  ;;  %v2896_v14 = vmul.f32 0.03125, %v2862_v61  ;;  %v2947_v29 = vsel %vm439_vm2, %v2925_v44, 0.0  ;;  %v2926_v9 = vmul.f32 %v7369_v35, %v7369_v35  ;;  %5078 = vmatpush3.bf16.msra.mxu1 %v5199_v7 }
 0xd75   :  { %2948 = vadd.xlane.f32.xlu1 %v2947_v29  ;;  %v2865_v41 = vpop.xlane.xlu1 %2864 }
 0xd76   :  { %v7379_v6 = vsub.f32 %v2831_v5, %v2896_v14  ;;  %v2897_v25 = vmul.f32 0.03125, %v2865_v41  ;;  %v2950_v18 = vsel %vm439_vm2, %v2926_v9, 0.0  ;;  %v2927_v36 = vmul.f32 %v7374_v39, %v7374_v39 }
 0xd77   :  { %2951 = vadd.xlane.f32.xlu0 %v2950_v18 }
 0xd78   :  { %v7384_v46 = vsub.f32 %v2832_v47, %v2897_v25  ;;  %v5041_v37 = vpop.f32.mrb[104].mxu1  ;;  %v2953_v59 = vsel %vm439_vm2, %v2927_v36, 0.0  ;;  %v2928_v21 = vmul.f32 %v7379_v6, %v7379_v6 }
 0xd79   :  { %2954 = vadd.xlane.f32.xlu1 %v2953_v59  ;;  %v2794_v51 = vpop.f32.mrb[105].mxu1  ;;  %v2803_v58 = vadd.f32 %v5041_v37, %v7322_v16 }
 0xd7a   :  { %v2795_v34 = vadd.f32 %v2794_v51, %v7322_v16  ;;  %v5042_v13 = vpop.f32.mrb[106].mxu1  ;;  %v2956_v43 = vsel %vm439_vm2, %v2928_v21, 0.0  ;;  %v2929_v5 = vmul.f32 %v7384_v46, %v7384_v46 }
 0xd7b   :  { %v2797_v42 = vpop.f32.mrb[107].mxu1  ;;  %2957 = vadd.xlane.f32.xlu0 %v2956_v43  ;;  %v2806_v47 = vadd.f32 %v5042_v13, %v7322_v16  ;;  %v7401_v53 = vadd.f32 %v2803_v58, %v7275_v20 }
 0xd7c   :  { %v7395_v40 = vadd.f32 %v2795_v34, %v7264_v54  ;;  %v2798_v55 = vadd.f32 %v2797_v42, %v7322_v16  ;;  %v2959_v10 = vsel %vm439_vm2, %v2929_v5, 0.0  ;;  %v3052_v5 = vsub.s32 2, %v8093_v17 }
 0xd7d   :  { %2960 = vadd.xlane.f32.xlu1 %v2959_v10  ;;  %v7409_v54 = vadd.f32 %v2806_v47, %v7278_v49  ;;  %v2872_v2 = vsel %vm439_vm2, %v7401_v53, 0.0  ;;  %v3090_v49 = vld [vmem:[%s8003_s2 + $0x10] ss:$0 sm:$0xff]  ;;  %v2841_v47 = vld [vmem:[%s8003_s2 + $0x20] sm:$0xc] }
 0xd7e   :  { %v7404_v38 = vadd.f32 %v2798_v55, %v7267_v3  ;;  %v2866_v8 = vsel %vm439_vm2, %v7395_v40, 0.0  ;;  %v5196_v3 = vld [vmem:[%s8001_s1 + $0xb0] ss:$72 sps:$4 sm:$0xff]   ;;  %v3092_v52 = vadd.f32 %v3091_v26, %v3090_v49 }
 0xd7f   :  { %2867 = vadd.xlane.f32.xlu0 %v2866_v8  ;;  %v2875_v20 = vsel %vm439_vm2, %v7409_v54, 0.0  ;;  %5050 = vmatpush3.bf16.msra.mxu0 %v5196_v3  ;;  %v3072_v8 = vsub.s32 3, %v8093_v17  ;;  %v7470_v3 = vrot.slane %v2841_v47, %v3052_v5 }
 0xd80   :  { %v2869_v0 = vsel %vm439_vm2, %v7404_v38, 0.0  ;;  %v3093_v48 = vpack.c.bf16 %v3092_v52, %v3092_v52  ;;  %5055 = vmatprep.subr.bf16.mxu0 %v5198_v31 }
 0xd81   :  { %2870 = vadd.xlane.f32.xlu1 %v2869_v0 }
 0xd82   :  { %5052 = vmatmul.mubr.msk.bf16.vlgmr.msra.gmra.mrb[80].mxu0 %vm439_vm2, %v3093_v48 }
 0xd83   :  { %2873 = vadd.xlane.f32.xlu0 %v2872_v2  ;;  %5056 = vmatpush3.bf16.msra.mxu0 %v5198_v31  ;;  %v7473_v31 = vrot.slane %v2841_v47, %v3072_v8 }
 0xd84   :  { %5057 = vmatprep.subr.bf16.mxu0 %v5200_v22 }
 0xd85   :  { %2876 = vadd.xlane.f32.xlu1 %v2875_v20 }
 0xd87   :  { %5058 = vmatpush3.bf16.msra.mxu0 %v5200_v22 }
 0xda6   :  { %v5045_v57 = vpop.f32.mrb[108].mxu1 }
 0xda7   :  { %v2810_v45 = vpop.f32.mrb[109].mxu1  ;;  %v2819_v12 = vadd.f32 %v5045_v57, %v7322_v16 }
 0xda8   :  { %v2811_v19 = vadd.f32 %v2810_v45, %v7322_v16  ;;  %v5046_v60 = vpop.f32.mrb[110].mxu1 }
 0xda9   :  { %v2813_v56 = vpop.f32.mrb[111].mxu1  ;;  %v2822_v23 = vadd.f32 %v5046_v60, %v7322_v16  ;;  %v7449_v61 = vadd.f32 %v2819_v12, %v7301_v24 }
 0xdaa   :  { %v7444_v11 = vadd.f32 %v2811_v19, %v7290_v1  ;;  %v2814_v44 = vadd.f32 %v2813_v56, %v7322_v16 }
 0xdab   :  { %v7457_v9 = vadd.f32 %v2822_v23, %v7304_v62  ;;  %v2884_v16 = vsel %vm439_vm2, %v7449_v61, 0.0 }
 0xdac   :  { %v7452_v14 = vadd.f32 %v2814_v44, %v7293_v30  ;;  %v2878_v29 = vsel %vm439_vm2, %v7444_v11, 0.0 }
 0xdad   :  { %2879 = vadd.xlane.f32.xlu0 %v2878_v29  ;;  %v2887_v24 = vsel %vm439_vm2, %v7457_v9, 0.0 }
 0xdae   :  { %v2881_v1 = vsel %vm439_vm2, %v7452_v14, 0.0 }
 0xdaf   :  { %2882 = vadd.xlane.f32.xlu1 %v2881_v1 }
 0xdb1   :  { %2885 = vadd.xlane.f32.xlu0 %v2884_v16 }
 0xdb3   :  { %2888 = vadd.xlane.f32.xlu1 %v2887_v24 }
 0xdfc   :  { %v2940_v30 = vpop.xlane.xlu0 %2939 }
 0xdfd   :  { %v2986_v41 = vmul.f32 0.03125, %v2940_v30 }
 0xdfe   :  { %v2943_v25 = vpop.xlane.xlu1 %2942 }
 0xdff   :  { %v3002_v18 = vadd.f32 1e-05, %v2986_v41  ;;  %v2987_v36 = vmul.f32 0.03125, %v2943_v25 }
 0xe00   :  { %v2946_v37 = vpop.xlane.xlu0 %2945 }
 0xe01   :  { %5507 = vrsqrt.f32 %v3002_v18  ;;  %v3003_v62 = vadd.f32 1e-05, %v2987_v36  ;;  %v2988_v59 = vmul.f32 0.03125, %v2946_v37  ;;  %v7494_v36 = vld [vmem:[%s8004_s3] sm:$0xff] }
 0xe02   :  { %v2949_v21 = vpop.xlane.xlu1 %2948 }
 0xe03   :  { %5509 = vrsqrt.f32 %v3003_v62  ;;  %v3004_v51 = vadd.f32 1e-05, %v2988_v59  ;;  %v2989_v58 = vmul.f32 0.03125, %v2949_v21 }
 0xe04   :  { %v2952_v34 = vpop.xlane.xlu0 %2951 }
 0xe05   :  { %5511 = vrsqrt.f32 %v3004_v51  ;;  %v3005_v13 = vadd.f32 1e-05, %v2989_v58  ;;  %v2990_v43 = vmul.f32 0.03125, %v2952_v34 }
 0xe06   :  { %v2955_v42 = vpop.xlane.xlu1 %2954 }
 0xe07   :  { %5513 = vrsqrt.f32 %v3005_v13  ;;  %v3006_v55 = vadd.f32 1e-05, %v2990_v43  ;;  %v2991_v10 = vmul.f32 0.03125, %v2955_v42  ;;  %v7513_v42 = vld [vmem:[%s8004_s3 + $0x8] sm:$0xff] }
 0xe08   :  { %v2958_v0 = vpop.xlane.xlu0 %2957 }
 0xe09   :  { %5515 = vrsqrt.f32 %v3006_v55  ;;  %v3007_v2 = vadd.f32 1e-05, %v2991_v10  ;;  %v2992_v20 = vmul.f32 0.03125, %v2958_v0 }
 0xe0a   :  { %v2961_v49 = vpop.xlane.xlu1 %2960 }
 0xe0b   :  { %v5508_v26 = vpop.eup %5507  ;;  %5517 = vrsqrt.f32 %v3007_v2  ;;  %v3008_v52 = vadd.f32 1e-05, %v2992_v20  ;;  %v2993_v48 = vmul.f32 0.03125, %v2961_v49 }
 0xe0c   :  { %v3034_v33 = vmul.f32 %v5508_v26, %v7353_v50  ;;  %v2868_v7 = vpop.xlane.xlu0 %2867 }
 0xe0d   :  { %v5510_v22 = vpop.eup %5509  ;;  %5519 = vrsqrt.f32 %v3008_v52  ;;  %v3009_v57 = vadd.f32 1e-05, %v2993_v48  ;;  %v2898_v45 = vmul.f32 0.03125, %v2868_v7  ;;  %v7535_v48 = vld [vmem:[%s8004_s3 + $0x18] sm:$0xff] }
 0xe0e   :  { %v3035_v12 = vmul.f32 %v5510_v22, %v7355_v4  ;;  %v2871_v19 = vpop.xlane.xlu1 %2870  ;;  %v3054_v60 = vmul.f32 %v7470_v3, %v3034_v33 }
 0xe0f   :  { %v5512_v56 = vpop.eup %5511  ;;  %5521 = vrsqrt.f32 %v3009_v57  ;;  %v7478_v23 = vsub.f32 %v7395_v40, %v2898_v45  ;;  %v2899_v44 = vmul.f32 0.03125, %v2871_v19 }
 0xe10   :  { %v3036_v50 = vmul.f32 %v5512_v56, %v7359_v63  ;;  %v2874_v29 = vpop.xlane.xlu0 %2873  ;;  %v3055_v1 = vmul.f32 %v7470_v3, %v3035_v12  ;;  %v3074_v16 = vadd.f32 %v7473_v31, %v3054_v60 }
 0xe11   :  { %v5514_v24 = vpop.eup %5513  ;;  %v7484_v30 = vsub.f32 %v7404_v38, %v2899_v44  ;;  %v2900_v4 = vmul.f32 0.03125, %v2874_v29  ;;  %v2930_v41 = vmul.f32 %v7478_v23, %v7478_v23  ;;  %v7550_v44 = vld [vmem:[%s8004_s3 + $0x20] sm:$0xff] }
 0xe12   :  { %v3056_v25 = vmul.f32 %v7470_v3, %v3036_v50  ;;  %v3037_v40 = vmul.f32 %v5514_v24, %v7364_v15  ;;  %v2877_v18 = vpop.xlane.xlu1 %2876  ;;  %v3075_v63 = vadd.f32 %v7473_v31, %v3055_v1  ;;  %v3154_v37 = vadd.f32 %v7494_v36, %v3074_v16 }
 0xe13   :  { %v5516_v38 = vpop.eup %5515  ;;  %v7498_v62 = vsub.f32 %v7401_v53, %v2900_v4  ;;  %v2901_v59 = vmul.f32 0.03125, %v2877_v18  ;;  %v2962_v21 = vsel %vm439_vm2, %v2930_v41, 0.0  ;;  %v2931_v15 = vmul.f32 %v7484_v30, %v7484_v30  ;;  %v7573_v18 = vld [vmem:[%s8004_s3 + $0x38] sm:$0xff] }
 0xe14   :  { %v3076_v51 = vadd.f32 %v7473_v31, %v3056_v25  ;;  %v3057_v58 = vmul.f32 %v7470_v3, %v3037_v40  ;;  %v3038_v34 = vmul.f32 %v5516_v38, %v7369_v35  ;;  %2963 = vadd.xlane.f32.xlu0 %v2962_v21  ;;  %v3316_v13 = vpack.c.bf16 %v3075_v63, %v3074_v16  ;;  %v7567_v25 = vld [vmem:[%s8004_s3 + $0x30] sm:$0xff] }
 0xe15   :  { %v5518_v43 = vpop.eup %5517  ;;  %v7507_v5 = vsub.f32 %v7409_v54, %v2901_v59  ;;  %v2965_v53 = vsel %vm439_vm2, %v2931_v15, 0.0  ;;  %v3155_v47 = vadd.f32 %v7513_v42, %v3075_v63  ;;  %v2932_v55 = vmul.f32 %v7498_v62, %v7498_v62  ;;  %v7524_v54 = vld [vmem:[%s8004_s3 + $0x10] sm:$0xff] }
 0xe16   :  { %v3077_v35 = vadd.f32 %v7473_v31, %v3057_v58  ;;  %v3039_v10 = vmul.f32 %v5518_v43, %v7374_v39  ;;  %2966 = vadd.xlane.f32.xlu1 %v2965_v53  ;;  %5079 = vmatprep.mubr.msk.bf16.mxu1 %vm439_vm2, %v3316_v13  ;;  %v3156_v8 = vadd.f32 %v7524_v54, %v3076_v51 }
 0xe17   :  { %v5520_v0 = vpop.eup %5519  ;;  %v3170_v2 = vpack.c.bf16 %v3155_v47, %v3154_v37  ;;  %v2968_v20 = vsel %vm439_vm2, %v2932_v55, 0.0  ;;  %v2933_v49 = vmul.f32 %v7507_v5, %v7507_v5  ;;  %v3058_v26 = vmul.f32 %v7470_v3, %v3038_v34 }
 0xe18   :  { %v3040_v39 = vmul.f32 %v5520_v0, %v7379_v6  ;;  %2969 = vadd.xlane.f32.xlu0 %v2968_v20  ;;  %v3317_v52 = vpack.c.bf16 %v3077_v35, %v3076_v51  ;;  %v3157_v33 = vadd.f32 %v7535_v48, %v3077_v35  ;;  %v3059_v7 = vmul.f32 %v7470_v3, %v3039_v10 }
 0xe19   :  { %v5522_v22 = vpop.eup %5521  ;;  %5059 = vmatprep.mubr.msk.bf16.mxu0 %vm439_vm2, %v3170_v2  ;;  %v2971_v57 = vsel %vm439_vm2, %v2933_v49, 0.0  ;;  %v3078_v45 = vadd.f32 %v7473_v31, %v3058_v26 }
 0xe1a   :  { %v3041_v6 = vmul.f32 %v5522_v22, %v7384_v46  ;;  %2972 = vadd.xlane.f32.xlu1 %v2971_v57  ;;  %5080 = vmatmul.mubr.msk.bf16.vlgmr.msra.gmra.mrb[112].mxu1 %vm439_vm2, %v3317_v52  ;;  %v3171_v12 = vpack.c.bf16 %v3157_v33, %v3156_v8  ;;  %v3079_v19 = vadd.f32 %v7473_v31, %v3059_v7  ;;  %v7556_v46 = vld [vmem:[%s8004_s3 + $0x28] sm:$0xff] }
 0xe1b   :  { %v3060_v60 = vmul.f32 %v7470_v3, %v3040_v39  ;;  %v3158_v50 = vadd.f32 %v7550_v44, %v3078_v45 }
 0xe1c   :  { %5060 = vmatmul.mubr.msk.bf16.vlgmr.msra.gmra.mrb[84].mxu0 %vm439_vm2, %v3171_v12  ;;  %v3318_v56 = vpack.c.bf16 %v3079_v19, %v3078_v45  ;;  %v3159_v29 = vadd.f32 %v7556_v46, %v3079_v19  ;;  %v3061_v1 = vmul.f32 %v7470_v3, %v3041_v6 }
 0xe1d   :  { %v3080_v16 = vadd.f32 %v7473_v31, %v3060_v60 }
 0xe1e   :  { %5083 = vmatprep.mubr.msk.bf16.mxu1 %vm439_vm2, %v3318_v56  ;;  %v3172_v24 = vpack.c.bf16 %v3159_v29, %v3158_v50  ;;  %v3081_v4 = vadd.f32 %v7473_v31, %v3061_v1 }
 0xe1f   :  { %v3160_v40 = vadd.f32 %v7567_v25, %v3080_v16 }
 0xe20   :  { %5063 = vmatprep.mubr.msk.bf16.mxu0 %vm439_vm2, %v3172_v24  ;;  %v3319_v41 = vpack.c.bf16 %v3081_v4, %v3080_v16  ;;  %v3161_v63 = vadd.f32 %v7573_v18, %v3081_v4 }
 0xe22   :  { %5084 = vmatmul.mubr.msk.bf16.gmra.mrb[116].mxu1 %vm439_vm2, %v3319_v41  ;;  %v3173_v37 = vpack.c.bf16 %v3161_v63, %v3160_v40 }
 0xe24   :  { %5064 = vmatmul.mubr.msk.bf16.gmra.mrb[88].mxu0 %vm439_vm2, %v3173_v37 }
 0xe3a   :  { %v2880_v38 = vpop.xlane.xlu0 %2879 }
 0xe3b   :  { %v2902_v59 = vmul.f32 0.03125, %v2880_v38 }
 0xe3c   :  { %v2883_v21 = vpop.xlane.xlu1 %2882 }
 0xe3d   :  { %v7579_v15 = vsub.f32 %v7444_v11, %v2902_v59  ;;  %v2903_v51 = vmul.f32 0.03125, %v2883_v21 }
 0xe3e   :  { %v2886_v58 = vpop.xlane.xlu0 %2885 }
 0xe3f   :  { %v7582_v34 = vsub.f32 %v7452_v14, %v2903_v51  ;;  %v2904_v13 = vmul.f32 0.03125, %v2886_v58  ;;  %v2934_v43 = vmul.f32 %v7579_v15, %v7579_v15 }
 0xe40   :  { %v2889_v53 = vpop.xlane.xlu1 %2888 }
 0xe41   :  { %v7587_v47 = vsub.f32 %v7449_v61, %v2904_v13  ;;  %v2905_v55 = vmul.f32 0.03125, %v2889_v53  ;;  %v2974_v35 = vsel %vm439_vm2, %v2934_v43, 0.0  ;;  %v2935_v11 = vmul.f32 %v7582_v34, %v7582_v34 }
 0xe42   :  { %2975 = vadd.xlane.f32.xlu0 %v2974_v35 }
 0xe43   :  { %v7593_v10 = vsub.f32 %v7457_v9, %v2905_v55  ;;  %v2977_v14 = vsel %vm439_vm2, %v2935_v11, 0.0  ;;  %v2936_v8 = vmul.f32 %v7587_v47, %v7587_v47 }
 0xe44   :  { %2978 = vadd.xlane.f32.xlu1 %v2977_v14 }
 0xe45   :  { %v2980_v0 = vsel %vm439_vm2, %v2936_v8, 0.0  ;;  %v2937_v61 = vmul.f32 %v7593_v10, %v7593_v10 }
 0xe46   :  { %2981 = vadd.xlane.f32.xlu0 %v2980_v0 }
 0xe47   :  { %v2983_v2 = vsel %vm439_vm2, %v2937_v61, 0.0 }
 0xe48   :  { %2984 = vadd.xlane.f32.xlu1 %v2983_v2 }
 0xe55   :  { %v7602_v20 = vpop.f32.mrb[80].mxu0 }
 0xe56   :  { %v5053_v49 = vpop.f32.mrb[81].mxu0 }
 0xe57   :  { %v3151_v9 = vpop.f32.mrb[82].mxu0 }
 0xe58   :  { %v5054_v26 = vpop.f32.mrb[83].mxu0 }
 0xea1   :  { %v2964_v39 = vpop.xlane.xlu0 %2963 }
 0xea2   :  { %v2994_v52 = vmul.f32 0.03125, %v2964_v39 }
 0xea3   :  { %v2967_v33 = vpop.xlane.xlu1 %2966 }
 0xea4   :  { %v3010_v7 = vadd.f32 1e-05, %v2994_v52  ;;  %v2995_v22 = vmul.f32 0.03125, %v2967_v33 }
 0xea5   :  { %v2970_v57 = vpop.xlane.xlu0 %2969 }
 0xea6   :  { %5523 = vrsqrt.f32 %v3010_v7  ;;  %v3011_v45 = vadd.f32 1e-05, %v2995_v22  ;;  %v2996_v6 = vmul.f32 0.03125, %v2970_v57 }
 0xea7   :  { %v2973_v12 = vpop.xlane.xlu1 %2972 }
 0xea8   :  { %5525 = vrsqrt.f32 %v3011_v45  ;;  %v3012_v19 = vadd.f32 1e-05, %v2996_v6  ;;  %v2997_v60 = vmul.f32 0.03125, %v2973_v12 }
 0xeaa   :  { %5527 = vrsqrt.f32 %v3012_v19  ;;  %v3013_v56 = vadd.f32 1e-05, %v2997_v60 }
 0xeac   :  { %5529 = vrsqrt.f32 %v3013_v56 }
 0xeb0   :  { %v5524_v50 = vpop.eup %5523 }
 0xeb1   :  { %v3042_v29 = vmul.f32 %v5524_v50, %v7478_v23 }
 0xeb2   :  { %v5526_v1 = vpop.eup %5525 }
 0xeb3   :  { %v3043_v16 = vmul.f32 %v5526_v1, %v7484_v30  ;;  %v3062_v24 = vmul.f32 %v7470_v3, %v3042_v29 }
 0xeb4   :  { %v5528_v4 = vpop.eup %5527 }
 0xeb5   :  { %v3044_v41 = vmul.f32 %v5528_v4, %v7498_v62  ;;  %v3063_v40 = vmul.f32 %v7470_v3, %v3043_v16  ;;  %v3082_v63 = vadd.f32 %v7473_v31, %v3062_v24 }
 0xeb6   :  { %v5530_v37 = vpop.eup %5529 }
 0xeb7   :  { %v3045_v38 = vmul.f32 %v5530_v37, %v7507_v5  ;;  %v3083_v59 = vadd.f32 %v7473_v31, %v3063_v40  ;;  %v3064_v21 = vmul.f32 %v7470_v3, %v3044_v41  ;;  %v3162_v23 = vadd.f32 %v7494_v36, %v3082_v63  ;;  %v7657_v37 = vld [vmem:[%s8003_s2 + $0x25] ss:$0 sm:$0xff] }
 0xeb9   :  { %v3320_v51 = vpack.c.bf16 %v3083_v59, %v3082_v63  ;;  %v3163_v30 = vadd.f32 %v7513_v42, %v3083_v59  ;;  %v3065_v58 = vmul.f32 %v7470_v3, %v3045_v38  ;;  %v3084_v62 = vadd.f32 %v7473_v31, %v3064_v21 }
 0xebb   :  { %5087 = vmatprep.mubr.msk.bf16.mxu1 %vm439_vm2, %v3320_v51  ;;  %v3174_v13 = vpack.c.bf16 %v3163_v30, %v3162_v23  ;;  %v3085_v43 = vadd.f32 %v7473_v31, %v3065_v58  ;;  %v3164_v53 = vadd.f32 %v7524_v54, %v3084_v62 }
 0xebd   :  { %5067 = vmatprep.mubr.msk.bf16.mxu0 %vm439_vm2, %v3174_v13  ;;  %v3321_v5 = vpack.c.bf16 %v3085_v43, %v3084_v62  ;;  %v3165_v55 = vadd.f32 %v7535_v48, %v3085_v43 }
 0xebf   :  { %5088 = vmatmul.mubr.msk.bf16.gmra.mrb[120].mxu1 %vm439_vm2, %v3321_v5  ;;  %v3175_v36 = vpack.c.bf16 %v3165_v55, %v3164_v53 }
 0xec1   :  { %5068 = vmatmul.mubr.msk.bf16.gmra.mrb[92].mxu0 %vm439_vm2, %v3175_v36 }
 0xecf   :  { %v2976_v42 = vpop.xlane.xlu0 %2975 }
 0xed0   :  { %v2998_v35 = vmul.f32 0.03125, %v2976_v42 }
 0xed1   :  { %v2979_v11 = vpop.xlane.xlu1 %2978 }
 0xed2   :  { %v3014_v14 = vadd.f32 1e-05, %v2998_v35  ;;  %v2999_v8 = vmul.f32 0.03125, %v2979_v11  ;;  %v8094_v11 = vld [vmem:[#allocation23_spill] sm:$0xff] }
 0xed3   :  { %v2982_v0 = vpop.xlane.xlu0 %2981 }
 0xed4   :  { %5531 = vrsqrt.f32 %v3014_v14  ;;  %v3015_v61 = vadd.f32 1e-05, %v2999_v8  ;;  %v3000_v2 = vmul.f32 0.03125, %v2982_v0  ;;  %v8095_v8 = vld [vmem:[#allocation22_spill] sm:$0xff] }
 0xed5   :  { %v2985_v49 = vpop.xlane.xlu1 %2984 }
 0xed6   :  { %5533 = vrsqrt.f32 %v3015_v61  ;;  %v3016_v9 = vadd.f32 1e-05, %v3000_v2  ;;  %v3001_v54 = vmul.f32 0.03125, %v2985_v49 }
 0xed8   :  { %5535 = vrsqrt.f32 %v3016_v9  ;;  %v3017_v48 = vadd.f32 1e-05, %v3001_v54 }
 0xeda   :  { %5537 = vrsqrt.f32 %v3017_v48 }
 0xede   :  { %v5532_v26 = vpop.eup %5531 }
 0xedf   :  { %v3046_v39 = vmul.f32 %v5532_v26, %v7579_v15 }
 0xee0   :  { %v5534_v52 = vpop.eup %5533 }
 0xee1   :  { %v3047_v33 = vmul.f32 %v5534_v52, %v7582_v34  ;;  %v3066_v7 = vmul.f32 %v7470_v3, %v3046_v39  ;;  %v3098_v34 = vld [vmem:[%s8003_s2 + $0x24] ss:$0 sm:$0xff] }
 0xee2   :  { %v5536_v22 = vpop.eup %5535  ;;  %v3149_v24 = vadd.f32 %v7602_v20, %v3098_v34 }
 0xee3   :  { %v3048_v57 = vmul.f32 %v5536_v22, %v7587_v47  ;;  %v3067_v45 = vmul.f32 %v7470_v3, %v3047_v33  ;;  %v3086_v6 = vadd.f32 %v7473_v31, %v3066_v7 }
 0xee4   :  { %v5538_v12 = vpop.eup %5537  ;;  %v7652_v63 = vpack.c.bf16 %v3149_v24, %v3149_v24 }
 0xee5   :  { %v3049_v19 = vmul.f32 %v5538_v12, %v7593_v10  ;;  %v3087_v60 = vadd.f32 %v7473_v31, %v3067_v45  ;;  %v3068_v56 = vmul.f32 %v7470_v3, %v3048_v57  ;;  %v3166_v15 = vadd.f32 %v7550_v44, %v3086_v6 }
 0xee7   :  { %v3322_v50 = vpack.c.bf16 %v3087_v60, %v3086_v6  ;;  %v3167_v47 = vadd.f32 %v7556_v46, %v3087_v60  ;;  %v3069_v29 = vmul.f32 %v7470_v3, %v3049_v19  ;;  %v3088_v1 = vadd.f32 %v7473_v31, %v3068_v56  ;;  %v7649_v3 = vld [vmem:[%s8003_s2 + $0x26] ss:$0 sm:$0xff] }
 0xee9   :  { %5091 = vmatprep.mubr.msk.bf16.mxu1 %vm439_vm2, %v3322_v50  ;;  %v3176_v10 = vpack.c.bf16 %v3167_v47, %v3166_v15  ;;  %v3089_v16 = vadd.f32 %v7473_v31, %v3069_v29  ;;  %v3168_v4 = vadd.f32 %v7567_v25, %v3088_v1 }
 0xeeb   :  { %5071 = vmatprep.mubr.msk.bf16.mxu0 %vm439_vm2, %v3176_v10  ;;  %v3323_v44 = vpack.c.bf16 %v3089_v16, %v3088_v1  ;;  %v3169_v41 = vadd.f32 %v7573_v18, %v3089_v16 }
 0xeed   :  { %v5081_v40 = vpop.f32.mrb[112].mxu1  ;;  %5092 = vmatmul.mubr.msk.bf16.gmra.mrb[124].mxu1 %vm439_vm2, %v3323_v44  ;;  %v3177_v46 = vpack.c.bf16 %v3169_v41, %v3168_v4 }
 0xeee   :  { %v3399_v31 = vpop.f32.mrb[113].mxu1  ;;  %v3408_v18 = vadd.f32 %v5081_v40, %v7649_v3 }
 0xeef   :  { %v5061_v20 = vpop.f32.mrb[84].mxu0  ;;  %5072 = vmatmul.mubr.msk.bf16.gmra.mrb[96].mxu0 %vm439_vm2, %v3177_v46  ;;  %v5082_v25 = vpop.f32.mrb[114].mxu1  ;;  %v3400_v23 = vadd.f32 %v3399_v31, %v7649_v3  ;;  %v8096_v46 = vld [vmem:[#allocation24_spill] sm:$0xff] }
 0xef0   :  { %v3411_v38 = vadd.f32 %v5082_v25, %v7649_v3  ;;  %v3253_v59 = vpop.f32.mrb[85].mxu0  ;;  %v3402_v21 = vpop.f32.mrb[115].mxu1  ;;  %4842 = vmatprep.mubr.msk.bf16.mxu0 %vm439_vm2, %v7652_v63  ;;  %v3262_v58 = vadd.f32 %v5061_v20, %v7657_v37  ;;  %v8097_v25 = vld [vmem:[#allocation25_spill] sm:$0xff] }
 0xef1   :  { %v3403_v51 = vadd.f32 %v3402_v21, %v7649_v3  ;;  %v5062_v30 = vpop.f32.mrb[86].mxu0  ;;  %v3254_v5 = vadd.f32 %v3253_v59, %v7657_v37 }
 0xef2   :  { %v7667_v62 = vpack.c.bf16 %v3411_v38, %v3408_v18  ;;  %v3265_v13 = vadd.f32 %v5062_v30, %v7657_v37  ;;  %v3256_v43 = vpop.f32.mrb[87].mxu0 }
 0xef3   :  { %v3467_v53 = vpack.c.bf16 %v3403_v51, %v3400_v23  ;;  %v3257_v55 = vadd.f32 %v3256_v43, %v7657_v37 }
 0xef4   :  { %v7672_v36 = vpack.c.bf16 %v3265_v13, %v3262_v58  ;;  %v3496_v54 = vmul.bf16 %v7667_v62, %v8094_v11  ;;  %v3488_v15 = vmul.bf16 %v7667_v62, %v8095_v8  ;;  %v3500_v38 = vmul.bf16 %v7667_v62, %v8096_v46 }
 0xef5   :  { %v7674_v42 = vpack.c.bf16 %v3257_v55, %v3254_v5  ;;  %v5085_v35 = vpop.f32.mrb[116].mxu1  ;;  %v3495_v14 = vmul.bf16 %v3467_v53, %v8094_v11  ;;  %v3487_v0 = vmul.bf16 %v3467_v53, %v8095_v8  ;;  %v3499_v31 = vmul.bf16 %v3467_v53, %v8096_v46 }
 0xef6   :  { %v3415_v61 = vpop.f32.mrb[117].mxu1  ;;  %v3424_v26 = vadd.f32 %v5085_v35, %v7649_v3  ;;  %v3480_v6 = vmul.bf16 %v7672_v36, %v8094_v11  ;;  %v3472_v24 = vmul.bf16 %v7672_v36, %v8095_v8  ;;  %v3491_v18 = vmul.bf16 %v3467_v53, %v8097_v25 }
 0xef7   :  { %v5065_v2 = vpop.f32.mrb[88].mxu0  ;;  %v5086_v49 = vpop.f32.mrb[118].mxu1  ;;  %4844 = vmatprep.subr.bf16.mxu1 %v3495_v14  ;;  %v3479_v9 = vmul.bf16 %v7674_v42, %v8094_v11  ;;  %v3471_v48 = vmul.bf16 %v7674_v42, %v8095_v8  ;;  %v3416_v7 = vadd.f32 %v3415_v61, %v7649_v3  ;;  %v3492_v23 = vmul.bf16 %v7667_v62, %v8097_v25 }
 0xef8   :  { %v3427_v39 = vadd.f32 %v5086_v49, %v7649_v3  ;;  %v3269_v52 = vpop.f32.mrb[89].mxu0  ;;  %v3418_v33 = vpop.f32.mrb[119].mxu1  ;;  %4845 = vmatpush3.bf16.msra.mxu1 %v3487_v0  ;;  %v3278_v12 = vadd.f32 %v5065_v2, %v7657_v37  ;;  %v3510_v4 = vsel %vm439_vm2, %v3472_v24, 0  ;;  %v3483_v5 = vmul.bf16 %v7674_v42, %v8096_v46 }
 0xef9   :  { %v3419_v22 = vadd.f32 %v3418_v33, %v7649_v3  ;;  %v5066_v57 = vpop.f32.mrb[90].mxu0  ;;  %5155 = vmatprep.subr.msk.bf16.mxu0 %vm439_vm2, %v3479_v9  ;;  %4846 = vmatprep.subr.bf16.mxu1 %v3496_v54  ;;  %v3507_v45 = vsel %vm439_vm2, %v3471_v48, 0  ;;  %v3270_v34 = vadd.f32 %v3269_v52, %v7657_v37  ;;  %v3475_v53 = vmul.bf16 %v7674_v42, %v8097_v25 }
 0xefa   :  { %v3470_v19 = vpack.c.bf16 %v3427_v39, %v3424_v26  ;;  %v3281_v60 = vadd.f32 %v5066_v57, %v7657_v37  ;;  %v3272_v56 = vpop.f32.mrb[91].mxu0  ;;  %4827 = vmatpush3.bf16.xpose.msra.mxu0 %v3507_v45  ;;  %v3484_v35 = vmul.bf16 %v7672_v36, %v8096_v46  ;;  %v3476_v14 = vmul.bf16 %v7672_v36, %v8097_v25 }
 0xefb   :  { %v3469_v50 = vpack.c.bf16 %v3419_v22, %v3416_v7  ;;  %v3273_v47 = vadd.f32 %v3272_v56, %v7657_v37  ;;  %5156 = vmatprep.subr.msk.bf16.mxu0 %vm439_vm2, %v3480_v6  ;;  %v3519_v55 = vsel %vm439_vm2, %v3475_v53, 0 }
 0xefc   :  { %v3466_v29 = vpack.c.bf16 %v3281_v60, %v3278_v12  ;;  %4847 = vmatpush3.bf16.msra.mxu1 %v3488_v15  ;;  %v3498_v44 = vmul.bf16 %v3470_v19, %v8094_v11  ;;  %v3490_v40 = vmul.bf16 %v3470_v19, %v8095_v8  ;;  %v3502_v13 = vmul.bf16 %v3470_v19, %v8096_v46 }
 0xefd   :  { %v3465_v1 = vpack.c.bf16 %v3273_v47, %v3270_v34  ;;  %v3497_v10 = vmul.bf16 %v3469_v50, %v8094_v11  ;;  %v3489_v16 = vmul.bf16 %v3469_v50, %v8095_v8  ;;  %v3501_v51 = vmul.bf16 %v3469_v50, %v8096_v46 }
 0xefe   :  { %v3482_v21 = vmul.bf16 %v3466_v29, %v8094_v11  ;;  %v3474_v30 = vmul.bf16 %v3466_v29, %v8095_v8  ;;  %v3493_v58 = vmul.bf16 %v3469_v50, %v8097_v25  ;;  %v3494_v62 = vmul.bf16 %v3470_v19, %v8097_v25 }
 0xeff   :  { %4848 = vmatprep.subr.bf16.mxu1 %v3497_v10  ;;  %v3481_v41 = vmul.bf16 %v3465_v1, %v8094_v11  ;;  %v3473_v20 = vmul.bf16 %v3465_v1, %v8095_v8  ;;  %v3522_v0 = vsel %vm439_vm2, %v3476_v14, 0  ;;  %v3485_v61 = vmul.bf16 %v3465_v1, %v8096_v46 }
 0xf00   :  { %4849 = vmatpush3.bf16.msra.mxu1 %v3489_v16  ;;  %v3516_v43 = vsel %vm439_vm2, %v3474_v30, 0  ;;  %v3477_v42 = vmul.bf16 %v3465_v1, %v8097_v25  ;;  %v3486_v49 = vmul.bf16 %v3466_v29, %v8096_v46  ;;  %v3478_v9 = vmul.bf16 %v3466_v29, %v8097_v25 }
 0xf01   :  { %4850 = vmatprep.subr.bf16.mxu1 %v3498_v44  ;;  %v3513_v59 = vsel %vm439_vm2, %v3473_v20, 0 }
 0xf02   :  { %4829 = vmatpush3.bf16.xpose.msra.mxu0 %v3510_v4  ;;  %v3525_v2 = vsel %vm439_vm2, %v3477_v42, 0  ;;  %v3528_v36 = vsel %vm439_vm2, %v3478_v9, 0 }
 0xf03   :  { %5157 = vmatprep.subr.msk.bf16.mxu0 %vm439_vm2, %v3481_v41 }
 0xf04   :  { %4851 = vmatpush3.bf16.msra.mxu1 %v3490_v40 }
 0xf05   :  { %4852 = vmatprep.subr.bf16.mxu1 %v3499_v31 }
 0xf08   :  { %4853 = vmatpush3.bf16.msra.mxu1 %v3491_v18 }
 0xf09   :  { %4854 = vmatprep.subr.bf16.mxu1 %v3500_v38 }
 0xf0a   :  { %4831 = vmatpush3.bf16.xpose.msra.mxu0 %v3513_v59 }
 0xf0b   :  { %5158 = vmatprep.subr.msk.bf16.mxu0 %vm439_vm2, %v3482_v21 }
 0xf0c   :  { %4855 = vmatpush3.bf16.msra.mxu1 %v3492_v23 }
 0xf0d   :  { %4856 = vmatprep.subr.bf16.mxu1 %v3501_v51 }
 0xf10   :  { %4857 = vmatpush3.bf16.msra.mxu1 %v3493_v58 }
 0xf11   :  { %4858 = vmatprep.subr.bf16.mxu1 %v3502_v13 }
 0xf12   :  { %4833 = vmatpush3.bf16.xpose.msra.mxu0 %v3516_v43 }
 0xf13   :  { %5159 = vmatprep.subr.msk.bf16.mxu0 %vm439_vm2, %v3483_v5 }
 0xf14   :  { %4859 = vmatpush3.bf16.msra.mxu1 %v3494_v62 }
 0xf1a   :  { %4835 = vmatpush3.bf16.xpose.msra.mxu0 %v3519_v55 }
 0xf1b   :  { %5160 = vmatprep.subr.msk.bf16.mxu0 %vm439_vm2, %v3484_v35 }
 0xf22   :  { %4837 = vmatpush3.bf16.xpose.msra.mxu0 %v3522_v0 }
 0xf23   :  { %5161 = vmatprep.subr.msk.bf16.mxu0 %vm439_vm2, %v3485_v61 }
 0xf2a   :  { %4839 = vmatpush3.bf16.xpose.msra.mxu0 %v3525_v2 }
 0xf2b   :  { %5162 = vmatprep.subr.msk.bf16.mxu0 %vm439_vm2, %v3486_v49 }
 0xf32   :  { %4841 = vmatpush3.bf16.xpose.msra.mxu0 %v3528_v36 }
 0xf39   :  { %4843 = vmatmul.mubr.msk.bf16.vlgmr.msra.gmra.mrb[100].mxu0 %vm439_vm2, %v7652_v63 }
 0xf92   :  { %v5089_v54 = vpop.f32.mrb[120].mxu1 }
 0xf93   :  { %v3431_v48 = vpop.f32.mrb[121].mxu1  ;;  %v3440_v52 = vadd.f32 %v5089_v54, %v7649_v3 }
 0xf94   :  { %v5069_v26 = vpop.f32.mrb[92].mxu0  ;;  %v5090_v39 = vpop.f32.mrb[122].mxu1  ;;  %v3432_v57 = vadd.f32 %v3431_v48, %v7649_v3 }
 0xf95   :  { %v3443_v33 = vadd.f32 %v5090_v39, %v7649_v3  ;;  %v3285_v7 = vpop.f32.mrb[93].mxu0  ;;  %v3434_v22 = vpop.f32.mrb[123].mxu1  ;;  %v3294_v12 = vadd.f32 %v5069_v26, %v7657_v37 }
 0xf96   :  { %v3435_v45 = vadd.f32 %v3434_v22, %v7649_v3  ;;  %v5070_v6 = vpop.f32.mrb[94].mxu0  ;;  %v3286_v15 = vadd.f32 %v3285_v7, %v7657_v37 }
 0xf97   :  { %v3696_v19 = vpack.c.bf16 %v3443_v33, %v3440_v52  ;;  %v3297_v60 = vadd.f32 %v5070_v6, %v7657_v37  ;;  %v3288_v56 = vpop.f32.mrb[95].mxu0 }
 0xf98   :  { %v3695_v34 = vpack.c.bf16 %v3435_v45, %v3432_v57  ;;  %v3289_v50 = vadd.f32 %v3288_v56, %v7657_v37 }
 0xf99   :  { %v7754_v47 = vpack.c.bf16 %v3297_v60, %v3294_v12  ;;  %v3724_v24 = vmul.bf16 %v3696_v19, %v8094_v11  ;;  %v3716_v44 = vmul.bf16 %v3696_v19, %v8095_v8  ;;  %v3728_v2 = vmul.bf16 %v3696_v19, %v8096_v46 }
 0xf9a   :  { %v7756_v29 = vpack.c.bf16 %v3289_v50, %v3286_v15  ;;  %v3723_v1 = vmul.bf16 %v3695_v34, %v8094_v11  ;;  %v3715_v10 = vmul.bf16 %v3695_v34, %v8095_v8  ;;  %v3727_v42 = vmul.bf16 %v3695_v34, %v8096_v46 }
 0xf9b   :  { %v3720_v49 = vmul.bf16 %v3696_v19, %v8097_v25 }
 0xf9c   :  { %4884 = vmatprep.subr.bf16.mxu0 %v3723_v1  ;;  %v3707_v16 = vmul.bf16 %v7756_v29, %v8094_v11 }
 0xf9d   :  { %4885 = vmatpush3.bf16.msra.mxu0 %v3715_v10 }
 0xf9e   :  { %5163 = vmatprep.subr.msk.bf16.mxu1 %vm439_vm2, %v3707_v16  ;;  %4886 = vmatprep.subr.bf16.mxu0 %v3724_v24 }
 0xfa1   :  { %4887 = vmatpush3.bf16.msra.mxu0 %v3716_v44 }
 0xfc0   :  { %v5093_v4 = vpop.f32.mrb[124].mxu1 }
 0xfc1   :  { %v3447_v41 = vpop.f32.mrb[125].mxu1  ;;  %v3456_v20 = vadd.f32 %v5093_v4, %v7649_v3 }
 0xfc2   :  { %v5073_v40 = vpop.f32.mrb[96].mxu0  ;;  %v5094_v31 = vpop.f32.mrb[126].mxu1  ;;  %v3448_v21 = vadd.f32 %v3447_v41, %v7649_v3 }
 0xfc3   :  { %v3459_v18 = vadd.f32 %v5094_v31, %v7649_v3  ;;  %v3301_v38 = vpop.f32.mrb[97].mxu0  ;;  %v3450_v59 = vpop.f32.mrb[127].mxu1  ;;  %v3310_v30 = vadd.f32 %v5073_v40, %v7657_v37 }
 0xfc4   :  { %v3451_v23 = vadd.f32 %v3450_v59, %v7649_v3  ;;  %v5074_v51 = vpop.f32.mrb[98].mxu0  ;;  %v3302_v5 = vadd.f32 %v3301_v38, %v7657_v37 }
 0xfc5   :  { %v3698_v58 = vpack.c.bf16 %v3459_v18, %v3456_v20  ;;  %v3313_v13 = vadd.f32 %v5074_v51, %v7657_v37  ;;  %v3304_v43 = vpop.f32.mrb[99].mxu0 }
 0xfc6   :  { %v3697_v62 = vpack.c.bf16 %v3451_v23, %v3448_v21  ;;  %v3305_v53 = vadd.f32 %v3304_v43, %v7657_v37  ;;  %v3719_v37 = vmul.bf16 %v3695_v34, %v8097_v25 }
 0xfc7   :  { %v7773_v55 = vpack.c.bf16 %v3313_v13, %v3310_v30  ;;  %v3726_v0 = vmul.bf16 %v3698_v58, %v8094_v11  ;;  %v3718_v61 = vmul.bf16 %v3698_v58, %v8095_v8  ;;  %v3730_v54 = vmul.bf16 %v3698_v58, %v8096_v46 }
 0xfc8   :  { %v7775_v35 = vpack.c.bf16 %v3305_v53, %v3302_v5  ;;  %v3725_v14 = vmul.bf16 %v3697_v62, %v8094_v11  ;;  %v3717_v3 = vmul.bf16 %v3697_v62, %v8095_v8  ;;  %v3729_v9 = vmul.bf16 %v3697_v62, %v8096_v46 }
 0xfc9   :  { %v3721_v36 = vmul.bf16 %v3697_v62, %v8097_v25  ;;  %v3722_v48 = vmul.bf16 %v3698_v58, %v8097_v25 }
 0xfca   :  { %4888 = vmatprep.subr.bf16.mxu0 %v3725_v14 }
 0xfcb   :  { %4889 = vmatpush3.bf16.msra.mxu0 %v3717_v3 }
 0xfcc   :  { %4890 = vmatprep.subr.bf16.mxu0 %v3726_v0 }
 0xfcf   :  { %4891 = vmatpush3.bf16.msra.mxu0 %v3718_v61 }
 0xfd0   :  { %4892 = vmatprep.subr.bf16.mxu0 %v3727_v42 }
 0xfd3   :  { %4893 = vmatpush3.bf16.msra.mxu0 %v3719_v37  ;;  %v3699_v37 = vmul.bf16 %v7756_v29, %v8095_v8 }
 0xfd4   :  { %4894 = vmatprep.subr.bf16.mxu0 %v3728_v2 }
 0xfd7   :  { %4895 = vmatpush3.bf16.msra.mxu0 %v3720_v49 }
 0xfd8   :  { %4896 = vmatprep.subr.bf16.mxu0 %v3729_v9  ;;  %v3732_v9 = vsel %vm439_vm2, %v3699_v37, 0 }
 0xfdb   :  { %4897 = vmatpush3.bf16.msra.mxu0 %v3721_v36  ;;  %v3708_v36 = vmul.bf16 %v7754_v47, %v8094_v11 }
 0xfdc   :  { %4898 = vmatprep.subr.bf16.mxu0 %v3730_v54  ;;  %v3700_v54 = vmul.bf16 %v7754_v47, %v8095_v8 }
 0xfdf   :  { %4899 = vmatpush3.bf16.msra.mxu0 %v3722_v48  ;;  %v3735_v48 = vsel %vm439_vm2, %v3700_v54, 0 }
 0xfe0   :  { %5095 = vmatprep.subr.bf16.mxu0 %v8088_v27 }
0x100c   :  { %v3588_v26 = vpop.f32.mrb[100].mxu0 }
0x100d   :  { %v3590_v39 = vpop.f32.mrb[101].mxu0  ;;  %v3606_v52 = vsel %vm989_vm13, %v3588_v26, -inf  ;;  %v3595_v57 = vsel %vm900_vm14, %v3588_v26, -inf }
0x100e   :  { %3607 = vmax.xlane.f32.xlu1 %v3606_v52  ;;  %v3592_v33 = vpop.f32.mrb[102].mxu0  ;;  %v3632_v7 = vsel %vm989_vm13, %v3590_v39, -inf  ;;  %v3621_v45 = vsel %vm900_vm14, %v3590_v39, -inf }
0x100f   :  { %3633 = vmax.xlane.f32.xlu0 %v3632_v7  ;;  %v3593_v22 = vpop.f32.mrb[103].mxu0  ;;  %v3710_v33 = vmul.bf16 %v7773_v55, %v8094_v11  ;;  %v3702_v7 = vmul.bf16 %v7773_v55, %v8095_v8 }
0x1011   :  { %v3741_v22 = vsel %vm439_vm2, %v3702_v7, 0 }
0x1012   :  { %3596 = vmax.xlane.f32.xlu1 %v3595_v57  ;;  %v3711_v57 = vmul.bf16 %v7756_v29, %v8096_v46 }
0x1013   :  { %3622 = vmax.xlane.f32.xlu0 %v3621_v45  ;;  %v3703_v45 = vmul.bf16 %v7756_v29, %v8097_v25  ;;  %v3705_v29 = vmul.bf16 %v7775_v35, %v8097_v25 }
0x109b   :  { %v3608_v6 = vpop.xlane.xlu1 %3607 }
0x109c   :  { %v3609_v12 = vsub.f32 %v3588_v26, %v3608_v6  ;;  %v3634_v19 = vpop.xlane.xlu0 %3633  ;;  %v3744_v6 = vsel %vm439_vm2, %v3703_v45, 0 }
0x109d   :  { %v3635_v60 = vsub.f32 %v3590_v39, %v3634_v19  ;;  %v3713_v19 = vmul.bf16 %v7775_v35, %v8096_v46 }
0x109e   :  { %v3610_v56 = vmul.f32 1.442695, %v3609_v12 }
0x109f   :  { %v3636_v15 = vmul.f32 1.442695, %v3635_v60  ;;  %v3597_v4 = vpop.xlane.xlu1 %3596  ;;  %v3750_v60 = vsel %vm439_vm2, %v3705_v29, 0 }
0x10a0   :  { %5539 = vpow2.f32 %v3610_v56  ;;  %v3623_v1 = vpop.xlane.xlu0 %3622  ;;  %v3598_v41 = vsub.f32 %v3588_v26, %v3597_v4  ;;  %v3709_v26 = vmul.bf16 %v7775_v35, %v8094_v11  ;;  %v3712_v11 = vmul.bf16 %v7754_v47, %v8096_v46 }
0x10a1   :  { %5541 = vpow2.f32 %v3636_v15  ;;  %v3624_v10 = vsub.f32 %v3590_v39, %v3623_v1  ;;  %v3701_v39 = vmul.bf16 %v7775_v35, %v8095_v8  ;;  %v3704_v8 = vmul.bf16 %v7754_v47, %v8097_v25 }
0x10a2   :  { %v3599_v40 = vmul.f32 1.442695, %v3598_v41  ;;  %v3714_v56 = vmul.bf16 %v7773_v55, %v8096_v46  ;;  %v3706_v47 = vmul.bf16 %v7773_v55, %v8097_v25 }
0x10a3   :  { %v3625_v16 = vmul.f32 1.442695, %v3624_v10  ;;  %v3738_v52 = vsel %vm439_vm2, %v3701_v39, 0  ;;  %v3747_v12 = vsel %vm439_vm2, %v3704_v8, 0 }
0x10a4   :  { %v3753_v15 = vsel %vm439_vm2, %v3706_v47, 0 }
0x10a5   :  { %5543 = vpow2.f32 %v3625_v16 }
0x10a6   :  { %5545 = vpow2.f32 %v3599_v40 }
0x10aa   :  { %v5540_v34 = vpop.eup %5539 }
0x10ab   :  { %v5542_v50 = vpop.eup %5541  ;;  %3613 = vrot.lane.b32.xlu1 %v5540_v34, %s5602_s11 }
0x10ac   :  { %3639 = vrot.lane.b32.xlu0 %v5542_v50, %s5602_s11 }
0x10af   :  { %v5544_v24 = vpop.eup %5543 }
0x10b0   :  { %v3627_v44 = vsel %vm900_vm14, %v5544_v24, 0.0  ;;  %v5546_v59 = vpop.eup %5545 }
0x10b1   :  { %v3601_v21 = vsel %vm900_vm14, %v5546_v59, 0.0 }
0x10cf   :  { %3628 = vadd.xlane.f32.xlu1 %v3627_v44 }
0x111d   :  { %v3614_v31 = vpop.permute.xlu1 %3613 }
0x111e   :  { %v3616_v20 = vsel %vm900_vm14, %v3614_v31, 0.0  ;;  %v3640_v18 = vpop.permute.xlu0 %3639 }
0x111f   :  { %v3642_v38 = vsel %vm900_vm14, %v3640_v18, 0.0  ;;  %3617 = vadd.xlane.f32.xlu1 %v3616_v20 }
0x1120   :  { %3643 = vadd.xlane.f32.xlu0 %v3642_v38 }
0x1124   :  { %3602 = vadd.xlane.f32.xlu0 %v3601_v21 }
0x115c   :  { %v3629_v23 = vpop.xlane.xlu1 %3628 }
0x115d   :  { %5547 = vrcp.f32 %v3629_v23 }
0x1167   :  { %v5548_v13 = vpop.eup %5547 }
0x1168   :  { %v3631_v5 = vmul.f32 %v5548_v13, %v5544_v24 }
0x11ac   :  { %v3618_v51 = vpop.xlane.xlu1 %3617 }
0x11ad   :  { %v3644_v30 = vpop.xlane.xlu0 %3643 }
0x11ae   :  { %5549 = vrcp.f32 %v3644_v30 }
0x11af   :  { %5551 = vrcp.f32 %v3618_v51 }
0x11b1   :  { %v3603_v58 = vpop.xlane.xlu0 %3602 }
0x11b2   :  { %5553 = vrcp.f32 %v3603_v58 }
0x11b8   :  { %v5550_v43 = vpop.eup %5549 }
0x11b9   :  { %v3646_v62 = vmul.f32 %v5550_v43, %v5542_v50  ;;  %v5552_v53 = vpop.eup %5551 }
0x11ba   :  { %v3620_v61 = vmul.f32 %v5552_v53, %v5540_v34  ;;  %v8098_v34 = vmov 0  }
0x11bb   :  { %v3648_v14 = vsel %vm900_vm14, %v3631_v5, %v3646_v62 }
0x11bc   :  { %v5554_v3 = vpop.eup %5553  ;;  %v3650_v0 = vpack.c.bf16 %v3648_v14, %v3648_v14 }
0x11bd   :  { %v3605_v42 = vmul.f32 %v5554_v3, %v5546_v59 }
0x11be   :  { %3683 = vmatprep.mubr.bf16.mxu1 %v3650_v0 }
0x11bf   :  { %v3647_v2 = vsel %vm900_vm14, %v3605_v42, %v3620_v61 }
0x11c0   :  { %v3649_v49 = vpack.c.bf16 %v3647_v2, %v3647_v2 }
0x11c2   :  { %3684 = vmatmul.mubr.bf16.vlgmr.msra.gmra.mrb[128].mxu1 %v3649_v49 }
0x11c3   :  { %4867 = vmatpush3.bf16.xpose.msra.mxu1 %v3732_v9  ;;  %4882 = vmatprep.mubr.msk.bf16.mxu1 %vm439_vm2, %v7652_v63 }
0x11c4   :  { %5164 = vmatprep.subr.msk.bf16.mxu1 %vm439_vm2, %v3708_v36 }
0x11cb   :  { %4869 = vmatpush3.bf16.xpose.msra.mxu1 %v3735_v48 }
0x11cc   :  { %5165 = vmatprep.subr.msk.bf16.mxu1 %vm439_vm2, %v3709_v26 }
0x11d3   :  { %4871 = vmatpush3.bf16.xpose.msra.mxu1 %v3738_v52 }
0x11d4   :  { %5166 = vmatprep.subr.msk.bf16.mxu1 %vm439_vm2, %v3710_v33 }
0x11db   :  { %4873 = vmatpush3.bf16.xpose.msra.mxu1 %v3741_v22 }
0x11dc   :  { %5167 = vmatprep.subr.msk.bf16.mxu1 %vm439_vm2, %v3711_v57 }
0x11e3   :  { %4875 = vmatpush3.bf16.xpose.msra.mxu1 %v3744_v6 }
0x11e4   :  { %5168 = vmatprep.subr.msk.bf16.mxu1 %vm439_vm2, %v3712_v11  ;;  %v5201_v11 = vld [vmem:[%s8001_s1 + $0x2c] ss:$72 sps:$4 sm:$0xff]  }
0x11eb   :  { %4877 = vmatpush3.bf16.xpose.msra.mxu1 %v3747_v12  ;;  %v5202_v12 = vld [vmem:[%s8001_s1 + $0xbc] ss:$72 sps:$4 sm:$0xff]  }
0x11ec   :  { %5169 = vmatprep.subr.msk.bf16.mxu1 %vm439_vm2, %v3713_v19 }
0x11f3   :  { %4879 = vmatpush3.bf16.xpose.msra.mxu1 %v3750_v60 }
0x11f4   :  { %5170 = vmatprep.subr.msk.bf16.mxu1 %vm439_vm2, %v3714_v56 }
0x11fb   :  { %4881 = vmatpush3.bf16.xpose.msra.mxu1 %v3753_v15 }
0x1202   :  { %4883 = vmatmul.mubr.msk.bf16.vlgmr.msra.gmra.mrb[132].mxu1 %vm439_vm2, %v7652_v63 }
0x1203   :  { %4314 = vmatprep.mubr.bf16.mxu1 %v8098_v34  ;;  %v3921_v34 = vld [vmem:[%s8003_s2 + $0x27] ss:$0 sm:$0xff] }
0x1295   :  { %v4860_v35 = vpop.f32.mrb[128].mxu1 }
0x1296   :  { %v4861_v50 = vpop.f32.mrb[129].mxu1 }
0x1297   :  { %v7852_v1 = vadd.f32 %v4861_v50, %v4860_v35  ;;  %v4863_v10 = vpop.f32.mrb[130].mxu1 }
0x1298   :  { %v4864_v46 = vpop.f32.mrb[131].mxu1 }
0x12d5   :  { %v3813_v16 = vpop.f32.mrb[132].mxu1 }
0x12d6   :  { %v3815_v24 = vpop.f32.mrb[133].mxu1  ;;  %v3831_v44 = vsel %vm989_vm13, %v3813_v16, -inf  ;;  %v3820_v63 = vsel %vm900_vm14, %v3813_v16, -inf }
0x12d7   :  { %3832 = vmax.xlane.f32.xlu1 %v3831_v44  ;;  %v3817_v25 = vpop.f32.mrb[134].mxu1  ;;  %v3857_v55 = vsel %vm989_vm13, %v3815_v24, -inf  ;;  %v3846_v41 = vsel %vm900_vm14, %v3815_v24, -inf }
0x12d8   :  { %3858 = vmax.xlane.f32.xlu0 %v3857_v55  ;;  %v3818_v4 = vpop.f32.mrb[135].mxu1 }
0x12db   :  { %3821 = vmax.xlane.f32.xlu1 %v3820_v63 }
0x12dc   :  { %3847 = vmax.xlane.f32.xlu0 %v3846_v41 }
0x1364   :  { %v3833_v40 = vpop.xlane.xlu1 %3832 }
0x1365   :  { %v3834_v31 = vsub.f32 %v3813_v16, %v3833_v40  ;;  %v3859_v20 = vpop.xlane.xlu0 %3858 }
0x1366   :  { %v3860_v18 = vsub.f32 %v3815_v24, %v3859_v20 }
0x1367   :  { %v3835_v38 = vmul.f32 1.442695, %v3834_v31 }
0x1368   :  { %v3861_v59 = vmul.f32 1.442695, %v3860_v18  ;;  %v3822_v5 = vpop.xlane.xlu1 %3821 }
0x1369   :  { %5555 = vpow2.f32 %v3835_v38  ;;  %v3848_v51 = vpop.xlane.xlu0 %3847  ;;  %v3823_v62 = vsub.f32 %v3813_v16, %v3822_v5  ;;  %v5599_v16 = vld [vmem:[%s8003_s2 + $0x10] ss:$0 sm:$0xff] }
0x136a   :  { %5557 = vpow2.f32 %v3861_v59  ;;  %v3849_v30 = vsub.f32 %v3815_v24, %v3848_v51  ;;  %v5203_v51 = vld [vmem:[%s8001_s1 + $0x30] ss:$72 sps:$4 sm:$0xff]  }
0x136b   :  { %v3824_v53 = vmul.f32 1.442695, %v3823_v62 }
0x136c   :  { %v3850_v58 = vmul.f32 1.442695, %v3849_v30  ;;  %v5204_v30 = vld [vmem:[%s8001_s1 + $0xc0] ss:$72 sps:$4 sm:$0xff]  }
0x136e   :  { %5559 = vpow2.f32 %v3850_v58 }
0x136f   :  { %5561 = vpow2.f32 %v3824_v53 }
0x1373   :  { %v5556_v21 = vpop.eup %5555 }
0x1374   :  { %v5558_v23 = vpop.eup %5557  ;;  %3838 = vrot.lane.b32.xlu1 %v5556_v21, %s5602_s11 }
0x1375   :  { %3864 = vrot.lane.b32.xlu0 %v5558_v23, %s5602_s11 }
0x1378   :  { %v5560_v13 = vpop.eup %5559 }
0x1379   :  { %v3852_v43 = vsel %vm900_vm14, %v5560_v13, 0.0  ;;  %v5562_v42 = vpop.eup %5561 }
0x137a   :  { %v3826_v37 = vsel %vm900_vm14, %v5562_v42, 0.0 }
0x1398   :  { %3853 = vadd.xlane.f32.xlu1 %v3852_v43 }
0x13e6   :  { %v3839_v14 = vpop.permute.xlu1 %3838 }
0x13e7   :  { %v3841_v3 = vsel %vm900_vm14, %v3839_v14, 0.0  ;;  %v3865_v0 = vpop.permute.xlu0 %3864  ;;  %v3980_v14 = vld [vmem:[%s8003_s2 + $0x30] sm:$0x3] }
0x13e8   :  { %v3867_v61 = vsel %vm900_vm14, %v3865_v0, 0.0  ;;  %3842 = vadd.xlane.f32.xlu1 %v3841_v3  ;;  %v8099_v3 = vld [vmem:[#allocation20_spill] sm:$0xff] }
0x13e9   :  { %3868 = vadd.xlane.f32.xlu0 %v3867_v61  ;;  %v4010_v0 = vrot.slane %v3980_v14, %v8099_v3 }
0x13ed   :  { %3827 = vadd.xlane.f32.xlu0 %v3826_v37 }
0x1425   :  { %v3854_v2 = vpop.xlane.xlu1 %3853 }
0x1426   :  { %5563 = vrcp.f32 %v3854_v2 }
0x1430   :  { %v5564_v54 = vpop.eup %5563 }
0x1431   :  { %v3856_v26 = vmul.f32 %v5564_v54, %v5560_v13 }
0x1475   :  { %v3843_v49 = vpop.xlane.xlu1 %3842 }
0x1476   :  { %v3869_v9 = vpop.xlane.xlu0 %3868 }
0x1477   :  { %5565 = vrcp.f32 %v3869_v9  ;;  %v8100_v9 = vld [vmem:[#allocation21_spill] sm:$0xff] }
0x1478   :  { %5567 = vrcp.f32 %v3843_v49 }
0x147a   :  { %v3828_v36 = vpop.xlane.xlu0 %3827 }
0x147b   :  { %5569 = vrcp.f32 %v3828_v36  ;;  %v4016_v36 = vrot.slane %v3980_v14, %v8100_v9 }
0x1481   :  { %v5566_v48 = vpop.eup %5565 }
0x1482   :  { %v3871_v39 = vmul.f32 %v5566_v48, %v5558_v23  ;;  %v5568_v52 = vpop.eup %5567 }
0x1483   :  { %v3845_v57 = vmul.f32 %v5568_v52, %v5556_v21 }
0x1484   :  { %v3873_v33 = vsel %vm900_vm14, %v3856_v26, %v3871_v39  ;;  %v5205_v39 = vld [vmem:[%s8001_s1 + $0x34] ss:$72 sps:$4 sm:$0xff]  }
0x1485   :  { %v5570_v7 = vpop.eup %5569  ;;  %v3875_v22 = vpack.c.bf16 %v3873_v33, %v3873_v33  ;;  %v5206_v33 = vld [vmem:[%s8001_s1 + $0xc4] ss:$72 sps:$4 sm:$0xff]  }
0x1486   :  { %v3830_v45 = vmul.f32 %v5570_v7, %v5562_v42  ;;  %v5207_v7 = vld [vmem:[%s8001_s1 + $0x154] ss:$72 sps:$4 sm:$0xff]  }
0x1487   :  { %3908 = vmatprep.mubr.bf16.mxu0 %v3875_v22  ;;  %v5208_v22 = vld [vmem:[%s8001_s1 + $0x1e4] ss:$72 sps:$4 sm:$0xff]  }
0x1488   :  { %v3872_v6 = vsel %vm900_vm14, %v3830_v45, %v3845_v57  ;;  %v4024_v57 = vld [vmem:[%s8003_s2 + $0x32] ss:$0 sm:$0xff] }
0x1489   :  { %v3874_v8 = vpack.c.bf16 %v3872_v6, %v3872_v6 }
0x148b   :  { %3909 = vmatmul.mubr.bf16.vlgmr.msra.gmra.mrb[104].mxu0 %v3874_v8 }
0x148c   :  { %5096 = vmatpush3.bf16.msra.mxu0 %v5201_v11  ;;  %5099 = vmatprep.mubr.msk.bf16.mxu0 %vm5603_vm15, %v8088_v27 }
0x148d   :  { %5097 = vmatprep.subr.bf16.mxu0 %v8088_v27 }
0x1490   :  { %5098 = vmatpush3.bf16.msra.mxu0 %v5202_v12 }
0x1491   :  { %5103 = vmatprep.subr.bf16.mxu0 %v8088_v27 }
0x155e   :  { %v4900_v19 = vpop.f32.mrb[104].mxu0 }
0x155f   :  { %v4901_v29 = vpop.f32.mrb[105].mxu0 }
0x1560   :  { %v4902_v60 = vadd.f32 %v4901_v29, %v4900_v19  ;;  %v4903_v56 = vpop.f32.mrb[106].mxu0 }
0x1561   :  { %v4904_v47 = vpop.f32.mrb[107].mxu0 }
0x1562   :  { %v3916_v15 = vpack.c.bf16 %v4902_v60, %v7852_v1  ;;  %v4092_v47 = vld [vmem:[%s8003_s2 + $0x33] ss:$0 sm:$0xff] }
0x1564   :  { %5100 = vmatmul.mubr.msk.bf16.vlgmr.msra.gmra.mrb[108].mxu0 %vm439_vm2, %v3916_v15 }
0x1565   :  { %5107 = vmatprep.mubr.msk.bf16.mxu0 %vm5603_vm15, %v8088_v27  ;;  %5104 = vmatpush3.bf16.msra.mxu0 %v5203_v51 }
0x1566   :  { %5105 = vmatprep.subr.bf16.mxu0 %v8088_v27 }
0x1569   :  { %5106 = vmatpush3.bf16.msra.mxu0 %v5204_v30 }
0x156a   :  { %5111 = vmatprep.subr.bf16.mxu0 %v8088_v27 }
0x1637   :  { %v3971_v35 = vpop.f32.mrb[108].mxu0 }
0x1638   :  { %v3972_v50 = vadd.f32 %v3971_v35, %v3921_v34  ;;  %v5101_v10 = vpop.f32.mrb[109].mxu0 }
0x1639   :  { %v3974_v46 = vpop.f32.mrb[110].mxu0 }
0x163a   :  { %v3978_v24 = vadd.f32 %v5599_v16, %v3972_v50  ;;  %v3975_v44 = vadd.f32 %v3974_v46, %v3921_v34  ;;  %v5102_v1 = vpop.f32.mrb[111].mxu0 }
0x163c   :  { %v3979_v25 = vadd.f32 %v5599_v16, %v3975_v44  ;;  %v3981_v55 = vsel %vm439_vm2, %v3978_v24, 0.0 }
0x163d   :  { %3982 = vadd.xlane.f32.xlu0 %v3981_v55 }
0x163e   :  { %v3984_v4 = vsel %vm439_vm2, %v3979_v25, 0.0 }
0x163f   :  { %3985 = vadd.xlane.f32.xlu1 %v3984_v4 }
0x16ca   :  { %v3983_v63 = vpop.xlane.xlu0 %3982 }
0x16cb   :  { %v3987_v41 = vmul.f32 0.03125, %v3983_v63 }
0x16cc   :  { %v3986_v40 = vpop.xlane.xlu1 %3985 }
0x16cd   :  { %v3989_v31 = vsub.f32 %v3978_v24, %v3987_v41  ;;  %v3988_v20 = vmul.f32 0.03125, %v3986_v40 }
0x16cf   :  { %v3990_v18 = vsub.f32 %v3979_v25, %v3988_v20  ;;  %v3991_v38 = vmul.f32 %v3989_v31, %v3989_v31 }
0x16d1   :  { %v3993_v59 = vsel %vm439_vm2, %v3991_v38, 0.0  ;;  %v3992_v21 = vmul.f32 %v3990_v18, %v3990_v18 }
0x16d2   :  { %3994 = vadd.xlane.f32.xlu0 %v3993_v59 }
0x16d3   :  { %v3996_v23 = vsel %vm439_vm2, %v3992_v21, 0.0 }
0x16d4   :  { %3997 = vadd.xlane.f32.xlu1 %v3996_v23 }
0x175f   :  { %v3995_v58 = vpop.xlane.xlu0 %3994 }
0x1760   :  { %v3999_v13 = vmul.f32 0.03125, %v3995_v58 }
0x1761   :  { %v3998_v43 = vpop.xlane.xlu1 %3997 }
0x1762   :  { %v4001_v5 = vadd.f32 1e-05, %v3999_v13  ;;  %v4000_v62 = vmul.f32 0.03125, %v3998_v43  ;;  %v4192_v13 = vsub.s32 4, %v8093_v17  ;;  %v4163_v43 = vld [vmem:[%s8003_s2 + $0x30] sm:$0x30] }
0x1764   :  { %5571 = vrsqrt.f32 %v4001_v5  ;;  %v4002_v53 = vadd.f32 1e-05, %v4000_v62  ;;  %v4198_v5 = vsub.s32 5, %v8093_v17  ;;  %v4193_v62 = vrot.slane %v4163_v43, %v4192_v13  ;;  %v4599_v17 = vld [vmem:[%s8003_s2 + $0x40] ss:$8 sm:$0x3] }
0x1765   :  { %v4332_v13 = vld [vmem:[%s8003_s2 + $0x41] ss:$0 sm:$0xff] }
0x1766   :  { %5573 = vrsqrt.f32 %v4002_v53 }
0x176e   :  { %v5572_v61 = vpop.eup %5571 }
0x176f   :  { %v4005_v42 = vmul.f32 %v5572_v61, %v3989_v31 }
0x1770   :  { %v5574_v37 = vpop.eup %5573 }
0x1771   :  { %v4011_v2 = vmul.f32 %v4010_v0, %v4005_v42  ;;  %v4006_v49 = vmul.f32 %v5574_v37, %v3990_v18 }
0x1773   :  { %v4012_v54 = vmul.f32 %v4010_v0, %v4006_v49  ;;  %v4017_v48 = vadd.f32 %v4016_v36, %v4011_v2  ;;  %v4199_v0 = vrot.slane %v4163_v43, %v4198_v5 }
0x1775   :  { %v4018_v26 = vadd.f32 %v4016_v36, %v4012_v54 }
0x1777   :  { %v4019_v52 = vpack.c.bf16 %v4018_v26, %v4017_v48 }
0x1779   :  { %5108 = vmatmul.mubr.msk.bf16.vlgmr.msra.gmra.mrb[112].mxu0 %vm439_vm2, %v4019_v52 }
0x177a   :  { %5112 = vmatpush3.bf16.msra.mxu0 %v5205_v39  ;;  %5119 = vmatprep.mubr.msk.bf16.mxu0 %vm5603_vm15, %v8088_v27 }
0x177b   :  { %5113 = vmatprep.subr.bf16.mxu0 %v8088_v27 }
0x177e   :  { %5114 = vmatpush3.bf16.msra.mxu0 %v5206_v33 }
0x177f   :  { %5115 = vmatprep.subr.bf16.mxu0 %v8088_v27 }
0x1782   :  { %5116 = vmatpush3.bf16.msra.mxu0 %v5207_v7 }
0x1783   :  { %5117 = vmatprep.subr.bf16.mxu0 %v8088_v27 }
0x1786   :  { %5118 = vmatpush3.bf16.msra.mxu0 %v5208_v22 }
0x1787   :  { %5131 = vmatprep.subr.bf16.mxu0 %v8088_v27 }
0x184c   :  { %v4074_v45 = vpop.f32.mrb[112].mxu0 }
0x184d   :  { %v4075_v6 = vadd.f32 %v4074_v45, %v4024_v57  ;;  %v5109_v11 = vpop.f32.mrb[113].mxu0 }
0x184e   :  { %v4077_v8 = vpop.f32.mrb[114].mxu0 }
0x184f   :  { %v4078_v12 = vadd.f32 %v4077_v8, %v4024_v57  ;;  %v5110_v19 = vpop.f32.mrb[115].mxu0  ;;  %v4081_v29 = vmax.f32 %v4075_v6, 0.0  ;;  %v5209_v8 = vld [vmem:[%s8001_s1 + $0x38] ss:$72 sps:$4 sm:$0xff]  }
0x1850   :  { %v5214_v19 = vld [vmem:[%s8001_s1 + $0xcc] ss:$72 sps:$4 sm:$0xff]  }
0x1851   :  { %v4082_v60 = vmax.f32 %v4078_v12, 0.0  ;;  %v5211_v12 = vld [vmem:[%s8001_s1 + $0x3c] ss:$72 sps:$4 sm:$0xff]  }
0x1852   :  { %4282 = vmatprep.subr.bf16.mxu1 %v5211_v12 }
0x1853   :  { %v4083_v56 = vpack.c.bf16 %v4082_v60, %v4081_v29  ;;  %4283 = vmatpush1.bf16.msra.mxu1 %v5209_v8  ;;  %v5212_v29 = vld [vmem:[%s8001_s1 + $0xc8] ss:$72 sps:$4 sm:$0xff]  }
0x1854   :  { %4284 = vmatprep.subr.bf16.mxu1 %v5214_v19 }
0x1855   :  { %5120 = vmatmul.mubr.msk.bf16.vlgmr.msra.gmra.mrb[116].mxu0 %vm900_vm14, %v4083_v56 }
0x1856   :  { %5135 = vmatprep.mubr.msk.bf16.mxu0 %vm5603_vm15, %v8088_v27 }
0x1857   :  { %4285 = vmatpush1.bf16.msra.mxu1 %v5212_v29 }
0x1858   :  { %5123 = vmatprep.subr.bf16.mxu1 %v8088_v27 }
0x1928   :  { %v4154_v15 = vpop.f32.mrb[116].mxu0 }
0x1929   :  { %v4155_v34 = vadd.f32 %v4154_v15, %v4092_v47  ;;  %v5121_v35 = vpop.f32.mrb[117].mxu0 }
0x192a   :  { %v4157_v50 = vpop.f32.mrb[118].mxu0 }
0x192b   :  { %v4161_v10 = vadd.f32 %v4155_v34, %v4017_v48  ;;  %v4158_v46 = vadd.f32 %v4157_v50, %v4092_v47  ;;  %v5122_v16 = vpop.f32.mrb[119].mxu0  ;;  %v4202_v50 = vld [vmem:[%s8003_s2 + $0x30] sm:$0xc0] }
0x192d   :  { %v4162_v24 = vadd.f32 %v4158_v46, %v4018_v26  ;;  %v4164_v44 = vsel %vm439_vm2, %v4161_v10, 0.0 }
0x192e   :  { %4165 = vadd.xlane.f32.xlu0 %v4164_v44 }
0x192f   :  { %v4167_v1 = vsel %vm439_vm2, %v4162_v24, 0.0 }
0x1930   :  { %4168 = vadd.xlane.f32.xlu1 %v4167_v1 }
0x19bb   :  { %v4166_v25 = vpop.xlane.xlu0 %4165 }
0x19bc   :  { %v4170_v55 = vmul.f32 0.03125, %v4166_v25  ;;  %v4238_v25 = vrot.slane %v4202_v50, %v2483_v32  ;;  %v4256_v32 = vrot.slane %v4599_v17, %v8100_v9  ;;  %v5218_v9 = vld [vmem:[%s8001_s1 + $0xd4] ss:$72 sps:$4 sm:$0xff]  }
0x19bd   :  { %v4169_v4 = vpop.xlane.xlu1 %4168 }
0x19be   :  { %v4172_v63 = vsub.f32 %v4161_v10, %v4170_v55  ;;  %v4171_v41 = vmul.f32 0.03125, %v4169_v4  ;;  %v4232_v10 = vrot.slane %v4202_v50, %v2463_v28  ;;  %v5215_v28 = vld [vmem:[%s8001_s1 + $0x40] ss:$72 sps:$4 sm:$0xff]  }
0x19c0   :  { %v4173_v40 = vsub.f32 %v4162_v24, %v4171_v41  ;;  %v4174_v31 = vmul.f32 %v4172_v63, %v4172_v63 }
0x19c2   :  { %v4176_v20 = vsel %vm439_vm2, %v4174_v31, 0.0  ;;  %v4175_v18 = vmul.f32 %v4173_v40, %v4173_v40 }
0x19c3   :  { %4177 = vadd.xlane.f32.xlu0 %v4176_v20 }
0x19c4   :  { %v4179_v38 = vsel %vm439_vm2, %v4175_v18, 0.0 }
0x19c5   :  { %4180 = vadd.xlane.f32.xlu1 %v4179_v38 }
0x1a50   :  { %v4178_v59 = vpop.xlane.xlu0 %4177 }
0x1a51   :  { %v4182_v21 = vmul.f32 0.03125, %v4178_v59 }
0x1a52   :  { %v4181_v23 = vpop.xlane.xlu1 %4180 }
0x1a53   :  { %v4184_v51 = vadd.f32 1e-05, %v4182_v21  ;;  %v4183_v30 = vmul.f32 0.03125, %v4181_v23 }
0x1a55   :  { %5575 = vrsqrt.f32 %v4184_v51  ;;  %v4185_v58 = vadd.f32 1e-05, %v4183_v30 }
0x1a57   :  { %5577 = vrsqrt.f32 %v4185_v58  ;;  %v5217_v58 = vld [vmem:[%s8001_s1 + $0x44] ss:$72 sps:$4 sm:$0xff]  }
0x1a58   :  { %5132 = vmatpush3.bf16.msra.mxu0 %v5217_v58 }
0x1a59   :  { %5133 = vmatprep.subr.bf16.mxu0 %v8088_v27 }
0x1a5c   :  { %5134 = vmatpush3.bf16.msra.mxu0 %v5218_v9 }
0x1a5f   :  { %v5576_v53 = vpop.eup %5575 }
0x1a60   :  { %v4188_v14 = vmul.f32 %v5576_v53, %v4172_v63 }
0x1a61   :  { %v5578_v61 = vpop.eup %5577 }
0x1a62   :  { %v4194_v42 = vmul.f32 %v4193_v62, %v4188_v14  ;;  %v4189_v37 = vmul.f32 %v5578_v61, %v4173_v40  ;;  %v5216_v40 = vld [vmem:[%s8001_s1 + $0xd0] ss:$72 sps:$4 sm:$0xff]  }
0x1a64   :  { %v4200_v2 = vadd.f32 %v4199_v0, %v4194_v42  ;;  %v4195_v49 = vmul.f32 %v4193_v62, %v4189_v37 }
0x1a66   :  { %v4203_v36 = vsel %vm439_vm2, %v4200_v2, 0.0  ;;  %v4201_v54 = vadd.f32 %v4199_v0, %v4195_v49 }
0x1a67   :  { %4204 = vadd.xlane.f32.xlu0 %v4203_v36 }
0x1a68   :  { %v4206_v48 = vsel %vm439_vm2, %v4201_v54, 0.0 }
0x1a69   :  { %4207 = vadd.xlane.f32.xlu1 %v4206_v48 }
0x1af4   :  { %v4205_v26 = vpop.xlane.xlu0 %4204 }
0x1af5   :  { %v4209_v39 = vmul.f32 0.03125, %v4205_v26 }
0x1af6   :  { %v4208_v52 = vpop.xlane.xlu1 %4207 }
0x1af7   :  { %v4211_v33 = vsub.f32 %v4200_v2, %v4209_v39  ;;  %v4210_v7 = vmul.f32 0.03125, %v4208_v52 }
0x1af9   :  { %v4212_v22 = vsub.f32 %v4201_v54, %v4210_v7  ;;  %v4213_v57 = vmul.f32 %v4211_v33, %v4211_v33 }
0x1afb   :  { %v4215_v45 = vsel %vm439_vm2, %v4213_v57, 0.0  ;;  %v4214_v6 = vmul.f32 %v4212_v22, %v4212_v22 }
0x1afc   :  { %4216 = vadd.xlane.f32.xlu0 %v4215_v45  ;;  %v4252_v45 = vrot.slane %v4599_v17, %v8099_v3 }
0x1afd   :  { %v4218_v11 = vsel %vm439_vm2, %v4214_v6, 0.0  ;;  %v8101_v6 = vld [vmem:[#allocation18_spill] sm:$0xff] }
0x1afe   :  { %4219 = vadd.xlane.f32.xlu1 %v4218_v11  ;;  %vm4465_vm0 = vcmp.lt.s32.totalorder %v8101_v6, 5 }
0x1b89   :  { %v4217_v60 = vpop.xlane.xlu0 %4216 }
0x1b8a   :  { %v4221_v56 = vmul.f32 0.03125, %v4217_v60 }
0x1b8b   :  { %v4220_v47 = vpop.xlane.xlu1 %4219 }
0x1b8c   :  { %v4223_v15 = vadd.f32 1e-05, %v4221_v56  ;;  %v4222_v34 = vmul.f32 0.03125, %v4220_v47 }
0x1b8e   :  { %5579 = vrsqrt.f32 %v4223_v15  ;;  %v4224_v35 = vadd.f32 1e-05, %v4222_v34 }
0x1b90   :  { %5581 = vrsqrt.f32 %v4224_v35 }
0x1b98   :  { %v5580_v46 = vpop.eup %5579 }
0x1b99   :  { %v4227_v16 = vmul.f32 %v5580_v46, %v4211_v33 }
0x1b9a   :  { %v5582_v24 = vpop.eup %5581 }
0x1b9b   :  { %v4233_v44 = vmul.f32 %v4232_v10, %v4227_v16  ;;  %v4228_v1 = vmul.f32 %v5582_v24, %v4212_v22 }
0x1b9d   :  { %v4234_v55 = vmul.f32 %v4232_v10, %v4228_v1  ;;  %v4239_v4 = vadd.f32 %v4238_v25, %v4233_v44 }
0x1b9f   :  { %v4240_v63 = vadd.f32 %v4238_v25, %v4234_v55 }
0x1ba1   :  { %v4241_v41 = vpack.c.bf16 %v4240_v63, %v4239_v4 }
0x1ba3   :  { %4604 = vmatmul.mubr.msk.bf16.vlgmr.msra.gmra.mrb[136].mxu1 %vm439_vm2, %v4241_v41 }
0x1ba4   :  { %5127 = vmatprep.mubr.msk.bf16.mxu1 %vm5603_vm15, %v8088_v27  ;;  %5124 = vmatpush3.bf16.msra.mxu1 %v5215_v28 }
0x1ba5   :  { %5125 = vmatprep.subr.bf16.mxu1 %v8088_v27  ;;  %v4396_v27 = vld [vmem:[%s8003_s2 + $0x42] ss:$0 sm:$0xff] }
0x1ba8   :  { %5126 = vmatpush3.bf16.msra.mxu1 %v5216_v40 }
0x1c76   :  { %v4316_v31 = vpop.f32.mrb[136].mxu1 }
0x1c77   :  { %v4318_v20 = vpop.f32.mrb[137].mxu1  ;;  %v4317_v11 = vadd.f32 %v4316_v31, %v4252_v45 }
0x1c78   :  { %v4319_v18 = vadd.f32 %v4318_v20, %v4256_v32  ;;  %v4320_v38 = vpop.f32.mrb[138].mxu1 }
0x1c79   :  { %v4322_v59 = vpop.f32.mrb[139].mxu1  ;;  %v4321_v12 = vadd.f32 %v4320_v38, %v4252_v45 }
0x1c7a   :  { %v4323_v21 = vadd.f32 %v4322_v59, %v4256_v32  ;;  %v4325_v23 = vmax.f32 %v4319_v18, 0.0 }
0x1c7c   :  { %v4326_v51 = vmax.f32 %v4323_v21, 0.0 }
0x1c7e   :  { %v4327_v30 = vpack.c.bf16 %v4326_v51, %v4325_v23 }
0x1c80   :  { %5128 = vmatmul.mubr.msk.bf16.vlgmr.msra.gmra.mrb[140].mxu1 %vm439_vm2, %v4327_v30 }
0x1d53   :  { %v4382_v43 = vpop.f32.mrb[140].mxu1 }
0x1d54   :  { %v4383_v5 = vadd.f32 %v4382_v43, %v4332_v13  ;;  %v5129_v62 = vpop.f32.mrb[141].mxu1 }
0x1d55   :  { %v4385_v53 = vpop.f32.mrb[142].mxu1 }
0x1d56   :  { %v4386_v14 = vadd.f32 %v4385_v53, %v4332_v13  ;;  %v5130_v0 = vpop.f32.mrb[143].mxu1  ;;  %v4389_v61 = vmax.f32 %v4383_v5, 0.0 }
0x1d58   :  { %v4390_v42 = vmax.f32 %v4386_v14, 0.0 }
0x1d5a   :  { %v4391_v37 = vpack.c.bf16 %v4390_v42, %v4389_v61 }
0x1d5c   :  { %5136 = vmatmul.mubr.msk.bf16.vlgmr.msra.gmra.mrb[120].mxu0 %vm439_vm2, %v4391_v37 }
0x1e2f   :  { %v4446_v2 = vpop.f32.mrb[120].mxu0 }
0x1e30   :  { %v4447_v49 = vadd.f32 %v4446_v2, %v4396_v27  ;;  %v5137_v36 = vpop.f32.mrb[121].mxu0 }
0x1e31   :  { %v4449_v54 = vpop.f32.mrb[122].mxu0 }
0x1e32   :  { %v4611_v48 = vmul.f32 -1.442695, %v4447_v49  ;;  %v4450_v26 = vadd.f32 %v4449_v54, %v4396_v27  ;;  %v5138_v39 = vpop.f32.mrb[123].mxu0 }
0x1e34   :  { %5583 = vpow2.f32 %v4611_v48  ;;  %v4612_v52 = vmul.f32 -1.442695, %v4450_v26 }
0x1e36   :  { %5585 = vpow2.f32 %v4612_v52 }
0x1e3e   :  { %v5584_v33 = vpop.eup %5583 }
0x1e3f   :  { %v4459_v7 = vadd.f32 1.0, %v5584_v33 }
0x1e40   :  { %v5586_v22 = vpop.eup %5585 }
0x1e41   :  { %5587 = vrcp.f32 %v4459_v7  ;;  %v4460_v57 = vadd.f32 1.0, %v5586_v22 }
0x1e43   :  { %5589 = vrcp.f32 %v4460_v57 }
0x1e4b   :  { %v5588_v8 = vpop.eup %5587 }
0x1e4c   :  { %v4468_v19 = vsel %vm4465_vm0, %v4317_v11, %v5588_v8 }
0x1e4d   :  { %v5590_v29 = vpop.eup %5589  ;;  %4470 = vst [vmem:[%s8005_s4] sm:$0xff] %v4468_v19 }
0x1e4e   :  { %v4469_v60 = vsel %vm4465_vm0, %v4321_v12, %v5590_v29 }
0x1e4f   :  { %4471 = vst [vmem:[%s8005_s4 + $0x8] sm:$0xff] %v4469_v60 }

</bundles_post_ra>
